<compile_context>
chip_gen: v7x
topology: tpu7x:2x2x1
jax: 0.10.0
libtpu: 0.0.40
codegen_flags: <defaults>
</compile_context>

<pallas_src>
import jax
import jax.numpy as jnp
import numpy as np
from jax.experimental import pallas as pl
from jax.experimental.pallas import tpu as pltpu


def _make_pm_kernel(C: int):
    inv_sqrt_c = 1.0 / (C ** 0.5)

    def kernel(xu_full_ref, xu_tile_ref, q_ref, out_ref):
        xu_full = xu_full_ref[0]          # (D, L)   raw unfold, features on sublanes
        xu_tile = xu_tile_ref[0]          # (D, TL)  raw unfold, this row tile
        q = q_ref[0]                      # (C, TL)  query (= x), positions on lanes
        D, L = xu_full.shape
        TL = xu_tile.shape[1]

        # F.normalize(x_unfold, dim=1): rsqrt on the EUP instead of sqrt + divide.
        xun = xu_full * jax.lax.rsqrt(
            jnp.maximum(jnp.sum(xu_full * xu_full, axis=0, keepdims=True), 1e-24))
        xun_t = xu_tile * jax.lax.rsqrt(
            jnp.maximum(jnp.sum(xu_tile * xu_tile, axis=0, keepdims=True), 1e-24))

        # R[n, p] = <xun_t[:, n], xun[:, p]> : cosine-similarity row tile (TL, L).
        # Kept f32 on the MXU so near-equal similarities don't flip the top-3.
        R = jax.lax.dot_general(xun_t, xun, (((0,), (0,)), ((), ())),
                                preferred_element_type=jnp.float32)        # (TL, L)

        col = jax.lax.broadcasted_iota(jnp.int32, (TL, L), 1)

        # Iterative top-3 over candidates (lane axis), min-index tie break.
        # Gather the 3 selected normalized patches with per-tile one-hot matmuls:
        #   G_m[d, n] = xun[d, idx_m[n]]        (D, TL)
        Rw = R
        gathers = []
        for m in range(3):
            mx = jnp.max(Rw, axis=1, keepdims=True)                        # (TL, 1)
            idx = jnp.min(jnp.where(Rw == mx, col, L), axis=1, keepdims=True)
            hit = col == idx                                               # (TL, L)
            G = jax.lax.dot_general(xun, hit.astype(jnp.float32),
                                    (((1,), (1,)), ((), ())),
                                    preferred_element_type=jnp.float32)    # (D, TL)
            gathers.append(G)
            if m < 2:
                Rw = jnp.where(hit, -jnp.inf, Rw)

        # Attention: K[n, m*9+i, j] = G_m[i*C + j, n]  (the module's "scrambled"
        # C*9 -> (9, C) reshape).  With positions on lanes, each q.K dot product
        # is a tiny segment sum over C sublanes -- no padded MXU projections.
        g_slices = [[G[i * C:(i + 1) * C, :] for i in range(9)] for G in gathers]
        scores = [[jnp.sum(q * g, axis=0, keepdims=True) * inv_sqrt_c      # (1, TL)
                   for g in row] for row in g_slices]

        # softmax over the 27 slots (piecewise; never materializes (L, 27))
        smax = scores[0][0]
        for row in scores:
            for s in row:
                smax = jnp.maximum(smax, s)
        exps = [[jnp.exp(s - smax) for s in row] for row in scores]
        denom = jnp.zeros_like(smax)
        for row in exps:
            for e in row:
                denom = denom + e
        # 1/denom on the EUP; one Newton step keeps full f32 accuracy.
        r = pl.reciprocal(denom, approx=True)
        inv_denom = r * (2.0 - denom * r)

        # weighted sum of the gathered (normalized) patches -> (C, TL)
        acc = jnp.zeros((C, TL), jnp.float32)
        for m in range(3):
            for i in range(9):
                acc = acc + exps[m][i] * g_slices[m][i]

        out_ref[0] = (acc * inv_denom).astype(out_ref.dtype)

    return kernel


def _unfold_3x3(x):
    """F.unfold(x, kernel_size=3, padding=1) -> (B, C*9, H*W), d = c*9 + slot."""
    B, C, H, W = x.shape
    xp = jnp.pad(x, ((0, 0), (0, 0), (1, 1), (1, 1)))
    cols = [xp[:, :, dh:dh + H, dw:dw + W] for dh in range(3) for dw in range(3)]
    patches = jnp.stack(cols, axis=2)                 # (B, C, 9, H, W)
    return patches.reshape(B, C * 9, H * W)


def patch_match(x):
    """Pallas implementation of PatchMatch.forward.  x: (B, C, H, W) float32."""
    B, C, H, W = x.shape
    L = H * W
    D = C * 9

    x = x.astype(jnp.float32)
    xu = _unfold_3x3(x)                  # (B, D, L) feature-on-sublanes, no transpose
    q = x.reshape(B, C, L)               # (B, C, L)

    TL = 128 if (L % 128 == 0) else L    # lane-aligned row tile of the similarity matrix
    nT = L // TL

    grid_spec = pltpu.PrefetchScalarGridSpec(
        num_scalar_prefetch=0,
        grid=(B, nT),
        in_specs=[
            # full unfolded tensor, resident per batch (index_map ignores the tile axis)
            pl.BlockSpec((1, D, L), lambda b, t: (b, 0, 0)),
            # row tile of the unfolded tensor (the R-row queries)
            pl.BlockSpec((1, D, TL), lambda b, t: (b, 0, t)),
            # query tile
            pl.BlockSpec((1, C, TL), lambda b, t: (b, 0, t)),
        ],
        out_specs=pl.BlockSpec((1, C, TL), lambda b, t: (b, 0, t)),
    )

    out = pl.pallas_call(
        _make_pm_kernel(C),
        out_shape=jax.ShapeDtypeStruct((B, C, L), jnp.float32),
        grid_spec=grid_spec,
        compiler_params=pltpu.CompilerParams(
            dimension_semantics=("parallel", "parallel"),
            vmem_limit_bytes=32 * 1024 * 1024),
    )(xu, xu, q)

    return out.reshape(B, C, H, W)       # channels already leading: no final transpose


def patch_match_ref(x):
    """Pure-JAX reference mirroring the PyTorch forward (same tie-break rule)."""
    B, C, H, W = x.shape
    L = H * W
    xu = _unfold_3x3(x)                                                    # (B, D, L)
    norm = jnp.sqrt(jnp.sum(xu * xu, axis=1, keepdims=True))
    xun = xu / jnp.maximum(norm, 1e-12)
    R = jnp.einsum('bdn,bdm->bnm', xun, xun,
                   precision=jax.lax.Precision.HIGHEST)                    # (B, L, L)
    col = jnp.arange(L)[None, None, :]
    Rw = R
    idxs = []
    for _ in range(3):
        mx = jnp.max(Rw, axis=2, keepdims=True)
        idx = jnp.min(jnp.where(Rw == mx, col, L), axis=2)                 # (B, L)
        idxs.append(idx)
        Rw = jnp.where(col == idx[..., None], -jnp.inf, Rw)

    def gather(idx):
        g = jnp.take_along_axis(xun, idx[:, None, :], axis=2)              # (B, D, L)
        return jnp.transpose(g, (0, 2, 1)).reshape(B, L, 9, C)

    K = jnp.concatenate([gather(i) for i in idxs], axis=2)                 # (B, L, 27, C)
    Q = jnp.transpose(x.reshape(B, C, L), (0, 2, 1))
    scores = jnp.einsum('bnc,bnkc->bnk', Q, K,
                        precision=jax.lax.Precision.HIGHEST) / (C ** 0.5)
    w = jax.nn.softmax(scores, axis=2)
    out = jnp.einsum('bnk,bnkc->bnc', w, K,
                     precision=jax.lax.Precision.HIGHEST)
    return jnp.transpose(out.reshape(B, H, W, C), (0, 3, 1, 2))


if __name__ == "__main__":
    key = jax.random.PRNGKey(0)
    x = jax.random.normal(key, (2, 4, 16, 16), dtype=jnp.float32)

    out = patch_match(x)
    jax.block_until_ready(out)

    ref = patch_match_ref(x)
    err = np.abs(np.asarray(out) - np.asarray(ref))
    # 99th percentile tolerance: robust to the (very rare) top-k tie flips that
    # can arise from MXU-vs-XLA rounding on near-equal similarities.
    assert float(np.quantile(err, 0.99)) < 1e-3, float(np.quantile(err, 0.99))
    assert out.shape == x.shape and out.dtype == jnp.float32

    print("KERNEL_OK")
</pallas_src>

<mosaic_0001>
module attributes {stable_mosaic.version = 11 : i64} {
  func.func @kernel(%arg0: i32, %arg1: i32, %arg2: memref<1x36x256xf32, #tpu.memory_space<vmem>>, %arg3: memref<1x36x128xf32, #tpu.memory_space<vmem>>, %arg4: memref<1x4x128xf32, #tpu.memory_space<vmem>>, %arg5: memref<1x4x128xf32, #tpu.memory_space<vmem>>) attributes {dimension_semantics = [#tpu.dimension_semantics<parallel>, #tpu.dimension_semantics<parallel>], iteration_bounds = array<i64: 2, 2>, scalar_prefetch = 0 : i64, scratch_operands = 0 : i64, tpu.core_type = #tpu.core_type<tc>, window_params = [{transform_indices = @transform_0, window_bounds = array<i64: 1, 36, 256>}, {transform_indices = @transform_1, window_bounds = array<i64: 1, 36, 128>}, {transform_indices = @transform_2, window_bounds = array<i64: 1, 4, 128>}, {transform_indices = @transform_3, window_bounds = array<i64: 1, 4, 128>}]} {
    %c0 = arith.constant 0 : index
    %c0_0 = arith.constant 0 : index
    %c0_1 = arith.constant 0 : index
    %0 = vector.load %arg2[%c0, %c0_0, %c0_1] : memref<1x36x256xf32, #tpu.memory_space<vmem>>, vector<1x36x256xf32>
    %1 = vector.shape_cast %0 : vector<1x36x256xf32> to vector<36x256xf32>
    %c0_2 = arith.constant 0 : index
    %c0_3 = arith.constant 0 : index
    %c0_4 = arith.constant 0 : index
    %2 = vector.load %arg3[%c0_2, %c0_3, %c0_4] : memref<1x36x128xf32, #tpu.memory_space<vmem>>, vector<1x36x128xf32>
    %3 = vector.shape_cast %2 : vector<1x36x128xf32> to vector<36x128xf32>
    %c0_5 = arith.constant 0 : index
    %c0_6 = arith.constant 0 : index
    %c0_7 = arith.constant 0 : index
    %4 = vector.load %arg4[%c0_5, %c0_6, %c0_7] : memref<1x4x128xf32, #tpu.memory_space<vmem>>, vector<1x4x128xf32>
    %5 = vector.shape_cast %4 : vector<1x4x128xf32> to vector<4x128xf32>
    %6 = arith.mulf %1, %1 : vector<36x256xf32>
    %cst = arith.constant dense<0.000000e+00> : vector<256xf32>
    %7 = vector.multi_reduction <add>, %6, %cst [0] : vector<36x256xf32> to vector<256xf32>
    %8 = vector.shape_cast %7 : vector<256xf32> to vector<1x256xf32>
    %cst_8 = arith.constant 1.000000e-24 : f32
    %9 = vector.broadcast %cst_8 : f32 to vector<1x256xf32>
    %10 = arith.maximumf %8, %9 : vector<1x256xf32>
    %11 = math.rsqrt %10 : vector<1x256xf32>
    %12 = vector.broadcast %11 : vector<1x256xf32> to vector<36x256xf32>
    %13 = arith.mulf %1, %12 : vector<36x256xf32>
    %14 = arith.mulf %3, %3 : vector<36x128xf32>
    %cst_9 = arith.constant dense<0.000000e+00> : vector<128xf32>
    %15 = vector.multi_reduction <add>, %14, %cst_9 [0] : vector<36x128xf32> to vector<128xf32>
    %16 = vector.shape_cast %15 : vector<128xf32> to vector<1x128xf32>
    %cst_10 = arith.constant 1.000000e-24 : f32
    %17 = vector.broadcast %cst_10 : f32 to vector<1x128xf32>
    %18 = arith.maximumf %16, %17 : vector<1x128xf32>
    %19 = math.rsqrt %18 : vector<1x128xf32>
    %20 = vector.broadcast %19 : vector<1x128xf32> to vector<36x128xf32>
    %21 = arith.mulf %3, %20 : vector<36x128xf32>
    %cst_11 = arith.constant dense<0.000000e+00> : vector<128x256xf32>
    %22 = tpu.matmul %21, %13, %cst_11 {dimension_numbers = #tpu.dot_dimension_numbers<[0], [0], [1], [1], [0, 1, 1, 1], [], []>} : vector<36x128xf32>, vector<36x256xf32>, vector<128x256xf32> -> vector<128x256xf32>
    %23 = tpu.iota {dimensions = array<i32: 1>} : vector<128x256xi32>
    %cst_12 = arith.constant dense<0xFF800000> : vector<128xf32>
    %24 = vector.multi_reduction <maximumf>, %22, %cst_12 [1] : vector<128x256xf32> to vector<128xf32>
    %25 = vector.shape_cast %24 : vector<128xf32> to vector<128x1xf32>
    %26 = vector.broadcast %25 : vector<128x1xf32> to vector<128x256xf32>
    %27 = arith.cmpf oeq, %22, %26 : vector<128x256xf32>
    %c256_i32 = arith.constant 256 : i32
    %28 = vector.broadcast %c256_i32 : i32 to vector<128x256xi32>
    %29 = arith.select %27, %23, %28 : vector<128x256xi1>, vector<128x256xi32>
    %cst_13 = arith.constant dense<2147483647> : vector<128xi32>
    %30 = vector.multi_reduction <minsi>, %29, %cst_13 [1] : vector<128x256xi32> to vector<128xi32>
    %31 = vector.shape_cast %30 : vector<128xi32> to vector<128x1xi32>
    %32 = vector.broadcast %31 : vector<128x1xi32> to vector<128x256xi32>
    %33 = arith.cmpi eq, %23, %32 : vector<128x256xi32>
    %34 = arith.extui %33 : vector<128x256xi1> to vector<128x256xi32>
    %35 = arith.sitofp %34 : vector<128x256xi32> to vector<128x256xf32>
    %cst_14 = arith.constant dense<0.000000e+00> : vector<36x128xf32>
    %36 = tpu.matmul %13, %35, %cst_14 {dimension_numbers = #tpu.dot_dimension_numbers<[1], [1], [0], [0], [0, 0, 1, 0], [], []>} : vector<36x256xf32>, vector<128x256xf32>, vector<36x128xf32> -> vector<36x128xf32>
    %cst_15 = arith.constant 0xFF800000 : f32
    %37 = vector.broadcast %cst_15 : f32 to vector<128x256xf32>
    %38 = arith.select %33, %37, %22 : vector<128x256xi1>, vector<128x256xf32>
    %cst_16 = arith.constant dense<0xFF800000> : vector<128xf32>
    %39 = vector.multi_reduction <maximumf>, %38, %cst_16 [1] : vector<128x256xf32> to vector<128xf32>
    %40 = vector.shape_cast %39 : vector<128xf32> to vector<128x1xf32>
    %41 = vector.broadcast %40 : vector<128x1xf32> to vector<128x256xf32>
    %42 = arith.cmpf oeq, %38, %41 : vector<128x256xf32>
    %c256_i32_17 = arith.constant 256 : i32
    %43 = vector.broadcast %c256_i32_17 : i32 to vector<128x256xi32>
    %44 = arith.select %42, %23, %43 : vector<128x256xi1>, vector<128x256xi32>
    %cst_18 = arith.constant dense<2147483647> : vector<128xi32>
    %45 = vector.multi_reduction <minsi>, %44, %cst_18 [1] : vector<128x256xi32> to vector<128xi32>
    %46 = vector.shape_cast %45 : vector<128xi32> to vector<128x1xi32>
    %47 = vector.broadcast %46 : vector<128x1xi32> to vector<128x256xi32>
    %48 = arith.cmpi eq, %23, %47 : vector<128x256xi32>
    %49 = arith.extui %48 : vector<128x256xi1> to vector<128x256xi32>
    %50 = arith.sitofp %49 : vector<128x256xi32> to vector<128x256xf32>
    %cst_19 = arith.constant dense<0.000000e+00> : vector<36x128xf32>
    %51 = tpu.matmul %13, %50, %cst_19 {dimension_numbers = #tpu.dot_dimension_numbers<[1], [1], [0], [0], [0, 0, 1, 0], [], []>} : vector<36x256xf32>, vector<128x256xf32>, vector<36x128xf32> -> vector<36x128xf32>
    %cst_20 = arith.constant 0xFF800000 : f32
    %52 = vector.broadcast %cst_20 : f32 to vector<128x256xf32>
    %53 = arith.select %48, %52, %38 : vector<128x256xi1>, vector<128x256xf32>
    %cst_21 = arith.constant dense<0xFF800000> : vector<128xf32>
    %54 = vector.multi_reduction <maximumf>, %53, %cst_21 [1] : vector<128x256xf32> to vector<128xf32>
    %55 = vector.shape_cast %54 : vector<128xf32> to vector<128x1xf32>
    %56 = vector.broadcast %55 : vector<128x1xf32> to vector<128x256xf32>
    %57 = arith.cmpf oeq, %53, %56 : vector<128x256xf32>
    %c256_i32_22 = arith.constant 256 : i32
    %58 = vector.broadcast %c256_i32_22 : i32 to vector<128x256xi32>
    %59 = arith.select %57, %23, %58 : vector<128x256xi1>, vector<128x256xi32>
    %cst_23 = arith.constant dense<2147483647> : vector<128xi32>
    %60 = vector.multi_reduction <minsi>, %59, %cst_23 [1] : vector<128x256xi32> to vector<128xi32>
    %61 = vector.shape_cast %60 : vector<128xi32> to vector<128x1xi32>
    %62 = vector.broadcast %61 : vector<128x1xi32> to vector<128x256xi32>
    %63 = arith.cmpi eq, %23, %62 : vector<128x256xi32>
    %64 = arith.extui %63 : vector<128x256xi1> to vector<128x256xi32>
    %65 = arith.sitofp %64 : vector<128x256xi32> to vector<128x256xf32>
    %cst_24 = arith.constant dense<0.000000e+00> : vector<36x128xf32>
    %66 = tpu.matmul %13, %65, %cst_24 {dimension_numbers = #tpu.dot_dimension_numbers<[1], [1], [0], [0], [0, 0, 1, 0], [], []>} : vector<36x256xf32>, vector<128x256xf32>, vector<36x128xf32> -> vector<36x128xf32>
    %67 = vector.extract_strided_slice %36 {offsets = [0, 0], sizes = [4, 128], strides = [1, 1]} : vector<36x128xf32> to vector<4x128xf32>
    %68 = vector.extract_strided_slice %36 {offsets = [4, 0], sizes = [4, 128], strides = [1, 1]} : vector<36x128xf32> to vector<4x128xf32>
    %69 = vector.extract_strided_slice %36 {offsets = [8, 0], sizes = [4, 128], strides = [1, 1]} : vector<36x128xf32> to vector<4x128xf32>
    %70 = vector.extract_strided_slice %36 {offsets = [12, 0], sizes = [4, 128], strides = [1, 1]} : vector<36x128xf32> to vector<4x128xf32>
    %71 = vector.extract_strided_slice %36 {offsets = [16, 0], sizes = [4, 128], strides = [1, 1]} : vector<36x128xf32> to vector<4x128xf32>
    %72 = vector.extract_strided_slice %36 {offsets = [20, 0], sizes = [4, 128], strides = [1, 1]} : vector<36x128xf32> to vector<4x128xf32>
    %73 = vector.extract_strided_slice %36 {offsets = [24, 0], sizes = [4, 128], strides = [1, 1]} : vector<36x128xf32> to vector<4x128xf32>
    %74 = vector.extract_strided_slice %36 {offsets = [28, 0], sizes = [4, 128], strides = [1, 1]} : vector<36x128xf32> to vector<4x128xf32>
    %75 = vector.extract_strided_slice %36 {offsets = [32, 0], sizes = [4, 128], strides = [1, 1]} : vector<36x128xf32> to vector<4x128xf32>
    %76 = vector.extract_strided_slice %51 {offsets = [0, 0], sizes = [4, 128], strides = [1, 1]} : vector<36x128xf32> to vector<4x128xf32>
    %77 = vector.extract_strided_slice %51 {offsets = [4, 0], sizes = [4, 128], strides = [1, 1]} : vector<36x128xf32> to vector<4x128xf32>
    %78 = vector.extract_strided_slice %51 {offsets = [8, 0], sizes = [4, 128], strides = [1, 1]} : vector<36x128xf32> to vector<4x128xf32>
    %79 = vector.extract_strided_slice %51 {offsets = [12, 0], sizes = [4, 128], strides = [1, 1]} : vector<36x128xf32> to vector<4x128xf32>
    %80 = vector.extract_strided_slice %51 {offsets = [16, 0], sizes = [4, 128], strides = [1, 1]} : vector<36x128xf32> to vector<4x128xf32>
    %81 = vector.extract_strided_slice %51 {offsets = [20, 0], sizes = [4, 128], strides = [1, 1]} : vector<36x128xf32> to vector<4x128xf32>
    %82 = vector.extract_strided_slice %51 {offsets = [24, 0], sizes = [4, 128], strides = [1, 1]} : vector<36x128xf32> to vector<4x128xf32>
    %83 = vector.extract_strided_slice %51 {offsets = [28, 0], sizes = [4, 128], strides = [1, 1]} : vector<36x128xf32> to vector<4x128xf32>
    %84 = vector.extract_strided_slice %51 {offsets = [32, 0], sizes = [4, 128], strides = [1, 1]} : vector<36x128xf32> to vector<4x128xf32>
    %85 = vector.extract_strided_slice %66 {offsets = [0, 0], sizes = [4, 128], strides = [1, 1]} : vector<36x128xf32> to vector<4x128xf32>
    %86 = vector.extract_strided_slice %66 {offsets = [4, 0], sizes = [4, 128], strides = [1, 1]} : vector<36x128xf32> to vector<4x128xf32>
    %87 = vector.extract_strided_slice %66 {offsets = [8, 0], sizes = [4, 128], strides = [1, 1]} : vector<36x128xf32> to vector<4x128xf32>
    %88 = vector.extract_strided_slice %66 {offsets = [12, 0], sizes = [4, 128], strides = [1, 1]} : vector<36x128xf32> to vector<4x128xf32>
    %89 = vector.extract_strided_slice %66 {offsets = [16, 0], sizes = [4, 128], strides = [1, 1]} : vector<36x128xf32> to vector<4x128xf32>
    %90 = vector.extract_strided_slice %66 {offsets = [20, 0], sizes = [4, 128], strides = [1, 1]} : vector<36x128xf32> to vector<4x128xf32>
    %91 = vector.extract_strided_slice %66 {offsets = [24, 0], sizes = [4, 128], strides = [1, 1]} : vector<36x128xf32> to vector<4x128xf32>
    %92 = vector.extract_strided_slice %66 {offsets = [28, 0], sizes = [4, 128], strides = [1, 1]} : vector<36x128xf32> to vector<4x128xf32>
    %93 = vector.extract_strided_slice %66 {offsets = [32, 0], sizes = [4, 128], strides = [1, 1]} : vector<36x128xf32> to vector<4x128xf32>
    %94 = arith.mulf %5, %67 : vector<4x128xf32>
    %cst_25 = arith.constant dense<0.000000e+00> : vector<128xf32>
    %95 = vector.multi_reduction <add>, %94, %cst_25 [0] : vector<4x128xf32> to vector<128xf32>
    %96 = vector.shape_cast %95 : vector<128xf32> to vector<1x128xf32>
    %cst_26 = arith.constant 5.000000e-01 : f32
    %97 = vector.broadcast %cst_26 : f32 to vector<1x128xf32>
    %98 = arith.mulf %96, %97 : vector<1x128xf32>
    %99 = arith.mulf %5, %68 : vector<4x128xf32>
    %cst_27 = arith.constant dense<0.000000e+00> : vector<128xf32>
    %100 = vector.multi_reduction <add>, %99, %cst_27 [0] : vector<4x128xf32> to vector<128xf32>
    %101 = vector.shape_cast %100 : vector<128xf32> to vector<1x128xf32>
    %cst_28 = arith.constant 5.000000e-01 : f32
    %102 = vector.broadcast %cst_28 : f32 to vector<1x128xf32>
    %103 = arith.mulf %101, %102 : vector<1x128xf32>
    %104 = arith.mulf %5, %69 : vector<4x128xf32>
    %cst_29 = arith.constant dense<0.000000e+00> : vector<128xf32>
    %105 = vector.multi_reduction <add>, %104, %cst_29 [0] : vector<4x128xf32> to vector<128xf32>
    %106 = vector.shape_cast %105 : vector<128xf32> to vector<1x128xf32>
    %cst_30 = arith.constant 5.000000e-01 : f32
    %107 = vector.broadcast %cst_30 : f32 to vector<1x128xf32>
    %108 = arith.mulf %106, %107 : vector<1x128xf32>
    %109 = arith.mulf %5, %70 : vector<4x128xf32>
    %cst_31 = arith.constant dense<0.000000e+00> : vector<128xf32>
    %110 = vector.multi_reduction <add>, %109, %cst_31 [0] : vector<4x128xf32> to vector<128xf32>
    %111 = vector.shape_cast %110 : vector<128xf32> to vector<1x128xf32>
    %cst_32 = arith.constant 5.000000e-01 : f32
    %112 = vector.broadcast %cst_32 : f32 to vector<1x128xf32>
    %113 = arith.mulf %111, %112 : vector<1x128xf32>
    %114 = arith.mulf %5, %71 : vector<4x128xf32>
    %cst_33 = arith.constant dense<0.000000e+00> : vector<128xf32>
    %115 = vector.multi_reduction <add>, %114, %cst_33 [0] : vector<4x128xf32> to vector<128xf32>
    %116 = vector.shape_cast %115 : vector<128xf32> to vector<1x128xf32>
    %cst_34 = arith.constant 5.000000e-01 : f32
    %117 = vector.broadcast %cst_34 : f32 to vector<1x128xf32>
    %118 = arith.mulf %116, %117 : vector<1x128xf32>
    %119 = arith.mulf %5, %72 : vector<4x128xf32>
    %cst_35 = arith.constant dense<0.000000e+00> : vector<128xf32>
    %120 = vector.multi_reduction <add>, %119, %cst_35 [0] : vector<4x128xf32> to vector<128xf32>
    %121 = vector.shape_cast %120 : vector<128xf32> to vector<1x128xf32>
    %cst_36 = arith.constant 5.000000e-01 : f32
    %122 = vector.broadcast %cst_36 : f32 to vector<1x128xf32>
    %123 = arith.mulf %121, %122 : vector<1x128xf32>
    %124 = arith.mulf %5, %73 : vector<4x128xf32>
    %cst_37 = arith.constant dense<0.000000e+00> : vector<128xf32>
    %125 = vector.multi_reduction <add>, %124, %cst_37 [0] : vector<4x128xf32> to vector<128xf32>
    %126 = vector.shape_cast %125 : vector<128xf32> to vector<1x128xf32>
    %cst_38 = arith.constant 5.000000e-01 : f32
    %127 = vector.broadcast %cst_38 : f32 to vector<1x128xf32>
    %128 = arith.mulf %126, %127 : vector<1x128xf32>
    %129 = arith.mulf %5, %74 : vector<4x128xf32>
    %cst_39 = arith.constant dense<0.000000e+00> : vector<128xf32>
    %130 = vector.multi_reduction <add>, %129, %cst_39 [0] : vector<4x128xf32> to vector<128xf32>
    %131 = vector.shape_cast %130 : vector<128xf32> to vector<1x128xf32>
    %cst_40 = arith.constant 5.000000e-01 : f32
    %132 = vector.broadcast %cst_40 : f32 to vector<1x128xf32>
    %133 = arith.mulf %131, %132 : vector<1x128xf32>
    %134 = arith.mulf %5, %75 : vector<4x128xf32>
    %cst_41 = arith.constant dense<0.000000e+00> : vector<128xf32>
    %135 = vector.multi_reduction <add>, %134, %cst_41 [0] : vector<4x128xf32> to vector<128xf32>
    %136 = vector.shape_cast %135 : vector<128xf32> to vector<1x128xf32>
    %cst_42 = arith.constant 5.000000e-01 : f32
    %137 = vector.broadcast %cst_42 : f32 to vector<1x128xf32>
    %138 = arith.mulf %136, %137 : vector<1x128xf32>
    %139 = arith.mulf %5, %76 : vector<4x128xf32>
    %cst_43 = arith.constant dense<0.000000e+00> : vector<128xf32>
    %140 = vector.multi_reduction <add>, %139, %cst_43 [0] : vector<4x128xf32> to vector<128xf32>
    %141 = vector.shape_cast %140 : vector<128xf32> to vector<1x128xf32>
    %cst_44 = arith.constant 5.000000e-01 : f32
    %142 = vector.broadcast %cst_44 : f32 to vector<1x128xf32>
    %143 = arith.mulf %141, %142 : vector<1x128xf32>
    %144 = arith.mulf %5, %77 : vector<4x128xf32>
    %cst_45 = arith.constant dense<0.000000e+00> : vector<128xf32>
    %145 = vector.multi_reduction <add>, %144, %cst_45 [0] : vector<4x128xf32> to vector<128xf32>
    %146 = vector.shape_cast %145 : vector<128xf32> to vector<1x128xf32>
    %cst_46 = arith.constant 5.000000e-01 : f32
    %147 = vector.broadcast %cst_46 : f32 to vector<1x128xf32>
    %148 = arith.mulf %146, %147 : vector<1x128xf32>
    %149 = arith.mulf %5, %78 : vector<4x128xf32>
    %cst_47 = arith.constant dense<0.000000e+00> : vector<128xf32>
    %150 = vector.multi_reduction <add>, %149, %cst_47 [0] : vector<4x128xf32> to vector<128xf32>
    %151 = vector.shape_cast %150 : vector<128xf32> to vector<1x128xf32>
    %cst_48 = arith.constant 5.000000e-01 : f32
    %152 = vector.broadcast %cst_48 : f32 to vector<1x128xf32>
    %153 = arith.mulf %151, %152 : vector<1x128xf32>
    %154 = arith.mulf %5, %79 : vector<4x128xf32>
    %cst_49 = arith.constant dense<0.000000e+00> : vector<128xf32>
    %155 = vector.multi_reduction <add>, %154, %cst_49 [0] : vector<4x128xf32> to vector<128xf32>
    %156 = vector.shape_cast %155 : vector<128xf32> to vector<1x128xf32>
    %cst_50 = arith.constant 5.000000e-01 : f32
    %157 = vector.broadcast %cst_50 : f32 to vector<1x128xf32>
    %158 = arith.mulf %156, %157 : vector<1x128xf32>
    %159 = arith.mulf %5, %80 : vector<4x128xf32>
    %cst_51 = arith.constant dense<0.000000e+00> : vector<128xf32>
    %160 = vector.multi_reduction <add>, %159, %cst_51 [0] : vector<4x128xf32> to vector<128xf32>
    %161 = vector.shape_cast %160 : vector<128xf32> to vector<1x128xf32>
    %cst_52 = arith.constant 5.000000e-01 : f32
    %162 = vector.broadcast %cst_52 : f32 to vector<1x128xf32>
    %163 = arith.mulf %161, %162 : vector<1x128xf32>
    %164 = arith.mulf %5, %81 : vector<4x128xf32>
    %cst_53 = arith.constant dense<0.000000e+00> : vector<128xf32>
    %165 = vector.multi_reduction <add>, %164, %cst_53 [0] : vector<4x128xf32> to vector<128xf32>
    %166 = vector.shape_cast %165 : vector<128xf32> to vector<1x128xf32>
    %cst_54 = arith.constant 5.000000e-01 : f32
    %167 = vector.broadcast %cst_54 : f32 to vector<1x128xf32>
    %168 = arith.mulf %166, %167 : vector<1x128xf32>
    %169 = arith.mulf %5, %82 : vector<4x128xf32>
    %cst_55 = arith.constant dense<0.000000e+00> : vector<128xf32>
    %170 = vector.multi_reduction <add>, %169, %cst_55 [0] : vector<4x128xf32> to vector<128xf32>
    %171 = vector.shape_cast %170 : vector<128xf32> to vector<1x128xf32>
    %cst_56 = arith.constant 5.000000e-01 : f32
    %172 = vector.broadcast %cst_56 : f32 to vector<1x128xf32>
    %173 = arith.mulf %171, %172 : vector<1x128xf32>
    %174 = arith.mulf %5, %83 : vector<4x128xf32>
    %cst_57 = arith.constant dense<0.000000e+00> : vector<128xf32>
    %175 = vector.multi_reduction <add>, %174, %cst_57 [0] : vector<4x128xf32> to vector<128xf32>
    %176 = vector.shape_cast %175 : vector<128xf32> to vector<1x128xf32>
    %cst_58 = arith.constant 5.000000e-01 : f32
    %177 = vector.broadcast %cst_58 : f32 to vector<1x128xf32>
    %178 = arith.mulf %176, %177 : vector<1x128xf32>
    %179 = arith.mulf %5, %84 : vector<4x128xf32>
    %cst_59 = arith.constant dense<0.000000e+00> : vector<128xf32>
    %180 = vector.multi_reduction <add>, %179, %cst_59 [0] : vector<4x128xf32> to vector<128xf32>
    %181 = vector.shape_cast %180 : vector<128xf32> to vector<1x128xf32>
    %cst_60 = arith.constant 5.000000e-01 : f32
    %182 = vector.broadcast %cst_60 : f32 to vector<1x128xf32>
    %183 = arith.mulf %181, %182 : vector<1x128xf32>
    %184 = arith.mulf %5, %85 : vector<4x128xf32>
    %cst_61 = arith.constant dense<0.000000e+00> : vector<128xf32>
    %185 = vector.multi_reduction <add>, %184, %cst_61 [0] : vector<4x128xf32> to vector<128xf32>
    %186 = vector.shape_cast %185 : vector<128xf32> to vector<1x128xf32>
    %cst_62 = arith.constant 5.000000e-01 : f32
    %187 = vector.broadcast %cst_62 : f32 to vector<1x128xf32>
    %188 = arith.mulf %186, %187 : vector<1x128xf32>
    %189 = arith.mulf %5, %86 : vector<4x128xf32>
    %cst_63 = arith.constant dense<0.000000e+00> : vector<128xf32>
    %190 = vector.multi_reduction <add>, %189, %cst_63 [0] : vector<4x128xf32> to vector<128xf32>
    %191 = vector.shape_cast %190 : vector<128xf32> to vector<1x128xf32>
    %cst_64 = arith.constant 5.000000e-01 : f32
    %192 = vector.broadcast %cst_64 : f32 to vector<1x128xf32>
    %193 = arith.mulf %191, %192 : vector<1x128xf32>
    %194 = arith.mulf %5, %87 : vector<4x128xf32>
    %cst_65 = arith.constant dense<0.000000e+00> : vector<128xf32>
    %195 = vector.multi_reduction <add>, %194, %cst_65 [0] : vector<4x128xf32> to vector<128xf32>
    %196 = vector.shape_cast %195 : vector<128xf32> to vector<1x128xf32>
    %cst_66 = arith.constant 5.000000e-01 : f32
    %197 = vector.broadcast %cst_66 : f32 to vector<1x128xf32>
    %198 = arith.mulf %196, %197 : vector<1x128xf32>
    %199 = arith.mulf %5, %88 : vector<4x128xf32>
    %cst_67 = arith.constant dense<0.000000e+00> : vector<128xf32>
    %200 = vector.multi_reduction <add>, %199, %cst_67 [0] : vector<4x128xf32> to vector<128xf32>
    %201 = vector.shape_cast %200 : vector<128xf32> to vector<1x128xf32>
    %cst_68 = arith.constant 5.000000e-01 : f32
    %202 = vector.broadcast %cst_68 : f32 to vector<1x128xf32>
    %203 = arith.mulf %201, %202 : vector<1x128xf32>
    %204 = arith.mulf %5, %89 : vector<4x128xf32>
    %cst_69 = arith.constant dense<0.000000e+00> : vector<128xf32>
    %205 = vector.multi_reduction <add>, %204, %cst_69 [0] : vector<4x128xf32> to vector<128xf32>
    %206 = vector.shape_cast %205 : vector<128xf32> to vector<1x128xf32>
    %cst_70 = arith.constant 5.000000e-01 : f32
    %207 = vector.broadcast %cst_70 : f32 to vector<1x128xf32>
    %208 = arith.mulf %206, %207 : vector<1x128xf32>
    %209 = arith.mulf %5, %90 : vector<4x128xf32>
    %cst_71 = arith.constant dense<0.000000e+00> : vector<128xf32>
    %210 = vector.multi_reduction <add>, %209, %cst_71 [0] : vector<4x128xf32> to vector<128xf32>
    %211 = vector.shape_cast %210 : vector<128xf32> to vector<1x128xf32>
    %cst_72 = arith.constant 5.000000e-01 : f32
    %212 = vector.broadcast %cst_72 : f32 to vector<1x128xf32>
    %213 = arith.mulf %211, %212 : vector<1x128xf32>
    %214 = arith.mulf %5, %91 : vector<4x128xf32>
    %cst_73 = arith.constant dense<0.000000e+00> : vector<128xf32>
    %215 = vector.multi_reduction <add>, %214, %cst_73 [0] : vector<4x128xf32> to vector<128xf32>
    %216 = vector.shape_cast %215 : vector<128xf32> to vector<1x128xf32>
    %cst_74 = arith.constant 5.000000e-01 : f32
    %217 = vector.broadcast %cst_74 : f32 to vector<1x128xf32>
    %218 = arith.mulf %216, %217 : vector<1x128xf32>
    %219 = arith.mulf %5, %92 : vector<4x128xf32>
    %cst_75 = arith.constant dense<0.000000e+00> : vector<128xf32>
    %220 = vector.multi_reduction <add>, %219, %cst_75 [0] : vector<4x128xf32> to vector<128xf32>
    %221 = vector.shape_cast %220 : vector<128xf32> to vector<1x128xf32>
    %cst_76 = arith.constant 5.000000e-01 : f32
    %222 = vector.broadcast %cst_76 : f32 to vector<1x128xf32>
    %223 = arith.mulf %221, %222 : vector<1x128xf32>
    %224 = arith.mulf %5, %93 : vector<4x128xf32>
    %cst_77 = arith.constant dense<0.000000e+00> : vector<128xf32>
    %225 = vector.multi_reduction <add>, %224, %cst_77 [0] : vector<4x128xf32> to vector<128xf32>
    %226 = vector.shape_cast %225 : vector<128xf32> to vector<1x128xf32>
    %cst_78 = arith.constant 5.000000e-01 : f32
    %227 = vector.broadcast %cst_78 : f32 to vector<1x128xf32>
    %228 = arith.mulf %226, %227 : vector<1x128xf32>
    %229 = arith.maximumf %98, %98 : vector<1x128xf32>
    %230 = arith.maximumf %229, %103 : vector<1x128xf32>
    %231 = arith.maximumf %230, %108 : vector<1x128xf32>
    %232 = arith.maximumf %231, %113 : vector<1x128xf32>
    %233 = arith.maximumf %232, %118 : vector<1x128xf32>
    %234 = arith.maximumf %233, %123 : vector<1x128xf32>
    %235 = arith.maximumf %234, %128 : vector<1x128xf32>
    %236 = arith.maximumf %235, %133 : vector<1x128xf32>
    %237 = arith.maximumf %236, %138 : vector<1x128xf32>
    %238 = arith.maximumf %237, %143 : vector<1x128xf32>
    %239 = arith.maximumf %238, %148 : vector<1x128xf32>
    %240 = arith.maximumf %239, %153 : vector<1x128xf32>
    %241 = arith.maximumf %240, %158 : vector<1x128xf32>
    %242 = arith.maximumf %241, %163 : vector<1x128xf32>
    %243 = arith.maximumf %242, %168 : vector<1x128xf32>
    %244 = arith.maximumf %243, %173 : vector<1x128xf32>
    %245 = arith.maximumf %244, %178 : vector<1x128xf32>
    %246 = arith.maximumf %245, %183 : vector<1x128xf32>
    %247 = arith.maximumf %246, %188 : vector<1x128xf32>
    %248 = arith.maximumf %247, %193 : vector<1x128xf32>
    %249 = arith.maximumf %248, %198 : vector<1x128xf32>
    %250 = arith.maximumf %249, %203 : vector<1x128xf32>
    %251 = arith.maximumf %250, %208 : vector<1x128xf32>
    %252 = arith.maximumf %251, %213 : vector<1x128xf32>
    %253 = arith.maximumf %252, %218 : vector<1x128xf32>
    %254 = arith.maximumf %253, %223 : vector<1x128xf32>
    %255 = arith.maximumf %254, %228 : vector<1x128xf32>
    %256 = arith.subf %98, %255 : vector<1x128xf32>
    %257 = math.exp %256 : vector<1x128xf32>
    %258 = arith.subf %103, %255 : vector<1x128xf32>
    %259 = math.exp %258 : vector<1x128xf32>
    %260 = arith.subf %108, %255 : vector<1x128xf32>
    %261 = math.exp %260 : vector<1x128xf32>
    %262 = arith.subf %113, %255 : vector<1x128xf32>
    %263 = math.exp %262 : vector<1x128xf32>
    %264 = arith.subf %118, %255 : vector<1x128xf32>
    %265 = math.exp %264 : vector<1x128xf32>
    %266 = arith.subf %123, %255 : vector<1x128xf32>
    %267 = math.exp %266 : vector<1x128xf32>
    %268 = arith.subf %128, %255 : vector<1x128xf32>
    %269 = math.exp %268 : vector<1x128xf32>
    %270 = arith.subf %133, %255 : vector<1x128xf32>
    %271 = math.exp %270 : vector<1x128xf32>
    %272 = arith.subf %138, %255 : vector<1x128xf32>
    %273 = math.exp %272 : vector<1x128xf32>
    %274 = arith.subf %143, %255 : vector<1x128xf32>
    %275 = math.exp %274 : vector<1x128xf32>
    %276 = arith.subf %148, %255 : vector<1x128xf32>
    %277 = math.exp %276 : vector<1x128xf32>
    %278 = arith.subf %153, %255 : vector<1x128xf32>
    %279 = math.exp %278 : vector<1x128xf32>
    %280 = arith.subf %158, %255 : vector<1x128xf32>
    %281 = math.exp %280 : vector<1x128xf32>
    %282 = arith.subf %163, %255 : vector<1x128xf32>
    %283 = math.exp %282 : vector<1x128xf32>
    %284 = arith.subf %168, %255 : vector<1x128xf32>
    %285 = math.exp %284 : vector<1x128xf32>
    %286 = arith.subf %173, %255 : vector<1x128xf32>
    %287 = math.exp %286 : vector<1x128xf32>
    %288 = arith.subf %178, %255 : vector<1x128xf32>
    %289 = math.exp %288 : vector<1x128xf32>
    %290 = arith.subf %183, %255 : vector<1x128xf32>
    %291 = math.exp %290 : vector<1x128xf32>
    %292 = arith.subf %188, %255 : vector<1x128xf32>
    %293 = math.exp %292 : vector<1x128xf32>
    %294 = arith.subf %193, %255 : vector<1x128xf32>
    %295 = math.exp %294 : vector<1x128xf32>
    %296 = arith.subf %198, %255 : vector<1x128xf32>
    %297 = math.exp %296 : vector<1x128xf32>
    %298 = arith.subf %203, %255 : vector<1x128xf32>
    %299 = math.exp %298 : vector<1x128xf32>
    %300 = arith.subf %208, %255 : vector<1x128xf32>
    %301 = math.exp %300 : vector<1x128xf32>
    %302 = arith.subf %213, %255 : vector<1x128xf32>
    %303 = math.exp %302 : vector<1x128xf32>
    %304 = arith.subf %218, %255 : vector<1x128xf32>
    %305 = math.exp %304 : vector<1x128xf32>
    %306 = arith.subf %223, %255 : vector<1x128xf32>
    %307 = math.exp %306 : vector<1x128xf32>
    %308 = arith.subf %228, %255 : vector<1x128xf32>
    %309 = math.exp %308 : vector<1x128xf32>
    %cst_79 = arith.constant 0.000000e+00 : f32
    %310 = vector.broadcast %cst_79 : f32 to vector<1x128xf32>
    %311 = arith.addf %310, %257 : vector<1x128xf32>
    %312 = arith.addf %311, %259 : vector<1x128xf32>
    %313 = arith.addf %312, %261 : vector<1x128xf32>
    %314 = arith.addf %313, %263 : vector<1x128xf32>
    %315 = arith.addf %314, %265 : vector<1x128xf32>
    %316 = arith.addf %315, %267 : vector<1x128xf32>
    %317 = arith.addf %316, %269 : vector<1x128xf32>
    %318 = arith.addf %317, %271 : vector<1x128xf32>
    %319 = arith.addf %318, %273 : vector<1x128xf32>
    %320 = arith.addf %319, %275 : vector<1x128xf32>
    %321 = arith.addf %320, %277 : vector<1x128xf32>
    %322 = arith.addf %321, %279 : vector<1x128xf32>
    %323 = arith.addf %322, %281 : vector<1x128xf32>
    %324 = arith.addf %323, %283 : vector<1x128xf32>
    %325 = arith.addf %324, %285 : vector<1x128xf32>
    %326 = arith.addf %325, %287 : vector<1x128xf32>
    %327 = arith.addf %326, %289 : vector<1x128xf32>
    %328 = arith.addf %327, %291 : vector<1x128xf32>
    %329 = arith.addf %328, %293 : vector<1x128xf32>
    %330 = arith.addf %329, %295 : vector<1x128xf32>
    %331 = arith.addf %330, %297 : vector<1x128xf32>
    %332 = arith.addf %331, %299 : vector<1x128xf32>
    %333 = arith.addf %332, %301 : vector<1x128xf32>
    %334 = arith.addf %333, %303 : vector<1x128xf32>
    %335 = arith.addf %334, %305 : vector<1x128xf32>
    %336 = arith.addf %335, %307 : vector<1x128xf32>
    %337 = arith.addf %336, %309 : vector<1x128xf32>
    %338 = tpu.reciprocal %337 {approx = true} : vector<1x128xf32> -> vector<1x128xf32>
    %339 = arith.mulf %337, %338 : vector<1x128xf32>
    %cst_80 = arith.constant 2.000000e+00 : f32
    %340 = vector.broadcast %cst_80 : f32 to vector<1x128xf32>
    %341 = arith.subf %340, %339 : vector<1x128xf32>
    %342 = arith.mulf %338, %341 : vector<1x128xf32>
    %cst_81 = arith.constant 0.000000e+00 : f32
    %343 = vector.broadcast %cst_81 : f32 to vector<4x128xf32>
    %344 = vector.broadcast %257 : vector<1x128xf32> to vector<4x128xf32>
    %345 = arith.mulf %344, %67 : vector<4x128xf32>
    %346 = arith.addf %343, %345 : vector<4x128xf32>
    %347 = vector.broadcast %259 : vector<1x128xf32> to vector<4x128xf32>
    %348 = arith.mulf %347, %68 : vector<4x128xf32>
    %349 = arith.addf %346, %348 : vector<4x128xf32>
    %350 = vector.broadcast %261 : vector<1x128xf32> to vector<4x128xf32>
    %351 = arith.mulf %350, %69 : vector<4x128xf32>
    %352 = arith.addf %349, %351 : vector<4x128xf32>
    %353 = vector.broadcast %263 : vector<1x128xf32> to vector<4x128xf32>
    %354 = arith.mulf %353, %70 : vector<4x128xf32>
    %355 = arith.addf %352, %354 : vector<4x128xf32>
    %356 = vector.broadcast %265 : vector<1x128xf32> to vector<4x128xf32>
    %357 = arith.mulf %356, %71 : vector<4x128xf32>
    %358 = arith.addf %355, %357 : vector<4x128xf32>
    %359 = vector.broadcast %267 : vector<1x128xf32> to vector<4x128xf32>
    %360 = arith.mulf %359, %72 : vector<4x128xf32>
    %361 = arith.addf %358, %360 : vector<4x128xf32>
    %362 = vector.broadcast %269 : vector<1x128xf32> to vector<4x128xf32>
    %363 = arith.mulf %362, %73 : vector<4x128xf32>
    %364 = arith.addf %361, %363 : vector<4x128xf32>
    %365 = vector.broadcast %271 : vector<1x128xf32> to vector<4x128xf32>
    %366 = arith.mulf %365, %74 : vector<4x128xf32>
    %367 = arith.addf %364, %366 : vector<4x128xf32>
    %368 = vector.broadcast %273 : vector<1x128xf32> to vector<4x128xf32>
    %369 = arith.mulf %368, %75 : vector<4x128xf32>
    %370 = arith.addf %367, %369 : vector<4x128xf32>
    %371 = vector.broadcast %275 : vector<1x128xf32> to vector<4x128xf32>
    %372 = arith.mulf %371, %76 : vector<4x128xf32>
    %373 = arith.addf %370, %372 : vector<4x128xf32>
    %374 = vector.broadcast %277 : vector<1x128xf32> to vector<4x128xf32>
    %375 = arith.mulf %374, %77 : vector<4x128xf32>
    %376 = arith.addf %373, %375 : vector<4x128xf32>
    %377 = vector.broadcast %279 : vector<1x128xf32> to vector<4x128xf32>
    %378 = arith.mulf %377, %78 : vector<4x128xf32>
    %379 = arith.addf %376, %378 : vector<4x128xf32>
    %380 = vector.broadcast %281 : vector<1x128xf32> to vector<4x128xf32>
    %381 = arith.mulf %380, %79 : vector<4x128xf32>
    %382 = arith.addf %379, %381 : vector<4x128xf32>
    %383 = vector.broadcast %283 : vector<1x128xf32> to vector<4x128xf32>
    %384 = arith.mulf %383, %80 : vector<4x128xf32>
    %385 = arith.addf %382, %384 : vector<4x128xf32>
    %386 = vector.broadcast %285 : vector<1x128xf32> to vector<4x128xf32>
    %387 = arith.mulf %386, %81 : vector<4x128xf32>
    %388 = arith.addf %385, %387 : vector<4x128xf32>
    %389 = vector.broadcast %287 : vector<1x128xf32> to vector<4x128xf32>
    %390 = arith.mulf %389, %82 : vector<4x128xf32>
    %391 = arith.addf %388, %390 : vector<4x128xf32>
    %392 = vector.broadcast %289 : vector<1x128xf32> to vector<4x128xf32>
    %393 = arith.mulf %392, %83 : vector<4x128xf32>
    %394 = arith.addf %391, %393 : vector<4x128xf32>
    %395 = vector.broadcast %291 : vector<1x128xf32> to vector<4x128xf32>
    %396 = arith.mulf %395, %84 : vector<4x128xf32>
    %397 = arith.addf %394, %396 : vector<4x128xf32>
    %398 = vector.broadcast %293 : vector<1x128xf32> to vector<4x128xf32>
    %399 = arith.mulf %398, %85 : vector<4x128xf32>
    %400 = arith.addf %397, %399 : vector<4x128xf32>
    %401 = vector.broadcast %295 : vector<1x128xf32> to vector<4x128xf32>
    %402 = arith.mulf %401, %86 : vector<4x128xf32>
    %403 = arith.addf %400, %402 : vector<4x128xf32>
    %404 = vector.broadcast %297 : vector<1x128xf32> to vector<4x128xf32>
    %405 = arith.mulf %404, %87 : vector<4x128xf32>
    %406 = arith.addf %403, %405 : vector<4x128xf32>
    %407 = vector.broadcast %299 : vector<1x128xf32> to vector<4x128xf32>
    %408 = arith.mulf %407, %88 : vector<4x128xf32>
    %409 = arith.addf %406, %408 : vector<4x128xf32>
    %410 = vector.broadcast %301 : vector<1x128xf32> to vector<4x128xf32>
    %411 = arith.mulf %410, %89 : vector<4x128xf32>
    %412 = arith.addf %409, %411 : vector<4x128xf32>
    %413 = vector.broadcast %303 : vector<1x128xf32> to vector<4x128xf32>
    %414 = arith.mulf %413, %90 : vector<4x128xf32>
    %415 = arith.addf %412, %414 : vector<4x128xf32>
    %416 = vector.broadcast %305 : vector<1x128xf32> to vector<4x128xf32>
    %417 = arith.mulf %416, %91 : vector<4x128xf32>
    %418 = arith.addf %415, %417 : vector<4x128xf32>
    %419 = vector.broadcast %307 : vector<1x128xf32> to vector<4x128xf32>
    %420 = arith.mulf %419, %92 : vector<4x128xf32>
    %421 = arith.addf %418, %420 : vector<4x128xf32>
    %422 = vector.broadcast %309 : vector<1x128xf32> to vector<4x128xf32>
    %423 = arith.mulf %422, %93 : vector<4x128xf32>
    %424 = arith.addf %421, %423 : vector<4x128xf32>
    %425 = vector.broadcast %342 : vector<1x128xf32> to vector<4x128xf32>
    %426 = arith.mulf %424, %425 : vector<4x128xf32>
    %c0_82 = arith.constant 0 : index
    %c0_83 = arith.constant 0 : index
    %c0_84 = arith.constant 0 : index
    %427 = vector.load %arg5[%c0_82, %c0_83, %c0_84] : memref<1x4x128xf32, #tpu.memory_space<vmem>>, vector<1x4x128xf32>
    %428 = vector.shape_cast %427 : vector<1x4x128xf32> to vector<4x128xf32>
    %429 = vector.shape_cast %426 : vector<4x128xf32> to vector<1x4x128xf32>
    tpu.vector_store %arg5[%c0_82, %c0_83, %c0_84], %429 {strides = array<i32>} : memref<1x4x128xf32, #tpu.memory_space<vmem>>, vector<1x4x128xf32>,
    return
  }
  func.func @transform_0(%arg0: i32, %arg1: i32) -> (i32, i32, i32) {
    %c0_i32 = arith.constant 0 : i32
    %c0_i32_0 = arith.constant 0 : i32
    %c0_i32_1 = arith.constant 0 : i32
    return %arg0, %c0_i32, %c0_i32_0 : i32, i32, i32
  }
  func.func @transform_1(%arg0: i32, %arg1: i32) -> (i32, i32, i32) {
    %c0_i32 = arith.constant 0 : i32
    %c0_i32_0 = arith.constant 0 : i32
    return %arg0, %c0_i32, %arg1 : i32, i32, i32
  }
  func.func @transform_2(%arg0: i32, %arg1: i32) -> (i32, i32, i32) {
    %c0_i32 = arith.constant 0 : i32
    %c0_i32_0 = arith.constant 0 : i32
    return %arg0, %c0_i32, %arg1 : i32, i32, i32
  }
  func.func @transform_3(%arg0: i32, %arg1: i32) -> (i32, i32, i32) {
    %c0_i32 = arith.constant 0 : i32
    %c0_i32_0 = arith.constant 0 : i32
    return %arg0, %c0_i32, %arg1 : i32, i32, i32
  }
}

</mosaic_0001>

<bundles_post_ra>
// kernel: tpu_custom_call.1
= control target key start
LH: loop header
LB: loop body
LE: loop exit
PB: predicated region body
PF: predicated region fallthrough
CT: control target
= control target key end

     0   :  { %8 = vsyncpa [#allocation4], 0  ;;  %s5577_s0 = inlined_call_operand.vmem [shape: f32[2,36,256], index: 0, kind: input, shape index: {}]   ;;  %s5578_s1 = inlined_call_operand.vmem [shape: f32[2,36,256], index: 1, kind: input, shape index: {}]   ;;  %s5579_s2 = inlined_call_operand.vmem [shape: f32[2,4,256], index: 2, kind: input, shape index: {}]   ;;  %s5580_s3 = inlined_call_operand.hbm [shape: f32[2,4,256], index: 3, kind: output, shape index: {}]  }
   0x1   :  { %10 = vsyncpa [#allocation4 + $0x1], 0  ;;  %s3589_s12 = smov 0   ;;  %s3591_s13 = smov 0  }
   0x2   :  { %s3593_s14 = smov 0   ;;  %s3595_s15 = smov 0  }
   0x3   :  { %s3597_s16 = smov 0   ;;  %s3599_s17 = smov 0  }
   0x4   :  { %s3601_s18 = smov 0   ;;  %s3603_s19 = smov 0  }
   0x5 LB: > { %s2986_s20 = sadd.s32 4294967295, %s3564_s19   ;;  %s2987_s21 = sadd.s32 4294967294, %s3564_s19   ;;  %s3564_s19 = sphi %s3603_s19, %s16_s19   ;;  %s3560_s18 = sphi %s3601_s18, %s5749_s18   ;;  %s3556_s17 = sphi %s3599_s17, %s5748_s17   ;;  %s3552_s16 = sphi %s3597_s16, %s5747_s16   ;;  %s3548_s15 = sphi %s3595_s15, %s5746_s15   ;;  %s3544_s14 = sphi %s3593_s14, %s5745_s14   ;;  %s3540_s13 = sphi %s3591_s13, %s5744_s13   ;;  %s3536_s12 = sphi %s3589_s12, %s5743_s12  }
   0x6   : > { %s25_s22 = sadd.s32 1, %s3556_s17  ;;  %s28_s23 = sadd.s32 1, %s3560_s18 }
   0x7   : > { %p26_p0 = scmp.ge.s32.totalorder %s25_s22, 2  ;;  %p70_p1 = scmp.ne.s32.totalorder %s3544_s14, %s3540_s13 }
   0x8   : > { %p71_p2 = scmp.eq.s32.totalorder %s3564_s19, 0  ;;  %p130_p5 = scmp.eq.s32.totalorder %s2986_s20, 3 }
   0x9   : > { %s5751_s22 = smov (%p26_p0, %s25_s22), 0  ;;  %s5753_s23 = smov (!%p26_p0, %s28_s23), %s3560_s18 }
   0xa   : > { %s59_s24 = ssub.s32 %s3556_s17, %s5751_s22  ;;  %p3641_p3 = por %p71_p2, %p70_p1 }
   0xb   : > { %p30_p4 = scmp.ge.s32.totalorder %s5753_s23, 2  ;;  %p135_p6 = scmp.ne.s32.totalorder %s3540_s13, %s3536_s12 }
   0xc   : > { %p136_p7 = scmp.eq.s32.totalorder %s2987_s21, 3  ;;  %p3649_p8 = por %p130_p5, %p70_p1 }
   0xd   : > { %s5755_s23 = smov (%p30_p4, %s5753_s23), 0  ;;  %s63_s30 = sadd.s32 1, %s3544_s14 }
   0xe   : > { %p3653_p9 = por %p136_p7, %p135_p6  ;;  %s58_s28 = ssub.s32 %s3560_s18, %s5755_s23 }
   0xf   : > { %s60_s29 = sor.u32 %s59_s24, %s58_s28  ;;  %p2989_p11 = scmp.ge.s32.totalorder %s3564_s19, 4 }
  0x10   : > { %p61_p10 = scmp.eq.s32.totalorder %s60_s29, 0 }
  0x11   : > { %152 = sbr.rel (%p2989_p11) target bundleno = 34 (0x22), region = 16 }
  0x12   : > { %s3661_s4 = scalar_select %p61_p10, %s3544_s14, %s63_s30  }
  0x18   : > { %163 = sbr.rel (!%p3641_p3) target bundleno = 34 (0x22), region = 24  ;;  %s165_s5 = sand.u32 (%p3641_p3), 1, %s3544_s14  }
  0x19   : > { %s3332_s6 = smul.u32 (%p3641_p3), 10, %s3560_s18 }
  0x1a   : > { %s3331_s7 = smul.u32 (%p3641_p3), 40, %s165_s5 }
  0x1b   : > { %s169_s8 = sadd.s32 (%p3641_p3), %s3556_s17, %s3332_s6 }
  0x1c   : > { %s2990_s9 = sshll.u32 (%p3641_p3), %s169_s8, 3  ;;  %s167_s21 = scalar_lea.vmem (%p3641_p3), [#allocation2], %s3331_s7 }
  0x1d   : > { %s171_s20 = scalar_lea.vmem (%p3641_p3), %s5578_s1, %s2990_s9 }
  0x1e   : > { %v207_v0 = vld [vmem:[%s171_s20] sm:$0xff] (%p3641_p3)  ;;  %v209_v1 = vld [vmem:[%s171_s20 + $0x10] sm:$0xff] (%p3641_p3) }
  0x1f   : > { %v211_v2 = vld [vmem:[%s171_s20 + $0x20] sm:$0xff]  ;;  %208 = vst [vmem:[%s167_s21] sm:$0xff] %v207_v0  ;;  %210 = vst [vmem:[%s167_s21 + $0x8] sm:$0xff] %v209_v1  ;;  %v213_v3 = vld [vmem:[%s171_s20 + $0x30] sm:$0xff] }
  0x20   : > { %212 = vst [vmem:[%s167_s21 + $0x10] sm:$0xff] %v211_v2  ;;  %v215_v4 = vld [vmem:[%s171_s20 + $0x40] sm:$0xff]  ;;  %214 = vst [vmem:[%s167_s21 + $0x18] sm:$0xff] %v213_v3 }
  0x21   : > { %216 = vst [vmem:[%s167_s21 + $0x20] sm:$0xff] %v215_v4 }
  0x22 PF: > { %p2991_p12 = scmp.ge.s32.totalorder %s3564_s19, 1  ;;  %p232_p13 = scmp.lt.s32.totalorder %s3564_s19, 5 }
  0x24   : > { %p233_p0 = pnand %p2991_p12, %p232_p13 }
  0x26   : > { %236 = sbr.rel (%p233_p0) target bundleno = 2178 (0x882), region = 66 }
  0x2d   : > { %s3675_s24 = sand.u32 1, %s3540_s13   ;;  %p275_p1 = scmp.lt.s32.totalorder %s3552_s16, 1  ;;  %v3566_v5 = vmov 0.0   ;;  %vm317_vm0 = vcmask 1043456   ;;  %vm406_vm1 = vcmask 293888  }
  0x2e   : > { %s3333_s25 = smul.u32 40, %s3675_s24  ;;  %525 = vmatprep.mubr.f32.mxu0 %v3566_v5  ;;  %p282_p2 = scmp.lt.s32.totalorder %s3548_s15, 1 }
  0x2f   : > { %s3681_s28 = scalar_select %p275_p1, %s3552_s16, 1 }
  0x30   : > { %s241_s29 = scalar_lea.vmem [#allocation2], %s3333_s25 }
  0x31   : > { %v3683_v6 = vld [vmem:[%s241_s29] sm:$0xff]  ;;  %v3685_v7 = vld [vmem:[%s241_s29 + $0x8] sm:$0xff]  ;;  %v3687_v8 = vld [vmem:[%s241_s29 + $0x10] sm:$0xff]  ;;  %s3334_s30 = smul.u32 80, %s3681_s28  ;;  %s2994_s9 = sshll.u32 %s3681_s28, 1 }
  0x32   : > { %v3690_v9 = vld [vmem:[%s241_s29 + $0x18] sm:$0xff]  ;;  %v3692_v10 = vld [vmem:[%s241_s29 + $0x20] sm:$0xf]  ;;  %v351_v11 = vmul.f32 %v3683_v6, %v3683_v6  ;;  %v352_v12 = vmul.f32 %v3685_v7, %v3685_v7  ;;  %v353_v13 = vmul.f32 %v3687_v8, %v3687_v8  ;;  %s283_s8 = scalar_select %p282_p2, %s3548_s15, 1 }
  0x33   : > { %v355_v14 = vmul.f32 %v3692_v10, %v3692_v10  ;;  %s279_s7 = scalar_lea.vmem %s5577_s0, %s3334_s30  ;;  %v354_v15 = vmul.f32 %v3690_v9, %v3690_v9  ;;  %s2992_s28 = sshll.u32 %s3675_s24, 2 }
  0x34   : > { %v356_v16 = vadd.f32 %v352_v12, %v351_v11  ;;  %v3707_v17 = vld [vmem:[%s279_s7 + $0x8] sm:$0xff]  ;;  %v3709_v18 = vld [vmem:[%s279_s7 + $0x18] sm:$0xff]  ;;  %v288_v25 = vld [vmem:[%s279_s7] sm:$0xff]  ;;  %s285_s10 = sadd.s32 %s2994_s9, %s283_s8  ;;  %s3207_s29 = sshll.u32 %s3552_s16, 1 }
  0x35   : > { %v3711_v19 = vld [vmem:[%s279_s7 + $0x28] sm:$0xff]  ;;  %v3713_v20 = vld [vmem:[%s279_s7 + $0x38] sm:$0xff]  ;;  %v305_v22 = vmul.f32 %v3707_v17, %v3707_v17  ;;  %v307_v23 = vmul.f32 %v3709_v18, %v3709_v18  ;;  %v359_v27 = vsel %vm317_vm0, %v355_v14, 0.0  ;;  %v290_v29 = vld [vmem:[%s279_s7 + $0x10] sm:$0xff]  ;;  %v304_v32 = vmul.f32 %v288_v25, %v288_v25  ;;  %s2995_s11 = sshll.u32 %s285_s10, 2  ;;  %s2872_s30 = sadd.s32 %s3548_s15, %s3207_s29 }
  0x36   : > { %v3715_v21 = vld [vmem:[%s279_s7 + $0x48] sm:$0xf]  ;;  %v309_v24 = vmul.f32 %v3711_v19, %v3711_v19  ;;  %v357_v26 = vadd.f32 %v356_v16, %v353_v13  ;;  %v292_v30 = vld [vmem:[%s279_s7 + $0x20] sm:$0xff]  ;;  %v294_v31 = vld [vmem:[%s279_s7 + $0x30] sm:$0xff]  ;;  %v311_v33 = vmul.f32 %v3713_v20, %v3713_v20  ;;  %v306_v36 = vmul.f32 %v290_v29, %v290_v29  ;;  %s287_s25 = scalar_lea.vmem %s5579_s2, %s2995_s11  ;;  %s3208_s5 = sshll.u32 %s2872_s30, 6 }
  0x37   : > { %v313_v28 = vmul.f32 %v3715_v21, %v3715_v21  ;;  %v326_v34 = vadd.f32 %v307_v23, %v305_v22  ;;  %v3728_v35 = vld [vmem:[%s279_s7 + $0x40] sm:$0xf]  ;;  %v308_v37 = vmul.f32 %v292_v30, %v292_v30  ;;  %v310_v41 = vmul.f32 %v294_v31, %v294_v31  ;;  %s274_s6 = scalar_lea.vmem [#allocation3], %s2992_s28  ;;  %s5523_s10 = scalar_lea.hbm %s5580_s3, %s3208_s5 }
  0x38   : > { %v358_v38 = vadd.f32 %v357_v26, %v354_v15  ;;  %v312_v39 = vmul.f32 %v3728_v35, %v3728_v35  ;;  %v314_v42 = vadd.f32 %v306_v36, %v304_v32  ;;  %s2876_s7 = sshll.u32 %s274_s6, 4  ;;  %s2861_s16 = scalar_lea.sflag [#allocation4], %s3675_s24  ;;  %s5525_s7 = int_to_ptr.vmem [resolvable:$true] %s2876_s7 }
  0x39   : > { %v327_v40 = vadd.f32 %v326_v34, %v309_v24  ;;  %v329_v44 = vsel %vm317_vm0, %v313_v28, 0.0  ;;  %s3470_s11 = scalar_lea.vmem %s5525_s7, 64  ;;  %s3568_s15 = smov [#allocation3]  }
  0x3a   : > { %v360_v43 = vadd.f32 %v359_v27, %v358_v38  ;;  %v315_v46 = vadd.f32 %v314_v42, %v308_v37  ;;  %v318_v48 = vsel %vm317_vm0, %v312_v39, 0.0  ;;  %p3471_p3 = scmp.ne.s32.totalorder %s5525_s7, %s3470_s11  ;;  %s3474_s20 = sshll.u32 %s3568_s15, 4  ;;  %s3475_s20 = int_to_ptr.vmem [resolvable:$false] %s3474_s20 }
  0x3b   : > { %v328_v45 = vadd.f32 %v327_v40, %v311_v33  ;;  %s3476_s21 = scalar_lea.vmem %s3475_s20, 128  ;;  %p3477_p6 = scmp.lt.s32.totalorder %s5525_s7, %s3475_s20 }
  0x3c   : > { %v361_v47 = vrot.slane %v360_v43, 4  ;;  %v316_v50 = vadd.f32 %v315_v46, %v310_v41  ;;  %p3472_p4 = pnand %p3471_p3, %p3649_p8  ;;  %p3478_p7 = scmp.lt.s32.totalorder %s3476_s21, %s3470_s11 }
  0x3d   : > { %v330_v49 = vadd.f32 %v329_v44, %v328_v45 }
  0x3e   : > { %v362_v51 = vadd.f32 %v361_v47, %v360_v43  ;;  %v319_v53 = vadd.f32 %v318_v48, %v316_v50  ;;  %p3473_p5 = pneg %p3472_p4  ;;  %p3479_p10 = por %p3478_p7, %p3477_p6 }
  0x3f   : > { %v331_v52 = vrot.slane %v330_v49, 4 }
  0x40   : > { %v363_v54 = vrot.slane %v362_v51, 2  ;;  %v320_v56 = vrot.slane %v319_v53, 4  ;;  %p3480_p11 = pnand %p3479_p10, %p3473_p5 }
  0x41   : > { %v332_v55 = vadd.f32 %v331_v52, %v330_v49 }
  0x42   : > { %v364_v57 = vadd.f32 %v363_v54, %v362_v51  ;;  %v321_v59 = vadd.f32 %v320_v56, %v319_v53 }
  0x43   : > { %v333_v58 = vrot.slane %v332_v55, 2 }
  0x44   : > { %v365_v60 = vrot.slane %v364_v57, 1  ;;  %v322_v62 = vrot.slane %v321_v59, 2 }
  0x45   : > { %v334_v61 = vadd.f32 %v333_v58, %v332_v55 }
  0x46   : > { %v366_v63 = vadd.f32 %v365_v60, %v364_v57  ;;  %v323_v1 = vadd.f32 %v322_v62, %v321_v59 }
  0x47   : > { %v335_v0 = vrot.slane %v334_v61, 1 }
  0x48   : > { %v367_v2 = vmax.f32 %v366_v63, 1e-24  ;;  %v324_v4 = vrot.slane %v323_v1, 1 }
  0x49   : > { %v336_v3 = vadd.f32 %v335_v0, %v334_v61 }
  0x4a   : > { %3408 = vrsqrt.f32 %v367_v2  ;;  %v325_v12 = vadd.f32 %v324_v4, %v323_v1 }
  0x4b   : > { %v338_v11 = vmax.f32 %v336_v3, 1e-24 }
  0x4c   : > { %v337_v13 = vmax.f32 %v325_v12, 1e-24 }
  0x4d   : > { %3410 = vrsqrt.f32 %v338_v11 }
  0x4e   : > { %3412 = vrsqrt.f32 %v337_v13 }
  0x54   : > { %v3409_v14 = vpop.eup %3408 }
  0x55   : > { %v369_v15 = vmul.f32 %v3409_v14, %v3683_v6  ;;  %v370_v22 = vmul.f32 %v3409_v14, %v3685_v7  ;;  %v371_v7 = vmul.f32 %v3409_v14, %v3687_v8 }
  0x57   : > { %v3411_v16 = vpop.eup %3410  ;;  %374 = vxpose.xlu0.b32.start [1/5] (short) %v369_v15, 128 }
  0x58   : > { %v3737_v23 = vmul.f32 %v3411_v16, %v3707_v17  ;;  %v3740_v24 = vmul.f32 %v3411_v16, %v3709_v18  ;;  %v3743_v26 = vmul.f32 %v3411_v16, %v3711_v19  ;;  %v3746_v27 = vmul.f32 %v3411_v16, %v3713_v20  ;;  %v3413_v28 = vpop.eup %3412 }
  0x59   : > { %v3750_v32 = vmul.f32 %v3413_v28, %v288_v25  ;;  %v3752_v33 = vmul.f32 %v3413_v28, %v290_v29  ;;  %v3758_v18 = vmul.f32 %v3413_v28, %v292_v30  ;;  %v3760_v19 = vmul.f32 %v3413_v28, %v294_v31 }
  0x5a   : > { %5645 = vst [vmem:[#allocation6_spill] sm:$0xff] %v3737_v23  ;;  %5646 = vst [vmem:[#allocation7_spill] sm:$0xff] %v3740_v24  ;;  %v3211_v6 = vpack.c.bf16 %v3740_v24, %v3737_v23  ;;  %1153 = vmatprep.mubr.f32.mxu1 %v3737_v23  ;;  %v3215_v17 = vpack.c.bf16 %v3746_v27, %v3743_v26  ;;  %v372_v29 = vmul.f32 %v3409_v14, %v3690_v9 }
  0x5b   : > { %5647 = vst [vmem:[#allocation8_spill] sm:$0xff] %v3743_v26  ;;  %5648 = vst [vmem:[#allocation9_spill] sm:$0xff] %v3746_v27  ;;  %375 = vxpose.xlu0.b32.cont [2/5] (short) %v370_v22, 128  ;;  %v3213_v20 = vpack.c.bf16 %v3752_v33, %v3750_v32  ;;  %v3217_v25 = vpack.c.bf16 %v3760_v19, %v3758_v18  ;;  %v3768_v8 = vmul.f32 %v3411_v16, %v3715_v21 }
  0x5c   : > { %5649 = vst [vmem:[#allocation10_spill] sm:$0xff] %v3750_v32  ;;  %5650 = vst [vmem:[#allocation11_spill] sm:$0xff] %v3752_v33  ;;  %3212 = vmatprep.subr.bf16.mxu0 %v3211_v6  ;;  %v3771_v30 = vmul.f32 %v3413_v28, %v3728_v35  ;;  %v373_v31 = vmul.f32 %v3409_v14, %v3692_v10 }
  0x5d   : > { %5651 = vst [vmem:[#allocation12_spill] sm:$0xff] %v3758_v18  ;;  %5652 = vst [vmem:[#allocation13_spill] sm:$0xff] %v3760_v19  ;;  %3214 = vmatpush1.bf16.msra.mxu0 %v3213_v20 }
  0x5e   : > { %3216 = vmatprep.subr.bf16.mxu0 %v3215_v17  ;;  %5653 = vst [vmem:[#allocation14_spill] sm:$0xff] %v3768_v8  ;;  %5654 = vst [vmem:[#allocation15_spill] sm:$0xff] %v3771_v30 }
  0x5f   : > { %376 = vxpose.xlu0.b32.cont [3/5] (short) %v371_v7, 128 }
  0x61   : > { %3218 = vmatpush1.bf16.msra.mxu0 %v3217_v25 }
  0x62   : > { %2996 = vmatprep.subr.msk.mxu0 %vm317_vm0, %v3768_v8 }
  0x63   : > { %377 = vxpose.xlu0.b32.cont [4/5] (short) %v372_v29, 128 }
  0x65   : > { %2997 = vmatpush1.msk.msra.mxu0 %vm317_vm0, %v3771_v30 }
  0x67   : > { %378 = vxpose.xlu0.b32.end [5/5] (short) %v373_v31, 128 }
  0xd7   : > { %v390_v9 = vpop.trf.xlu0 }
  0xd8   : > { %2998 = vmatmul.mubr.msk.f32.vlgmr.msra.gmra.mrb[0].mxu0 %vm406_vm1, %v390_v9 }
  0xd9   : > { %531 = vmatprep.mubr.f32.mxu0 %v3566_v5 }
  0xdb   : > { %v391_v21 = vpop.trf.xlu0 }
  0xdc   : > { %2999 = vmatmul.mubr.msk.f32.gmra.mrb[2].mxu0 %vm406_vm1, %v391_v21 }
  0xdd   : > { %537 = vmatprep.mubr.f32.mxu0 %v3566_v5 }
  0xdf   : > { %v392_v34 = vpop.trf.xlu0 }
  0xe0   : > { %3000 = vmatmul.mubr.msk.f32.gmra.mrb[4].mxu0 %vm406_vm1, %v392_v34 }
  0xe1   : > { %543 = vmatprep.mubr.f32.mxu0 %v3566_v5 }
  0xe3   : > { %v393_v10 = vpop.trf.xlu0 }
  0xe4   : > { %3001 = vmatmul.mubr.msk.f32.gmra.mrb[6].mxu0 %vm406_vm1, %v393_v10 }
  0xe5   : > { %549 = vmatprep.mubr.f32.mxu0 %v3566_v5 }
  0xe7   : > { %v394_v35 = vpop.trf.xlu0 }
  0xe8   : > { %3002 = vmatmul.mubr.msk.f32.gmra.mrb[8].mxu0 %vm406_vm1, %v394_v35 }
  0xe9   : > { %555 = vmatprep.mubr.f32.mxu0 %v3566_v5 }
  0xeb   : > { %v395_v36 = vpop.trf.xlu0 }
  0xec   : > { %3003 = vmatmul.mubr.msk.f32.gmra.mrb[10].mxu0 %vm406_vm1, %v395_v36 }
  0xed   : > { %561 = vmatprep.mubr.f32.mxu0 %v3566_v5 }
  0xef   : > { %v396_v37 = vpop.trf.xlu0 }
  0xf0   : > { %3004 = vmatmul.mubr.msk.f32.gmra.mrb[12].mxu0 %vm406_vm1, %v396_v37 }
  0xf1   : > { %567 = vmatprep.mubr.f32.mxu0 %v3566_v5 }
  0xf3   : > { %v397_v38 = vpop.trf.xlu0 }
  0xf4   : > { %3005 = vmatmul.mubr.msk.f32.gmra.mrb[14].mxu0 %vm406_vm1, %v397_v38 }
  0xf5   : > { %573 = vmatprep.mubr.f32.mxu0 %v3566_v5 }
  0xf7   : > { %v398_v39 = vpop.trf.xlu0 }
  0xf8   : > { %3006 = vmatmul.mubr.msk.f32.gmra.mrb[16].mxu0 %vm406_vm1, %v398_v39 }
  0xf9   : > { %579 = vmatprep.mubr.f32.mxu0 %v3566_v5 }
  0xfb   : > { %v399_v40 = vpop.trf.xlu0 }
  0xfc   : > { %3007 = vmatmul.mubr.msk.f32.gmra.mrb[18].mxu0 %vm406_vm1, %v399_v40 }
  0xfd   : > { %585 = vmatprep.mubr.f32.mxu0 %v3566_v5 }
  0xff   : > { %v400_v41 = vpop.trf.xlu0 }
 0x100   : > { %3008 = vmatmul.mubr.msk.f32.gmra.mrb[20].mxu0 %vm406_vm1, %v400_v41  ;;  %v622_v41 = vlaneseq }
 0x101   : > { %591 = vmatprep.mubr.f32.mxu0 %v3566_v5 }
 0x103   : > { %v401_v42 = vpop.trf.xlu0 }
 0x104   : > { %3009 = vmatmul.mubr.msk.f32.gmra.mrb[22].mxu0 %vm406_vm1, %v401_v42  ;;  %v3906_v42 = vand.u32 127, %v622_v41 }
 0x105   : > { %597 = vmatprep.mubr.f32.mxu0 %v3566_v5 }
 0x107   : > { %v402_v43 = vpop.trf.xlu0 }
 0x108   : > { %3010 = vmatmul.mubr.msk.f32.gmra.mrb[24].mxu0 %vm406_vm1, %v402_v43  ;;  %v3909_v43 = vadd.s32 128, %v3906_v42 }
 0x109   : > { %603 = vmatprep.mubr.f32.mxu0 %v3566_v5 }
 0x10b   : > { %v403_v44 = vpop.trf.xlu0 }
 0x10c   : > { %3011 = vmatmul.mubr.msk.f32.gmra.mrb[26].mxu0 %vm406_vm1, %v403_v44 }
 0x10d   : > { %609 = vmatprep.mubr.f32.mxu0 %v3566_v5 }
 0x10f   : > { %v404_v45 = vpop.trf.xlu0 }
 0x110   : > { %3012 = vmatmul.mubr.msk.f32.gmra.mrb[28].mxu0 %vm406_vm1, %v404_v45 }
 0x111   : > { %615 = vmatprep.mubr.f32.mxu0 %v3566_v5 }
 0x113   : > { %v405_v46 = vpop.trf.xlu0 }
 0x114   : > { %3013 = vmatmul.mubr.msk.f32.gmra.mrb[30].mxu0 %vm406_vm1, %v405_v46 }
 0x115   : > { %1739 = vmatprep.mubr.f32.mxu0 %v3737_v23 }
 0x1ab   : > { %v3810_v47 = vpop.f32.mrb[0].mxu0 }
 0x1ac   : > { %v3812_v48 = vpop.f32.mrb[1].mxu0 }
 0x1ad   : > { %v625_v49 = vmax.f32 %v3810_v47, %v3812_v48 }
 0x1af   : > { %626 = vmax.xlane.f32.xlu1 %v625_v49  ;;  %v3816_v50 = vpop.f32.mrb[2].mxu0 }
 0x1b0   : > { %v3818_v51 = vpop.f32.mrb[3].mxu0 }
 0x1b1   : > { %v628_v5 = vmax.f32 %v3816_v50, %v3818_v51 }
 0x1b3   : > { %629 = vmax.xlane.f32.xlu1 %v628_v5  ;;  %v3822_v52 = vpop.f32.mrb[4].mxu0 }
 0x1b4   : > { %v3824_v53 = vpop.f32.mrb[5].mxu0 }
 0x1b5   : > { %v631_v54 = vmax.f32 %v3822_v52, %v3824_v53 }
 0x1b7   : > { %632 = vmax.xlane.f32.xlu1 %v631_v54  ;;  %v3828_v55 = vpop.f32.mrb[6].mxu0 }
 0x1b8   : > { %v3830_v56 = vpop.f32.mrb[7].mxu0 }
 0x1b9   : > { %v634_v57 = vmax.f32 %v3828_v55, %v3830_v56 }
 0x1bb   : > { %635 = vmax.xlane.f32.xlu1 %v634_v57  ;;  %v3834_v58 = vpop.f32.mrb[8].mxu0 }
 0x1bc   : > { %v3836_v59 = vpop.f32.mrb[9].mxu0 }
 0x1bd   : > { %v637_v60 = vmax.f32 %v3834_v58, %v3836_v59 }
 0x1bf   : > { %638 = vmax.xlane.f32.xlu1 %v637_v60  ;;  %v3840_v61 = vpop.f32.mrb[10].mxu0 }
 0x1c0   : > { %v3842_v62 = vpop.f32.mrb[11].mxu0 }
 0x1c1   : > { %v640_v63 = vmax.f32 %v3840_v61, %v3842_v62 }
 0x1c3   : > { %641 = vmax.xlane.f32.xlu0 %v640_v63  ;;  %v3846_v0 = vpop.f32.mrb[12].mxu0 }
 0x1c4   : > { %v3848_v1 = vpop.f32.mrb[13].mxu0 }
 0x1c5   : > { %v643_v2 = vmax.f32 %v3846_v0, %v3848_v1 }
 0x1c7   : > { %644 = vmax.xlane.f32.xlu1 %v643_v2  ;;  %v3852_v3 = vpop.f32.mrb[14].mxu0 }
 0x1c8   : > { %v3854_v4 = vpop.f32.mrb[15].mxu0 }
 0x1c9   : > { %v646_v11 = vmax.f32 %v3852_v3, %v3854_v4 }
 0x1cb   : > { %647 = vmax.xlane.f32.xlu1 %v646_v11  ;;  %v3858_v12 = vpop.f32.mrb[16].mxu0 }
 0x1cc   : > { %v3860_v13 = vpop.f32.mrb[17].mxu0 }
 0x1cd   : > { %v649_v14 = vmax.f32 %v3858_v12, %v3860_v13 }
 0x1cf   : > { %650 = vmax.xlane.f32.xlu1 %v649_v14  ;;  %v3864_v15 = vpop.f32.mrb[18].mxu0 }
 0x1d0   : > { %v3866_v16 = vpop.f32.mrb[19].mxu0 }
 0x1d1   : > { %v652_v22 = vmax.f32 %v3864_v15, %v3866_v16 }
 0x1d3   : > { %653 = vmax.xlane.f32.xlu1 %v652_v22  ;;  %v3870_v28 = vpop.f32.mrb[20].mxu0 }
 0x1d4   : > { %v3872_v6 = vpop.f32.mrb[21].mxu0 }
 0x1d5   : > { %5655 = vst [vmem:[#allocation16_spill] sm:$0xff] %v3872_v6  ;;  %v655_v7 = vmax.f32 %v3870_v28, %v3872_v6 }
 0x1d7   : > { %656 = vmax.xlane.f32.xlu1 %v655_v7  ;;  %v3876_v17 = vpop.f32.mrb[22].mxu0 }
 0x1d8   : > { %5656 = vst [vmem:[#allocation17_spill] sm:$0xff] %v3876_v17  ;;  %v3878_v20 = vpop.f32.mrb[23].mxu0 }
 0x1d9   : > { %5657 = vst [vmem:[#allocation18_spill] sm:$0xff] %v3878_v20  ;;  %v658_v25 = vmax.f32 %v3876_v17, %v3878_v20 }
 0x1db   : > { %659 = vmax.xlane.f32.xlu1 %v658_v25  ;;  %v3882_v29 = vpop.f32.mrb[24].mxu0 }
 0x1dc   : > { %5658 = vst [vmem:[#allocation19_spill] sm:$0xff] %v3882_v29  ;;  %v3884_v31 = vpop.f32.mrb[25].mxu0 }
 0x1dd   : > { %5659 = vst [vmem:[#allocation20_spill] sm:$0xff] %v3884_v31  ;;  %v661_v9 = vmax.f32 %v3882_v29, %v3884_v31 }
 0x1df   : > { %662 = vmax.xlane.f32.xlu1 %v661_v9  ;;  %v3888_v21 = vpop.f32.mrb[26].mxu0 }
 0x1e0   : > { %5660 = vst [vmem:[#allocation21_spill] sm:$0xff] %v3888_v21  ;;  %v3890_v34 = vpop.f32.mrb[27].mxu0 }
 0x1e1   : > { %5661 = vst [vmem:[#allocation22_spill] sm:$0xff] %v3890_v34  ;;  %v664_v10 = vmax.f32 %v3888_v21, %v3890_v34 }
 0x1e3   : > { %665 = vmax.xlane.f32.xlu1 %v664_v10  ;;  %v3894_v35 = vpop.f32.mrb[28].mxu0 }
 0x1e4   : > { %5662 = vst [vmem:[#allocation23_spill] sm:$0xff] %v3894_v35  ;;  %v3896_v36 = vpop.f32.mrb[29].mxu0 }
 0x1e5   : > { %5663 = vst [vmem:[#allocation24_spill] sm:$0xff] %v3896_v36  ;;  %v667_v37 = vmax.f32 %v3894_v35, %v3896_v36 }
 0x1e7   : > { %668 = vmax.xlane.f32.xlu1 %v667_v37  ;;  %v3900_v38 = vpop.f32.mrb[30].mxu0 }
 0x1e8   : > { %5664 = vst [vmem:[#allocation25_spill] sm:$0xff] %v3900_v38  ;;  %v3902_v39 = vpop.f32.mrb[31].mxu0 }
 0x1e9   : > { %5665 = vst [vmem:[#allocation26_spill] sm:$0xff] %v3902_v39  ;;  %v670_v40 = vmax.f32 %v3900_v38, %v3902_v39 }
 0x1eb   : > { %671 = vmax.xlane.f32.xlu1 %v670_v40 }
 0x23c   : > { %v627_v44 = vpop.xlane.xlu1 %626 }
 0x23d   : > { %vm673_vm2 = vcmp.eq.f32.partialorder %v3810_v47, %v627_v44  ;;  %vm674_vm3 = vcmp.eq.f32.partialorder %v3812_v48, %v627_v44 }
 0x23e   : > { %v705_v45 = vsel %vm673_vm2, %v3906_v42, 256  ;;  %v706_v46 = vsel %vm674_vm3, %v3909_v43, 256 }
 0x23f   : > { %vm737_vm4 = vcmp.lt.s32.totalorder %v705_v45, %v706_v46 }
 0x240   : > { %v630_v49 = vpop.xlane.xlu1 %629  ;;  %v3915_v5 = vsel %vm737_vm4, %v705_v45, %v706_v46 }
 0x241   : > { %vm675_vm5 = vcmp.eq.f32.partialorder %v3816_v50, %v630_v49  ;;  %vm676_vm6 = vcmp.eq.f32.partialorder %v3818_v51, %v630_v49  ;;  %v740_v54 = vshra.s32 %v3915_v5, 16 }
 0x242   : > { %v707_v57 = vsel %vm675_vm5, %v3906_v42, 256  ;;  %v708_v60 = vsel %vm676_vm6, %v3909_v43, 256 }
 0x243   : > { %v3922_v63 = vcvt.s32.f32 %v740_v54  ;;  %vm753_vm7 = vcmp.lt.s32.totalorder %v707_v57, %v708_v60 }
 0x244   : > { %v633_v2 = vpop.xlane.xlu1 %632  ;;  %v3924_v11 = vsel %vm753_vm7, %v707_v57, %v708_v60 }
 0x245   : > { %vm677_vm8 = vcmp.eq.f32.partialorder %v3822_v52, %v633_v2  ;;  %vm678_vm9 = vcmp.eq.f32.partialorder %v3824_v53, %v633_v2  ;;  %743 = vmin.xlane.f32.xlu1 %v3922_v63  ;;  %v756_v14 = vshra.s32 %v3924_v11, 16 }
 0x246   : > { %v709_v22 = vsel %vm677_vm8, %v3906_v42, 256  ;;  %v710_v7 = vsel %vm678_vm9, %v3909_v43, 256 }
 0x247   : > { %v3932_v25 = vcvt.s32.f32 %v756_v14  ;;  %vm769_vm10 = vcmp.lt.s32.totalorder %v709_v22, %v710_v7 }
 0x248   : > { %v636_v9 = vpop.xlane.xlu1 %635  ;;  %v3934_v10 = vsel %vm769_vm10, %v709_v22, %v710_v7 }
 0x249   : > { %vm679_vm11 = vcmp.eq.f32.partialorder %v3828_v55, %v636_v9  ;;  %vm680_vm12 = vcmp.eq.f32.partialorder %v3830_v56, %v636_v9  ;;  %759 = vmin.xlane.f32.xlu1 %v3932_v25  ;;  %v772_v37 = vshra.s32 %v3934_v10, 16 }
 0x24a   : > { %v711_v40 = vsel %vm679_vm11, %v3906_v42, 256  ;;  %v712_v41 = vsel %vm680_vm12, %v3909_v43, 256 }
 0x24b   : > { %v3942_v44 = vcvt.s32.f32 %v772_v37  ;;  %vm785_vm13 = vcmp.lt.s32.totalorder %v711_v40, %v712_v41 }
 0x24c   : > { %v639_v45 = vpop.xlane.xlu1 %638  ;;  %v3944_v46 = vsel %vm785_vm13, %v711_v40, %v712_v41 }
 0x24d   : > { %vm681_vm14 = vcmp.eq.f32.partialorder %v3834_v58, %v639_v45  ;;  %vm682_vm15 = vcmp.eq.f32.partialorder %v3836_v59, %v639_v45  ;;  %775 = vmin.xlane.f32.xlu1 %v3942_v44  ;;  %v788_v49 = vshra.s32 %v3944_v46, 16 }
 0x24e   : > { %v713_v54 = vsel %vm681_vm14, %v3906_v42, 256  ;;  %v714_v57 = vsel %vm682_vm15, %v3909_v43, 256 }
 0x24f   : > { %v3952_v60 = vcvt.s32.f32 %v788_v49  ;;  %vm801_vm1 = vcmp.lt.s32.totalorder %v713_v54, %v714_v57 }
 0x250   : > { %v642_v2 = vpop.xlane.xlu0 %641  ;;  %v3954_v14 = vsel %vm801_vm1, %v713_v54, %v714_v57 }
 0x251   : > { %vm683_vm2 = vcmp.eq.f32.partialorder %v3840_v61, %v642_v2  ;;  %vm684_vm3 = vcmp.eq.f32.partialorder %v3842_v62, %v642_v2  ;;  %791 = vmin.xlane.f32.xlu1 %v3952_v60  ;;  %v804_v22 = vshra.s32 %v3954_v14, 16 }
 0x252   : > { %v715_v7 = vsel %vm683_vm2, %v3906_v42, 256  ;;  %v716_v9 = vsel %vm684_vm3, %v3909_v43, 256 }
 0x253   : > { %v3962_v37 = vcvt.s32.f32 %v804_v22  ;;  %vm817_vm4 = vcmp.lt.s32.totalorder %v715_v7, %v716_v9 }
 0x254   : > { %v645_v40 = vpop.xlane.xlu1 %644  ;;  %v3964_v41 = vsel %vm817_vm4, %v715_v7, %v716_v9 }
 0x255   : > { %vm685_vm5 = vcmp.eq.f32.partialorder %v3846_v0, %v645_v40  ;;  %vm686_vm6 = vcmp.eq.f32.partialorder %v3848_v1, %v645_v40  ;;  %807 = vmin.xlane.f32.xlu1 %v3962_v37  ;;  %v820_v45 = vshra.s32 %v3964_v41, 16 }
 0x256   : > { %v717_v49 = vsel %vm685_vm5, %v3906_v42, 256  ;;  %v718_v54 = vsel %vm686_vm6, %v3909_v43, 256 }
 0x257   : > { %v3972_v57 = vcvt.s32.f32 %v820_v45  ;;  %vm833_vm7 = vcmp.lt.s32.totalorder %v717_v49, %v718_v54 }
 0x258   : > { %v648_v2 = vpop.xlane.xlu1 %647  ;;  %v3974_v22 = vsel %vm833_vm7, %v717_v49, %v718_v54 }
 0x259   : > { %vm687_vm8 = vcmp.eq.f32.partialorder %v3852_v3, %v648_v2  ;;  %vm688_vm9 = vcmp.eq.f32.partialorder %v3854_v4, %v648_v2  ;;  %823 = vmin.xlane.f32.xlu1 %v3972_v57  ;;  %v836_v7 = vshra.s32 %v3974_v22, 16 }
 0x25a   : > { %v719_v9 = vsel %vm687_vm8, %v3906_v42, 256  ;;  %v720_v40 = vsel %vm688_vm9, %v3909_v43, 256 }
 0x25b   : > { %v3982_v23 = vcvt.s32.f32 %v836_v7  ;;  %vm849_vm10 = vcmp.lt.s32.totalorder %v719_v9, %v720_v40 }
 0x25c   : > { %v651_v45 = vpop.xlane.xlu1 %650  ;;  %v3984_v30 = vsel %vm849_vm10, %v719_v9, %v720_v40 }
 0x25d   : > { %vm689_vm11 = vcmp.eq.f32.partialorder %v3858_v12, %v651_v45  ;;  %vm690_vm12 = vcmp.eq.f32.partialorder %v3860_v13, %v651_v45  ;;  %839 = vmin.xlane.f32.xlu1 %v3982_v23  ;;  %v852_v49 = vshra.s32 %v3984_v30, 16 }
 0x25e   : > { %v721_v54 = vsel %vm689_vm11, %v3906_v42, 256  ;;  %v722_v2 = vsel %vm690_vm12, %v3909_v43, 256 }
 0x25f   : > { %v3992_v8 = vcvt.s32.f32 %v852_v49  ;;  %vm865_vm13 = vcmp.lt.s32.totalorder %v721_v54, %v722_v2 }
 0x260   : > { %v654_v7 = vpop.xlane.xlu1 %653  ;;  %v3994_v19 = vsel %vm865_vm13, %v721_v54, %v722_v2 }
 0x261   : > { %vm691_vm14 = vcmp.eq.f32.partialorder %v3864_v15, %v654_v7  ;;  %vm692_vm15 = vcmp.eq.f32.partialorder %v3866_v16, %v654_v7  ;;  %855 = vmin.xlane.f32.xlu1 %v3992_v8  ;;  %v868_v9 = vshra.s32 %v3994_v19, 16 }
 0x262   : > { %v723_v40 = vsel %vm691_vm14, %v3906_v42, 256  ;;  %v724_v45 = vsel %vm692_vm15, %v3909_v43, 256 }
 0x263   : > { %v4002_v27 = vcvt.s32.f32 %v868_v9  ;;  %vm881_vm1 = vcmp.lt.s32.totalorder %v723_v40, %v724_v45 }
 0x264   : > { %v657_v49 = vpop.xlane.xlu1 %656  ;;  %v4004_v18 = vsel %vm881_vm1, %v723_v40, %v724_v45 }
 0x265   : > { %vm693_vm2 = vcmp.eq.f32.partialorder %v3870_v28, %v657_v49  ;;  %vm694_vm3 = vcmp.eq.f32.partialorder %v3872_v6, %v657_v49  ;;  %871 = vmin.xlane.f32.xlu1 %v4002_v27  ;;  %v884_v54 = vshra.s32 %v4004_v18, 16 }
 0x266   : > { %v725_v2 = vsel %vm693_vm2, %v3906_v42, 256  ;;  %v726_v7 = vsel %vm694_vm3, %v3909_v43, 256 }
 0x267   : > { %v4012_v26 = vcvt.s32.f32 %v884_v54  ;;  %vm897_vm4 = vcmp.lt.s32.totalorder %v725_v2, %v726_v7 }
 0x268   : > { %v660_v9 = vpop.xlane.xlu1 %659  ;;  %v4014_v33 = vsel %vm897_vm4, %v725_v2, %v726_v7 }
 0x269   : > { %vm695_vm5 = vcmp.eq.f32.partialorder %v3876_v17, %v660_v9  ;;  %vm696_vm6 = vcmp.eq.f32.partialorder %v3878_v20, %v660_v9  ;;  %887 = vmin.xlane.f32.xlu1 %v4012_v26  ;;  %v900_v40 = vshra.s32 %v4014_v33, 16 }
 0x26a   : > { %v727_v45 = vsel %vm695_vm5, %v3906_v42, 256  ;;  %v728_v49 = vsel %vm696_vm6, %v3909_v43, 256 }
 0x26b   : > { %v4022_v24 = vcvt.s32.f32 %v900_v40  ;;  %vm913_vm7 = vcmp.lt.s32.totalorder %v727_v45, %v728_v49 }
 0x26c   : > { %v663_v54 = vpop.xlane.xlu1 %662  ;;  %v4024_v32 = vsel %vm913_vm7, %v727_v45, %v728_v49 }
 0x26d   : > { %vm697_vm8 = vcmp.eq.f32.partialorder %v3882_v29, %v663_v54  ;;  %vm698_vm9 = vcmp.eq.f32.partialorder %v3884_v31, %v663_v54  ;;  %903 = vmin.xlane.f32.xlu1 %v4022_v24  ;;  %v916_v2 = vshra.s32 %v4024_v32, 16 }
 0x26e   : > { %v729_v7 = vsel %vm697_vm8, %v3906_v42, 256  ;;  %v730_v9 = vsel %vm698_vm9, %v3909_v43, 256 }
 0x26f   : > { %v4032_v20 = vcvt.s32.f32 %v916_v2  ;;  %vm929_vm10 = vcmp.lt.s32.totalorder %v729_v7, %v730_v9 }
 0x270   : > { %v666_v40 = vpop.xlane.xlu1 %665  ;;  %v4034_v17 = vsel %vm929_vm10, %v729_v7, %v730_v9 }
 0x271   : > { %vm699_vm11 = vcmp.eq.f32.partialorder %v3888_v21, %v666_v40  ;;  %vm700_vm12 = vcmp.eq.f32.partialorder %v3890_v34, %v666_v40  ;;  %919 = vmin.xlane.f32.xlu1 %v4032_v20  ;;  %v932_v45 = vshra.s32 %v4034_v17, 16 }
 0x272   : > { %v731_v49 = vsel %vm699_vm11, %v3906_v42, 256  ;;  %v732_v54 = vsel %vm700_vm12, %v3909_v43, 256 }
 0x273   : > { %v4042_v31 = vcvt.s32.f32 %v932_v45  ;;  %vm945_vm13 = vcmp.lt.s32.totalorder %v731_v49, %v732_v54 }
 0x274   : > { %v669_v2 = vpop.xlane.xlu1 %668  ;;  %v4044_v29 = vsel %vm945_vm13, %v731_v49, %v732_v54 }
 0x275   : > { %vm701_vm14 = vcmp.eq.f32.partialorder %v3894_v35, %v669_v2  ;;  %vm702_vm15 = vcmp.eq.f32.partialorder %v3896_v36, %v669_v2  ;;  %935 = vmin.xlane.f32.xlu1 %v4042_v31  ;;  %v948_v7 = vshra.s32 %v4044_v29, 16  ;;  %v755_v35 = vand.u32 65535, %v3924_v11 }
 0x276   : > { %v733_v9 = vsel %vm701_vm14, %v3906_v42, 256  ;;  %v734_v40 = vsel %vm702_vm15, %v3909_v43, 256  ;;  %v787_v11 = vand.u32 65535, %v3944_v46  ;;  %v819_v46 = vand.u32 65535, %v3964_v41 }
 0x277   : > { %v4052_v34 = vcvt.s32.f32 %v948_v7  ;;  %vm961_vm1 = vcmp.lt.s32.totalorder %v733_v9, %v734_v40  ;;  %v851_v41 = vand.u32 65535, %v3984_v30  ;;  %v883_v30 = vand.u32 65535, %v4004_v18 }
 0x278   : > { %v672_v45 = vpop.xlane.xlu1 %671  ;;  %v4054_v21 = vsel %vm961_vm1, %v733_v9, %v734_v40  ;;  %v915_v18 = vand.u32 65535, %v4024_v32  ;;  %v947_v32 = vand.u32 65535, %v4044_v29 }
 0x279   : > { %vm703_vm2 = vcmp.eq.f32.partialorder %v3900_v38, %v672_v45  ;;  %vm704_vm3 = vcmp.eq.f32.partialorder %v3902_v39, %v672_v45  ;;  %951 = vmin.xlane.f32.xlu0 %v4052_v34  ;;  %v964_v49 = vshra.s32 %v4054_v21, 16  ;;  %v739_v45 = vand.u32 65535, %v3915_v5 }
 0x27a   : > { %v735_v54 = vsel %vm703_vm2, %v3906_v42, 256  ;;  %v736_v2 = vsel %vm704_vm3, %v3909_v43, 256 }
 0x27b   : > { %v4062_v36 = vcvt.s32.f32 %v964_v49  ;;  %vm977_vm4 = vcmp.lt.s32.totalorder %v735_v54, %v736_v2  ;;  %v741_v38 = vcvt.s32.f32 %v739_v45 }
 0x27c   : > { %v4064_v7 = vsel %vm977_vm4, %v735_v54, %v736_v2  ;;  %v757_v2 = vcvt.s32.f32 %v755_v35  ;;  %v789_v35 = vcvt.s32.f32 %v787_v11 }
 0x27d   : > { %967 = vmin.xlane.f32.xlu1 %v4062_v36  ;;  %v980_v9 = vshra.s32 %v4064_v7, 16  ;;  %v979_v29 = vand.u32 65535, %v4064_v7 }
 0x27f   : > { %v4068_v40 = vcvt.s32.f32 %v980_v9  ;;  %v771_v9 = vand.u32 65535, %v3934_v10  ;;  %v803_v10 = vand.u32 65535, %v3954_v14  ;;  %v835_v14 = vand.u32 65535, %v3974_v22 }
 0x280   : > { %v867_v22 = vand.u32 65535, %v3994_v19  ;;  %v899_v19 = vand.u32 65535, %v4014_v33  ;;  %v931_v33 = vand.u32 65535, %v4034_v17  ;;  %v963_v17 = vand.u32 65535, %v4054_v21 }
 0x281   : > { %983 = vmin.xlane.f32.xlu0 %v4068_v40  ;;  %v773_v45 = vcvt.s32.f32 %v771_v9  ;;  %v821_v9 = vcvt.s32.f32 %v819_v46  ;;  %v837_v11 = vcvt.s32.f32 %v835_v14  ;;  %v885_v46 = vcvt.s32.f32 %v883_v30 }
 0x282   : > { %v981_v30 = vcvt.s32.f32 %v979_v29 }
 0x2d2   : > { %v4072_v39 = vpop.xlane.xlu1 %743 }
 0x2d3   : > { %vm745_vm5 = vcmp.eq.f32.partialorder %v3922_v63, %v4072_v39 }
 0x2d4   : > { %v746_v49 = vsel %vm745_vm5, %v741_v38, inf }
 0x2d5   : > { %747 = vmin.xlane.f32.xlu1 %v746_v49  ;;  %v805_v49 = vcvt.s32.f32 %v803_v10 }
 0x2d6   : > { %v4077_v54 = vpop.xlane.xlu1 %759 }
 0x2d7   : > { %vm761_vm6 = vcmp.eq.f32.partialorder %v3932_v25, %v4077_v54 }
 0x2d8   : > { %v762_v6 = vsel %vm761_vm6, %v757_v2, inf }
 0x2d9   : > { %763 = vmin.xlane.f32.xlu0 %v762_v6 }
 0x2da   : > { %v4082_v5 = vpop.xlane.xlu1 %775 }
 0x2db   : > { %vm777_vm7 = vcmp.eq.f32.partialorder %v3942_v44, %v4082_v5 }
 0x2dc   : > { %v778_v38 = vsel %vm777_vm7, %v773_v45, inf }
 0x2dd   : > { %779 = vmin.xlane.f32.xlu1 %v778_v38 }
 0x2de   : > { %v4087_v63 = vpop.xlane.xlu1 %791 }
 0x2df   : > { %vm793_vm8 = vcmp.eq.f32.partialorder %v3952_v60, %v4087_v63 }
 0x2e0   : > { %v794_v25 = vsel %vm793_vm8, %v789_v35, inf  ;;  %v853_v35 = vcvt.s32.f32 %v851_v41  ;;  %v933_v41 = vcvt.s32.f32 %v931_v33 }
 0x2e1   : > { %795 = vmin.xlane.f32.xlu0 %v794_v25  ;;  %v869_v25 = vcvt.s32.f32 %v867_v22 }
 0x2e2   : > { %v4092_v6 = vpop.xlane.xlu1 %807 }
 0x2e3   : > { %vm809_vm9 = vcmp.eq.f32.partialorder %v3962_v37, %v4092_v6 }
 0x2e4   : > { %v810_v44 = vsel %vm809_vm9, %v805_v49, inf }
 0x2e5   : > { %811 = vmin.xlane.f32.xlu1 %v810_v44 }
 0x2e6   : > { %v4097_v2 = vpop.xlane.xlu1 %823 }
 0x2e7   : > { %vm825_vm10 = vcmp.eq.f32.partialorder %v3972_v57, %v4097_v2 }
 0x2e8   : > { %v826_v60 = vsel %vm825_vm10, %v821_v9, inf  ;;  %v901_v9 = vcvt.s32.f32 %v899_v19  ;;  %v766_v19 = vcvt.f32.s32 %v4077_v54 }
 0x2e9   : > { %827 = vmin.xlane.f32.xlu0 %v826_v60  ;;  %v917_v60 = vcvt.s32.f32 %v915_v18 }
 0x2ea   : > { %v4102_v45 = vpop.xlane.xlu1 %839  ;;  %v767_v18 = vshll.u32 %v766_v19, 16 }
 0x2eb   : > { %vm841_vm11 = vcmp.eq.f32.partialorder %v3982_v23, %v4102_v45 }
 0x2ec   : > { %v842_v37 = vsel %vm841_vm11, %v837_v11, inf }
 0x2ed   : > { %843 = vmin.xlane.f32.xlu1 %v842_v37 }
 0x2ee   : > { %v4107_v38 = vpop.xlane.xlu1 %855 }
 0x2ef   : > { %vm857_vm12 = vcmp.eq.f32.partialorder %v3992_v8, %v4107_v38 }
 0x2f0   : > { %v858_v57 = vsel %vm857_vm12, %v853_v35, inf  ;;  %v949_v35 = vcvt.s32.f32 %v947_v32 }
 0x2f1   : > { %859 = vmin.xlane.f32.xlu0 %v858_v57  ;;  %v965_v57 = vcvt.s32.f32 %v963_v17 }
 0x2f2   : > { %v4112_v10 = vpop.xlane.xlu1 %871 }
 0x2f3   : > { %vm873_vm13 = vcmp.eq.f32.partialorder %v4002_v27, %v4112_v10 }
 0x2f4   : > { %v874_v23 = vsel %vm873_vm13, %v869_v25, inf }
 0x2f5   : > { %875 = vmin.xlane.f32.xlu1 %v874_v23 }
 0x2f6   : > { %v4117_v49 = vpop.xlane.xlu1 %887 }
 0x2f7   : > { %vm889_vm14 = vcmp.eq.f32.partialorder %v4012_v26, %v4117_v49 }
 0x2f8   : > { %v890_v8 = vsel %vm889_vm14, %v885_v46, inf }
 0x2f9   : > { %891 = vmin.xlane.f32.xlu0 %v890_v8 }
 0x2fa   : > { %v4122_v44 = vpop.xlane.xlu1 %903 }
 0x2fb   : > { %vm905_vm15 = vcmp.eq.f32.partialorder %v4022_v24, %v4122_v44 }
 0x2fc   : > { %v906_v27 = vsel %vm905_vm15, %v901_v9, inf }
 0x2fd   : > { %907 = vmin.xlane.f32.xlu1 %v906_v27 }
 0x2fe   : > { %v4127_v14 = vpop.xlane.xlu1 %919 }
 0x2ff   : > { %vm921_vm1 = vcmp.eq.f32.partialorder %v4032_v20, %v4127_v14 }
 0x300   : > { %v922_v26 = vsel %vm921_vm1, %v917_v60, inf }
 0x301   : > { %923 = vmin.xlane.f32.xlu0 %v922_v26  ;;  %v798_v26 = vcvt.f32.s32 %v4087_v63 }
 0x302   : > { %v4132_v11 = vpop.xlane.xlu1 %935 }
 0x303   : > { %vm937_vm2 = vcmp.eq.f32.partialorder %v4042_v31, %v4132_v11 }
 0x304   : > { %v938_v24 = vsel %vm937_vm2, %v933_v41, inf }
 0x305   : > { %939 = vmin.xlane.f32.xlu1 %v938_v24  ;;  %v5611_v24 = vmov 1.0|1.0  }
 0x306   : > { %v4137_v37 = vpop.xlane.xlu0 %951 }
 0x307   : > { %vm953_vm3 = vcmp.eq.f32.partialorder %v4052_v34, %v4137_v37  ;;  %v750_v34 = vcvt.f32.s32 %v4072_v39 }
 0x308   : > { %v954_v20 = vsel %vm953_vm3, %v949_v35, inf  ;;  %v814_v35 = vcvt.f32.s32 %v4092_v6 }
 0x309   : > { %955 = vmin.xlane.f32.xlu0 %v954_v20  ;;  %v751_v46 = vshll.u32 %v750_v34, 16 }
 0x30a   : > { %v4142_v22 = vpop.xlane.xlu1 %967 }
 0x30b   : > { %vm969_vm4 = vcmp.eq.f32.partialorder %v4062_v36, %v4142_v22  ;;  %v782_v36 = vcvt.f32.s32 %v4082_v5 }
 0x30c   : > { %v970_v31 = vsel %vm969_vm4, %v965_v57, inf }
 0x30d   : > { %971 = vmin.xlane.f32.xlu1 %v970_v31  ;;  %v783_v5 = vshll.u32 %v782_v36, 16  ;;  %v815_v31 = vshll.u32 %v814_v35, 16 }
 0x30e   : > { %v4147_v25 = vpop.xlane.xlu0 %983 }
 0x30f   : > { %vm985_vm5 = vcmp.eq.f32.partialorder %v4068_v40, %v4147_v25 }
 0x310   : > { %v986_v21 = vsel %vm985_vm5, %v981_v30, inf }
 0x311   : > { %987 = vmin.xlane.f32.xlu0 %v986_v21  ;;  %v830_v21 = vcvt.f32.s32 %v4097_v2 }
 0x362   : > { %v748_v23 = vpop.xlane.xlu1 %747 }
 0x363   : > { %v749_v7 = vcvt.f32.s32 %v748_v23 }
 0x365   : > { %v752_v8 = vadd.s32 %v751_v46, %v749_v7  ;;  %v846_v46 = vcvt.f32.s32 %v4102_v45  ;;  %v831_v7 = vshll.u32 %v830_v21, 16 }
 0x366   : > { %v764_v9 = vpop.xlane.xlu0 %763 }
 0x367   : > { %v765_v27 = vcvt.f32.s32 %v764_v9  ;;  %vm993_vm6 = vcmp.eq.s32.totalorder %v3906_v42, %v752_v8  ;;  %vm994_vm7 = vcmp.eq.s32.totalorder %v3909_v43, %v752_v8  ;;  %v847_v9 = vshll.u32 %v846_v46, 16 }
 0x368   : > { %v4159_v40 = vsel %vm993_vm6, -inf, %v3810_v47  ;;  %v4162_v39 = vsel %vm994_vm7, -inf, %v3812_v48 }
 0x369   : > { %v1211_v54 = vmax.f32 %v4159_v40, %v4162_v39  ;;  %v768_v60 = vadd.s32 %v767_v18, %v765_v27  ;;  %v862_v27 = vcvt.f32.s32 %v4107_v38 }
 0x36a   : > { %v780_v33 = vpop.xlane.xlu1 %779 }
 0x36b   : > { %v781_v41 = vcvt.f32.s32 %v780_v33  ;;  %1212 = vmax.xlane.f32.xlu1 %v1211_v54  ;;  %vm996_vm8 = vcmp.eq.s32.totalorder %v3909_v43, %v768_v60  ;;  %vm995_vm9 = vcmp.eq.s32.totalorder %v3906_v42, %v768_v60 }
 0x36c   : > { %vm3219_vm10 = vmpackc.low %vm996_vm8, %vm994_vm7  ;;  %v4170_v47 = vsel %vm996_vm8, -inf, %v3818_v51  ;;  %v4173_v48 = vsel %vm995_vm9, -inf, %v3816_v50  ;;  %v799_v51 = vshll.u32 %v798_v26, 16  ;;  %v863_v26 = vshll.u32 %v862_v27, 16 }
 0x36d   : > { %v784_v32 = vadd.s32 %v783_v5, %v781_v41  ;;  %3220 = vmatprep.subr.msk.bf16.mxu1 %vm3219_vm10, %v5611_v24  ;;  %vm3221_vm11 = vmpackc.low %vm995_vm9, %vm993_vm6  ;;  %v1214_v63 = vmax.f32 %v4173_v48, %v4170_v47  ;;  %v878_v5 = vcvt.f32.s32 %v4112_v10 }
 0x36e   : > { %3222 = vmatpush1.bf16.xpose.msk.msra.mxu1 %vm3221_vm11, %v5611_v24  ;;  %v796_v17 = vpop.xlane.xlu0 %795 }
 0x36f   : > { %v797_v20 = vcvt.f32.s32 %v796_v17  ;;  %1215 = vmax.xlane.f32.xlu0 %v1214_v63  ;;  %vm997_vm12 = vcmp.eq.s32.totalorder %v3906_v42, %v784_v32  ;;  %vm998_vm13 = vcmp.eq.s32.totalorder %v3909_v43, %v784_v32  ;;  %v879_v63 = vshll.u32 %v878_v5, 16 }
 0x370   : > { %v4187_v50 = vsel %vm997_vm12, -inf, %v3822_v52  ;;  %v4190_v57 = vsel %vm998_vm13, -inf, %v3824_v53  ;;  %v894_v17 = vcvt.f32.s32 %v4117_v49 }
 0x371   : > { %v800_v29 = vadd.s32 %v799_v51, %v797_v20  ;;  %v1217_v6 = vmax.f32 %v4187_v50, %v4190_v57 }
 0x372   : > { %v812_v30 = vpop.xlane.xlu1 %811 }
 0x373   : > { %v813_v34 = vcvt.f32.s32 %v812_v30  ;;  %1218 = vmax.xlane.f32.xlu1 %v1217_v6  ;;  %vm1000_vm14 = vcmp.eq.s32.totalorder %v3909_v43, %v800_v29  ;;  %vm999_vm15 = vcmp.eq.s32.totalorder %v3906_v42, %v800_v29  ;;  %v910_v29 = vcvt.f32.s32 %v4122_v44 }
 0x374   : > { %vm3223_vm1 = vmpackc.low %vm1000_vm14, %vm998_vm13  ;;  %v4198_v52 = vsel %vm999_vm15, -inf, %v3828_v55  ;;  %v4201_v53 = vsel %vm1000_vm14, -inf, %v3830_v56 }
 0x375   : > { %v816_v23 = vadd.s32 %v815_v31, %v813_v34  ;;  %3224 = vmatprep.subr.msk.bf16.mxu1 %vm3223_vm1, %v5611_v24  ;;  %vm3225_vm2 = vmpackc.low %vm999_vm15, %vm997_vm12  ;;  %v1220_v2 = vmax.f32 %v4198_v52, %v4201_v53  ;;  %v895_v31 = vshll.u32 %v894_v17, 16  ;;  %v911_v34 = vshll.u32 %v910_v29, 16  ;;  %v5672_v17 = vld [vmem:[#allocation19_spill] sm:$0xff] }
 0x376   : > { %3226 = vmatpush1.bf16.xpose.msk.msra.mxu1 %vm3225_vm2, %v5611_v24  ;;  %v828_v19 = vpop.xlane.xlu0 %827 }
 0x377   : > { %v829_v55 = vcvt.f32.s32 %v828_v19  ;;  %1221 = vmax.xlane.f32.xlu0 %v1220_v2  ;;  %vm1001_vm3 = vcmp.eq.s32.totalorder %v3906_v42, %v816_v23  ;;  %vm1002_vm4 = vcmp.eq.s32.totalorder %v3909_v43, %v816_v23  ;;  %v926_v2 = vcvt.f32.s32 %v4127_v14 }
 0x378   : > { %v4215_v56 = vsel %vm1001_vm3, -inf, %v3834_v58  ;;  %v4218_v8 = vsel %vm1002_vm4, -inf, %v3836_v59 }
 0x379   : > { %v832_v36 = vadd.s32 %v831_v7, %v829_v55  ;;  %v1223_v45 = vmax.f32 %v4215_v56, %v4218_v8  ;;  %v942_v7 = vcvt.f32.s32 %v4132_v11 }
 0x37a   : > { %v844_v18 = vpop.xlane.xlu1 %843 }
 0x37b   : > { %v845_v54 = vcvt.f32.s32 %v844_v18  ;;  %1224 = vmax.xlane.f32.xlu1 %v1223_v45  ;;  %vm1004_vm5 = vcmp.eq.s32.totalorder %v3909_v43, %v832_v36  ;;  %vm1003_vm6 = vcmp.eq.s32.totalorder %v3906_v42, %v832_v36  ;;  %v927_v36 = vshll.u32 %v926_v2, 16  ;;  %v5666_v45 = vld [vmem:[#allocation16_spill] sm:$0xff] }
 0x37c   : > { %vm3227_vm7 = vmpackc.low %vm1004_vm5, %vm1002_vm4  ;;  %v4226_v58 = vsel %vm1003_vm6, -inf, %v3840_v61  ;;  %v4229_v59 = vsel %vm1004_vm5, -inf, %v3842_v62  ;;  %v943_v27 = vshll.u32 %v942_v7, 16 }
 0x37d   : > { %v848_v60 = vadd.s32 %v847_v9, %v845_v54  ;;  %3228 = vmatprep.subr.msk.bf16.mxu1 %vm3227_vm7, %v5611_v24  ;;  %vm3229_vm8 = vmpackc.low %vm1003_vm6, %vm1001_vm3  ;;  %v1226_v38 = vmax.f32 %v4226_v58, %v4229_v59 }
 0x37e   : > { %3230 = vmatpush1.bf16.xpose.msk.msra.mxu1 %vm3229_vm8, %v5611_v24  ;;  %v860_v33 = vpop.xlane.xlu0 %859 }
 0x37f   : > { %v861_v61 = vcvt.f32.s32 %v860_v33  ;;  %1227 = vmax.xlane.f32.xlu0 %v1226_v38  ;;  %vm1005_vm9 = vcmp.eq.s32.totalorder %v3906_v42, %v848_v60  ;;  %vm1006_vm10 = vcmp.eq.s32.totalorder %v3909_v43, %v848_v60  ;;  %v958_v60 = vcvt.f32.s32 %v4137_v37  ;;  %v5670_v33 = vld [vmem:[#allocation18_spill] sm:$0xff] }
 0x380   : > { %v4243_v62 = vsel %vm1005_vm9, -inf, %v3846_v0  ;;  %v4246_v41 = vsel %vm1006_vm10, -inf, %v3848_v1 }
 0x381   : > { %v864_v32 = vadd.s32 %v863_v26, %v861_v61  ;;  %v1229_v10 = vmax.f32 %v4243_v62, %v4246_v41 }
 0x382   : > { %v876_v35 = vpop.xlane.xlu1 %875 }
 0x383   : > { %v877_v51 = vcvt.f32.s32 %v876_v35  ;;  %1230 = vmax.xlane.f32.xlu1 %v1229_v10  ;;  %vm1008_vm11 = vcmp.eq.s32.totalorder %v3909_v43, %v864_v32  ;;  %vm1007_vm12 = vcmp.eq.s32.totalorder %v3906_v42, %v864_v32  ;;  %v974_v32 = vcvt.f32.s32 %v4142_v22 }
 0x384   : > { %vm3231_vm13 = vmpackc.low %vm1008_vm11, %vm1006_vm10  ;;  %v4254_v0 = vsel %vm1007_vm12, -inf, %v3852_v3  ;;  %v4257_v1 = vsel %vm1008_vm11, -inf, %v3854_v4 }
 0x385   : > { %v880_v20 = vadd.s32 %v879_v63, %v877_v51  ;;  %3232 = vmatprep.subr.msk.bf16.mxu1 %vm3231_vm13, %v5611_v24  ;;  %vm3233_vm14 = vmpackc.low %vm1007_vm12, %vm1005_vm9  ;;  %v1232_v49 = vmax.f32 %v4254_v0, %v4257_v1  ;;  %v959_v63 = vshll.u32 %v958_v60, 16  ;;  %v5686_v60 = vld [vmem:[#allocation26_spill] sm:$0xff] }
 0x386   : > { %3234 = vmatpush1.bf16.xpose.msk.msra.mxu1 %vm3233_vm14, %v5611_v24  ;;  %v892_v6 = vpop.xlane.xlu0 %891 }
 0x387   : > { %v893_v3 = vcvt.f32.s32 %v892_v6  ;;  %1233 = vmax.xlane.f32.xlu0 %v1232_v49  ;;  %vm1009_vm15 = vcmp.eq.s32.totalorder %v3906_v42, %v880_v20  ;;  %vm1010_vm1 = vcmp.eq.s32.totalorder %v3909_v43, %v880_v20  ;;  %v5674_v20 = vld [vmem:[#allocation20_spill] sm:$0xff]  ;;  %v975_v6 = vshll.u32 %v974_v32, 16 }
 0x388   : > { %v4271_v4 = vsel %vm1009_vm15, -inf, %v3858_v12  ;;  %v4274_v30 = vsel %vm1010_vm1, -inf, %v3860_v13  ;;  %v5691_v32 = vld [vmem:[#allocation8_spill] sm:$0xff] }
 0x389   : > { %v896_v21 = vadd.s32 %v895_v31, %v893_v3  ;;  %v1235_v44 = vmax.f32 %v4271_v4, %v4274_v30  ;;  %v990_v3 = vcvt.f32.s32 %v4147_v25 }
 0x38a   : > { %v908_v23 = vpop.xlane.xlu1 %907 }
 0x38b   : > { %v909_v46 = vcvt.f32.s32 %v908_v23  ;;  %1236 = vmax.xlane.f32.xlu1 %v1235_v44  ;;  %vm1012_vm2 = vcmp.eq.s32.totalorder %v3909_v43, %v896_v21  ;;  %vm1011_vm3 = vcmp.eq.s32.totalorder %v3906_v42, %v896_v21  ;;  %v5676_v44 = vld [vmem:[#allocation21_spill] sm:$0xff]  ;;  %v5678_v23 = vld [vmem:[#allocation22_spill] sm:$0xff] }
 0x38c   : > { %vm3235_vm4 = vmpackc.low %vm1012_vm2, %vm1010_vm1  ;;  %v4282_v12 = vsel %vm1011_vm3, -inf, %v3864_v15  ;;  %v4285_v13 = vsel %vm1012_vm2, -inf, %v3866_v16 }
 0x38d   : > { %v912_v19 = vadd.s32 %v911_v34, %v909_v46  ;;  %3236 = vmatprep.subr.msk.bf16.mxu1 %vm3235_vm4, %v5611_v24  ;;  %vm3237_vm5 = vmpackc.low %vm1011_vm3, %vm1009_vm15  ;;  %v1238_v14 = vmax.f32 %v4282_v12, %v4285_v13 }
 0x38e   : > { %3238 = vmatpush1.bf16.xpose.msk.msra.mxu1 %vm3237_vm5, %v5611_v24  ;;  %v924_v55 = vpop.xlane.xlu0 %923 }
 0x38f   : > { %v925_v15 = vcvt.f32.s32 %v924_v55  ;;  %1239 = vmax.xlane.f32.xlu0 %v1238_v14  ;;  %vm1013_vm6 = vcmp.eq.s32.totalorder %v3906_v42, %v912_v19  ;;  %vm1014_vm7 = vcmp.eq.s32.totalorder %v3909_v43, %v912_v19  ;;  %v991_v14 = vshll.u32 %v990_v3, 16  ;;  %v5680_v55 = vld [vmem:[#allocation23_spill] sm:$0xff] }
 0x390   : > { %v4299_v16 = vsel %vm1013_vm6, -inf, %v3870_v28  ;;  %v4302_v9 = vsel %vm1014_vm7, -inf, %v5666_v45  ;;  %v5668_v28 = vld [vmem:[#allocation17_spill] sm:$0xff] }
 0x391   : > { %5667 = vst [vmem:[#allocation16_spill] sm:$0xff] %v4302_v9  ;;  %v928_v18 = vadd.s32 %v927_v36, %v925_v15  ;;  %v1241_v11 = vmax.f32 %v4299_v16, %v4302_v9  ;;  %v5682_v15 = vld [vmem:[#allocation24_spill] sm:$0xff] }
 0x392   : > { %v940_v54 = vpop.xlane.xlu1 %939 }
 0x393   : > { %v941_v38 = vcvt.f32.s32 %v940_v54  ;;  %1242 = vmax.xlane.f32.xlu1 %v1241_v11  ;;  %vm1016_vm8 = vcmp.eq.s32.totalorder %v3909_v43, %v928_v18  ;;  %vm1015_vm9 = vcmp.eq.s32.totalorder %v3906_v42, %v928_v18 }
 0x394   : > { %vm3239_vm10 = vmpackc.low %vm1016_vm8, %vm1014_vm7  ;;  %v4310_v5 = vsel %vm1015_vm9, -inf, %v5668_v28  ;;  %v4313_v26 = vsel %vm1016_vm8, -inf, %v5670_v33  ;;  %v5688_v33 = vld [vmem:[#allocation10_spill] sm:$0xff] }
 0x395   : > { %5669 = vst [vmem:[#allocation17_spill] sm:$0xff] %v4310_v5  ;;  %5671 = vst [vmem:[#allocation18_spill] sm:$0xff] %v4313_v26  ;;  %v944_v61 = vadd.s32 %v943_v27, %v941_v38  ;;  %3240 = vmatprep.subr.msk.bf16.mxu1 %vm3239_vm10, %v5611_v24  ;;  %v1244_v37 = vmax.f32 %v4310_v5, %v4313_v26  ;;  %v5684_v27 = vld [vmem:[#allocation25_spill] sm:$0xff] }
 0x396   : > { %vm3241_vm11 = vmpackc.low %vm1015_vm9, %vm1013_vm6  ;;  %v956_v10 = vpop.xlane.xlu0 %955 }
 0x397   : > { %3242 = vmatpush1.bf16.xpose.msk.msra.mxu1 %vm3241_vm11, %v5611_v24  ;;  %v957_v35 = vcvt.f32.s32 %v956_v10  ;;  %1245 = vmax.xlane.f32.xlu0 %v1244_v37  ;;  %vm1017_vm12 = vcmp.eq.s32.totalorder %v3906_v42, %v944_v61  ;;  %vm1018_vm13 = vcmp.eq.s32.totalorder %v3909_v43, %v944_v61  ;;  %v5689_v61 = vld [vmem:[#allocation7_spill] sm:$0xff]  ;;  %v5692_v10 = vld [vmem:[#allocation12_spill] sm:$0xff] }
 0x398   : > { %v4327_v51 = vsel %vm1017_vm12, -inf, %v5672_v17  ;;  %v4330_v49 = vsel %vm1018_vm13, -inf, %v5674_v20  ;;  %v5690_v37 = vld [vmem:[#allocation11_spill] sm:$0xff]  ;;  %v5695_v17 = vld [vmem:[#allocation14_spill] sm:$0xff] }
 0x399   : > { %5673 = vst [vmem:[#allocation19_spill] sm:$0xff] %v4327_v51  ;;  %5675 = vst [vmem:[#allocation20_spill] sm:$0xff] %v4330_v49  ;;  %v960_v29 = vadd.s32 %v959_v63, %v957_v35  ;;  %v1247_v22 = vmax.f32 %v4327_v51, %v4330_v49  ;;  %v5693_v63 = vld [vmem:[#allocation9_spill] sm:$0xff]  ;;  %v5696_v20 = vld [vmem:[#allocation15_spill] sm:$0xff] }
 0x39a   : > { %v972_v31 = vpop.xlane.xlu1 %971  ;;  %v5694_v35 = vld [vmem:[#allocation13_spill] sm:$0xff] }
 0x39b   : > { %v973_v21 = vcvt.f32.s32 %v972_v31  ;;  %1248 = vmax.xlane.f32.xlu1 %v1247_v22  ;;  %vm1020_vm14 = vcmp.eq.s32.totalorder %v3909_v43, %v960_v29  ;;  %vm1019_vm15 = vcmp.eq.s32.totalorder %v3906_v42, %v960_v29 }
 0x39c   : > { %vm3243_vm1 = vmpackc.low %vm1020_vm14, %vm1018_vm13  ;;  %v4338_v34 = vsel %vm1019_vm15, -inf, %v5676_v44  ;;  %v4341_v2 = vsel %vm1020_vm14, -inf, %v5678_v23 }
 0x39d   : > { %5677 = vst [vmem:[#allocation21_spill] sm:$0xff] %v4338_v34  ;;  %5679 = vst [vmem:[#allocation22_spill] sm:$0xff] %v4341_v2  ;;  %v976_v46 = vadd.s32 %v975_v6, %v973_v21  ;;  %3244 = vmatprep.subr.msk.bf16.mxu1 %vm3243_vm1, %v5611_v24  ;;  %v1250_v25 = vmax.f32 %v4338_v34, %v4341_v2 }
 0x39e   : > { %vm3245_vm2 = vmpackc.low %vm1019_vm15, %vm1017_vm12  ;;  %v988_v19 = vpop.xlane.xlu0 %987 }
 0x39f   : > { %3246 = vmatpush1.bf16.xpose.msk.msra.mxu1 %vm3245_vm2, %v5611_v24  ;;  %vm1021_vm3 = vcmp.eq.s32.totalorder %v3906_v42, %v976_v46  ;;  %vm1022_vm4 = vcmp.eq.s32.totalorder %v3909_v43, %v976_v46  ;;  %v989_v7 = vcvt.f32.s32 %v988_v19  ;;  %1251 = vmax.xlane.f32.xlu0 %v1250_v25 }
 0x3a0   : > { %v4354_v36 = vsel %vm1021_vm3, -inf, %v5680_v55  ;;  %v4357_v45 = vsel %vm1022_vm4, -inf, %v5682_v15 }
 0x3a1   : > { %5681 = vst [vmem:[#allocation23_spill] sm:$0xff] %v4354_v36  ;;  %5683 = vst [vmem:[#allocation24_spill] sm:$0xff] %v4357_v45  ;;  %v992_v18 = vadd.s32 %v991_v14, %v989_v7  ;;  %v1253_v11 = vmax.f32 %v4354_v36, %v4357_v45 }
 0x3a3   : > { %1254 = vmax.xlane.f32.xlu1 %v1253_v11  ;;  %vm1024_vm5 = vcmp.eq.s32.totalorder %v3909_v43, %v992_v18  ;;  %vm1023_vm6 = vcmp.eq.s32.totalorder %v3906_v42, %v992_v18 }
 0x3a4   : > { %vm3247_vm7 = vmpackc.low %vm1024_vm5, %vm1022_vm4  ;;  %v4364_v54 = vsel %vm1023_vm6, -inf, %v5684_v27  ;;  %v4367_v38 = vsel %vm1024_vm5, -inf, %v5686_v60 }
 0x3a5   : > { %5685 = vst [vmem:[#allocation25_spill] sm:$0xff] %v4364_v54  ;;  %5687 = vst [vmem:[#allocation26_spill] sm:$0xff] %v4367_v38  ;;  %3248 = vmatprep.subr.msk.bf16.mxu1 %vm3247_vm7, %v5611_v24  ;;  %v1256_v28 = vmax.f32 %v4364_v54, %v4367_v38 }
 0x3a6   : > { %vm3249_vm8 = vmpackc.low %vm1023_vm6, %vm1021_vm3 }
 0x3a7   : > { %3250 = vmatpush1.bf16.xpose.msk.msra.mxu1 %vm3249_vm8, %v5611_v24  ;;  %1257 = vmax.xlane.f32.xlu0 %v1256_v28 }
 0x3ae   : > { %1154 = vmatmul.mubr.f32.vlgmr.msra.gmra.mrb[0].mxu1 %v5688_v33 }
 0x3af   : > { %1158 = vmatprep.mubr.f32.mxu1 %v5689_v61 }
 0x3b2   : > { %1159 = vmatmul.mubr.f32.gmra.mrb[2].mxu1 %v5690_v37 }
 0x3b3   : > { %1163 = vmatprep.mubr.f32.mxu1 %v5691_v32 }
 0x3b6   : > { %1164 = vmatmul.mubr.f32.gmra.mrb[4].mxu1 %v5692_v10 }
 0x3b7   : > { %1168 = vmatprep.mubr.f32.mxu1 %v5693_v63 }
 0x3ba   : > { %1169 = vmatmul.mubr.f32.gmra.mrb[6].mxu1 %v5694_v35 }
 0x3bb   : > { %1173 = vmatprep.mubr.f32.mxu1 %v5695_v17 }
 0x3be   : > { %1174 = vmatmul.mubr.f32.gmra.mrb[8].mxu1 %v5696_v20 }
 0x3bf   : > { %2330 = vmatprep.mubr.f32.mxu1 %v5689_v61 }
 0x3f8   : > { %v1213_v29 = vpop.xlane.xlu1 %1212 }
 0x3f9   : > { %vm1259_vm9 = vcmp.eq.f32.partialorder %v4159_v40, %v1213_v29  ;;  %vm1260_vm10 = vcmp.eq.f32.partialorder %v4162_v39, %v1213_v29 }
 0x3fa   : > { %v1291_v22 = vsel %vm1259_vm9, %v3906_v42, 256  ;;  %v1292_v6 = vsel %vm1260_vm10, %v3909_v43, 256 }
 0x3fb   : > { %vm1323_vm11 = vcmp.lt.s32.totalorder %v1291_v22, %v1292_v6 }
 0x3fc   : > { %v1216_v31 = vpop.xlane.xlu0 %1215  ;;  %v4389_v3 = vsel %vm1323_vm11, %v1291_v22, %v1292_v6 }
 0x3fd   : > { %vm1261_vm12 = vcmp.eq.f32.partialorder %v4173_v48, %v1216_v31  ;;  %vm1262_vm13 = vcmp.eq.f32.partialorder %v4170_v47, %v1216_v31  ;;  %v1326_v21 = vshra.s32 %v4389_v3, 16 }
 0x3fe   : > { %v1293_v44 = vsel %vm1261_vm12, %v3906_v42, 256  ;;  %v1294_v23 = vsel %vm1262_vm13, %v3909_v43, 256 }
 0x3ff   : > { %vm1339_vm14 = vcmp.lt.s32.totalorder %v1293_v44, %v1294_v23  ;;  %v4396_v46 = vcvt.s32.f32 %v1326_v21 }
 0x400   : > { %v1219_v25 = vpop.xlane.xlu1 %1218  ;;  %v4398_v19 = vsel %vm1339_vm14, %v1293_v44, %v1294_v23 }
 0x401   : > { %vm1263_vm15 = vcmp.eq.f32.partialorder %v4187_v50, %v1219_v25  ;;  %vm1264_vm1 = vcmp.eq.f32.partialorder %v4190_v57, %v1219_v25  ;;  %1329 = vmin.xlane.f32.xlu1 %v4396_v46  ;;  %v1342_v14 = vshra.s32 %v4398_v19, 16 }
 0x402   : > { %v1295_v7 = vsel %vm1263_vm15, %v3906_v42, 256  ;;  %v1296_v55 = vsel %vm1264_vm1, %v3909_v43, 256 }
 0x403   : > { %vm1355_vm2 = vcmp.lt.s32.totalorder %v1295_v7, %v1296_v55  ;;  %v4406_v15 = vcvt.s32.f32 %v1342_v14 }
 0x404   : > { %v1222_v18 = vpop.xlane.xlu0 %1221  ;;  %v4408_v11 = vsel %vm1355_vm2, %v1295_v7, %v1296_v55 }
 0x405   : > { %vm1265_vm3 = vcmp.eq.f32.partialorder %v4198_v52, %v1222_v18  ;;  %vm1266_vm4 = vcmp.eq.f32.partialorder %v4201_v53, %v1222_v18  ;;  %1345 = vmin.xlane.f32.xlu0 %v4406_v15  ;;  %v1358_v27 = vshra.s32 %v4408_v11, 16 }
 0x406   : > { %v1297_v60 = vsel %vm1265_vm3, %v3906_v42, 256  ;;  %v1298_v28 = vsel %vm1266_vm4, %v3909_v43, 256 }
 0x407   : > { %vm1371_vm5 = vcmp.lt.s32.totalorder %v1297_v60, %v1298_v28  ;;  %v4416_v29 = vcvt.s32.f32 %v1358_v27 }
 0x408   : > { %v1225_v22 = vpop.xlane.xlu1 %1224  ;;  %v4418_v6 = vsel %vm1371_vm5, %v1297_v60, %v1298_v28 }
 0x409   : > { %vm1267_vm6 = vcmp.eq.f32.partialorder %v4215_v56, %v1225_v22  ;;  %vm1268_vm7 = vcmp.eq.f32.partialorder %v4218_v8, %v1225_v22  ;;  %1361 = vmin.xlane.f32.xlu1 %v4416_v29  ;;  %v1374_v31 = vshra.s32 %v4418_v6, 16 }
 0x40a   : > { %v1299_v21 = vsel %vm1267_vm6, %v3906_v42, 256  ;;  %v1300_v44 = vsel %vm1268_vm7, %v3909_v43, 256 }
 0x40b   : > { %vm1387_vm8 = vcmp.lt.s32.totalorder %v1299_v21, %v1300_v44  ;;  %v4426_v23 = vcvt.s32.f32 %v1374_v31 }
 0x40c   : > { %v1228_v25 = vpop.xlane.xlu0 %1227  ;;  %v4428_v14 = vsel %vm1387_vm8, %v1299_v21, %v1300_v44 }
 0x40d   : > { %vm1269_vm9 = vcmp.eq.f32.partialorder %v4226_v58, %v1228_v25  ;;  %vm1270_vm10 = vcmp.eq.f32.partialorder %v4229_v59, %v1228_v25  ;;  %1377 = vmin.xlane.f32.xlu0 %v4426_v23  ;;  %v1390_v7 = vshra.s32 %v4428_v14, 16 }
 0x40e   : > { %v1301_v55 = vsel %vm1269_vm9, %v3906_v42, 256  ;;  %v1302_v18 = vsel %vm1270_vm10, %v3909_v43, 256 }
 0x40f   : > { %vm1403_vm11 = vcmp.lt.s32.totalorder %v1301_v55, %v1302_v18  ;;  %v4436_v27 = vcvt.s32.f32 %v1390_v7 }
 0x410   : > { %v1231_v60 = vpop.xlane.xlu1 %1230  ;;  %v4438_v28 = vsel %vm1403_vm11, %v1301_v55, %v1302_v18 }
 0x411   : > { %vm1271_vm12 = vcmp.eq.f32.partialorder %v4243_v62, %v1231_v60  ;;  %vm1272_vm13 = vcmp.eq.f32.partialorder %v4246_v41, %v1231_v60  ;;  %1393 = vmin.xlane.f32.xlu1 %v4436_v27  ;;  %v1406_v22 = vshra.s32 %v4438_v28, 16 }
 0x412   : > { %v1303_v31 = vsel %vm1271_vm12, %v3906_v42, 256  ;;  %v1304_v21 = vsel %vm1272_vm13, %v3909_v43, 256 }
 0x413   : > { %vm1419_vm14 = vcmp.lt.s32.totalorder %v1303_v31, %v1304_v21  ;;  %v4446_v44 = vcvt.s32.f32 %v1406_v22 }
 0x414   : > { %v1234_v25 = vpop.xlane.xlu0 %1233  ;;  %v4448_v7 = vsel %vm1419_vm14, %v1303_v31, %v1304_v21 }
 0x415   : > { %vm1273_vm15 = vcmp.eq.f32.partialorder %v4254_v0, %v1234_v25  ;;  %vm1274_vm1 = vcmp.eq.f32.partialorder %v4257_v1, %v1234_v25  ;;  %1409 = vmin.xlane.f32.xlu0 %v4446_v44  ;;  %v1422_v55 = vshra.s32 %v4448_v7, 16 }
 0x416   : > { %v1305_v18 = vsel %vm1273_vm15, %v3906_v42, 256  ;;  %v1306_v60 = vsel %vm1274_vm1, %v3909_v43, 256 }
 0x417   : > { %vm1435_vm2 = vcmp.lt.s32.totalorder %v1305_v18, %v1306_v60  ;;  %v4456_v24 = vcvt.s32.f32 %v1422_v55 }
 0x418   : > { %v1237_v22 = vpop.xlane.xlu1 %1236  ;;  %v4458_v20 = vsel %vm1435_vm2, %v1305_v18, %v1306_v60 }
 0x419   : > { %vm1275_vm3 = vcmp.eq.f32.partialorder %v4271_v4, %v1237_v22  ;;  %vm1276_vm4 = vcmp.eq.f32.partialorder %v4274_v30, %v1237_v22  ;;  %1425 = vmin.xlane.f32.xlu1 %v4456_v24  ;;  %v1438_v31 = vshra.s32 %v4458_v20, 16 }
 0x41a   : > { %v1307_v21 = vsel %vm1275_vm3, %v3906_v42, 256  ;;  %v1308_v25 = vsel %vm1276_vm4, %v3909_v43, 256 }
 0x41b   : > { %vm1451_vm5 = vcmp.lt.s32.totalorder %v1307_v21, %v1308_v25  ;;  %v4466_v17 = vcvt.s32.f32 %v1438_v31 }
 0x41c   : > { %v4468_v55 = vsel %vm1451_vm5, %v1307_v21, %v1308_v25  ;;  %v1240_v35 = vpop.xlane.xlu0 %1239 }
 0x41d   : > { %vm1277_vm6 = vcmp.eq.f32.partialorder %v4282_v12, %v1240_v35  ;;  %vm1278_vm7 = vcmp.eq.f32.partialorder %v4285_v13, %v1240_v35  ;;  %1441 = vmin.xlane.f32.xlu0 %v4466_v17  ;;  %v1454_v18 = vshra.s32 %v4468_v55, 16 }
 0x41e   : > { %v1309_v60 = vsel %vm1277_vm6, %v3906_v42, 256  ;;  %v1310_v22 = vsel %vm1278_vm7, %v3909_v43, 256 }
 0x41f   : > { %vm1467_vm8 = vcmp.lt.s32.totalorder %v1309_v60, %v1310_v22  ;;  %v4476_v63 = vcvt.s32.f32 %v1454_v18 }
 0x420   : > { %v1243_v31 = vpop.xlane.xlu1 %1242  ;;  %v4478_v10 = vsel %vm1467_vm8, %v1309_v60, %v1310_v22 }
 0x421   : > { %vm1279_vm9 = vcmp.eq.f32.partialorder %v4299_v16, %v1243_v31  ;;  %vm1280_vm10 = vcmp.eq.f32.partialorder %v4302_v9, %v1243_v31  ;;  %1457 = vmin.xlane.f32.xlu1 %v4476_v63  ;;  %v1470_v35 = vshra.s32 %v4478_v10, 16 }
 0x422   : > { %v1311_v21 = vsel %vm1279_vm9, %v3906_v42, 256  ;;  %v1312_v25 = vsel %vm1280_vm10, %v3909_v43, 256 }
 0x423   : > { %vm1483_vm11 = vcmp.lt.s32.totalorder %v1311_v21, %v1312_v25  ;;  %v4486_v32 = vcvt.s32.f32 %v1470_v35 }
 0x424   : > { %v4488_v18 = vsel %vm1483_vm11, %v1311_v21, %v1312_v25  ;;  %v1246_v37 = vpop.xlane.xlu0 %1245 }
 0x425   : > { %vm1281_vm12 = vcmp.eq.f32.partialorder %v4310_v5, %v1246_v37  ;;  %vm1282_vm13 = vcmp.eq.f32.partialorder %v4313_v26, %v1246_v37  ;;  %1473 = vmin.xlane.f32.xlu0 %v4486_v32  ;;  %v1486_v60 = vshra.s32 %v4488_v18, 16 }
 0x426   : > { %v1313_v22 = vsel %vm1281_vm12, %v3906_v42, 256  ;;  %v1314_v31 = vsel %vm1282_vm13, %v3909_v43, 256 }
 0x427   : > { %vm1499_vm14 = vcmp.lt.s32.totalorder %v1313_v22, %v1314_v31  ;;  %v4496_v61 = vcvt.s32.f32 %v1486_v60 }
 0x428   : > { %v1249_v35 = vpop.xlane.xlu1 %1248  ;;  %v4498_v33 = vsel %vm1499_vm14, %v1313_v22, %v1314_v31 }
 0x429   : > { %vm1283_vm15 = vcmp.eq.f32.partialorder %v4327_v51, %v1249_v35  ;;  %vm1284_vm1 = vcmp.eq.f32.partialorder %v4330_v49, %v1249_v35  ;;  %1489 = vmin.xlane.f32.xlu1 %v4496_v61  ;;  %v1502_v37 = vshra.s32 %v4498_v33, 16 }
 0x42a   : > { %v1315_v21 = vsel %vm1283_vm15, %v3906_v42, 256  ;;  %v1316_v25 = vsel %vm1284_vm1, %v3909_v43, 256 }
 0x42b   : > { %vm1515_vm2 = vcmp.lt.s32.totalorder %v1315_v21, %v1316_v25  ;;  %v4506_v26 = vcvt.s32.f32 %v1502_v37 }
 0x42c   : > { %v4508_v60 = vsel %vm1515_vm2, %v1315_v21, %v1316_v25  ;;  %v1252_v5 = vpop.xlane.xlu0 %1251 }
 0x42d   : > { %vm1285_vm3 = vcmp.eq.f32.partialorder %v4338_v34, %v1252_v5  ;;  %vm1286_vm4 = vcmp.eq.f32.partialorder %v4341_v2, %v1252_v5  ;;  %1505 = vmin.xlane.f32.xlu0 %v4506_v26  ;;  %v1518_v22 = vshra.s32 %v4508_v60, 16 }
 0x42e   : > { %v1317_v31 = vsel %vm1285_vm3, %v3906_v42, 256  ;;  %v1318_v35 = vsel %vm1286_vm4, %v3909_v43, 256 }
 0x42f   : > { %vm1531_vm5 = vcmp.lt.s32.totalorder %v1317_v31, %v1318_v35  ;;  %v4516_v49 = vcvt.s32.f32 %v1518_v22 }
 0x430   : > { %v1255_v37 = vpop.xlane.xlu1 %1254  ;;  %v4518_v51 = vsel %vm1531_vm5, %v1317_v31, %v1318_v35 }
 0x431   : > { %vm1287_vm6 = vcmp.eq.f32.partialorder %v4354_v36, %v1255_v37  ;;  %vm1288_vm7 = vcmp.eq.f32.partialorder %v4357_v45, %v1255_v37  ;;  %1521 = vmin.xlane.f32.xlu1 %v4516_v49  ;;  %v1534_v5 = vshra.s32 %v4518_v51, 16  ;;  %v1341_v36 = vand.u32 65535, %v4398_v19 }
 0x432   : > { %v1319_v21 = vsel %vm1287_vm6, %v3906_v42, 256  ;;  %v1320_v25 = vsel %vm1288_vm7, %v3909_v43, 256  ;;  %v1373_v19 = vand.u32 65535, %v4418_v6  ;;  %v1405_v6 = vand.u32 65535, %v4438_v28 }
 0x433   : > { %vm1547_vm8 = vcmp.lt.s32.totalorder %v1319_v21, %v1320_v25  ;;  %v4526_v2 = vcvt.s32.f32 %v1534_v5  ;;  %v1437_v28 = vand.u32 65535, %v4458_v20  ;;  %v1469_v20 = vand.u32 65535, %v4478_v10 }
 0x434   : > { %v4528_v22 = vsel %vm1547_vm8, %v1319_v21, %v1320_v25  ;;  %v1258_v34 = vpop.xlane.xlu0 %1257  ;;  %v1501_v10 = vand.u32 65535, %v4498_v33 }
 0x435   : > { %vm1289_vm9 = vcmp.eq.f32.partialorder %v4364_v54, %v1258_v34  ;;  %vm1290_vm10 = vcmp.eq.f32.partialorder %v4367_v38, %v1258_v34  ;;  %1537 = vmin.xlane.f32.xlu0 %v4526_v2  ;;  %v1550_v31 = vshra.s32 %v4528_v22, 16  ;;  %v1325_v34 = vand.u32 65535, %v4389_v3 }
 0x436   : > { %v1321_v35 = vsel %vm1289_vm9, %v3906_v42, 256  ;;  %v1322_v37 = vsel %vm1290_vm10, %v3909_v43, 256 }
 0x437   : > { %vm1563_vm11 = vcmp.lt.s32.totalorder %v1321_v35, %v1322_v37  ;;  %v4536_v45 = vcvt.s32.f32 %v1550_v31  ;;  %v1327_v54 = vcvt.s32.f32 %v1325_v34 }
 0x438   : > { %v4538_v5 = vsel %vm1563_vm11, %v1321_v35, %v1322_v37  ;;  %v1357_v35 = vand.u32 65535, %v4408_v11 }
 0x439   : > { %1553 = vmin.xlane.f32.xlu1 %v4536_v45  ;;  %v1566_v21 = vshra.s32 %v4538_v5, 16 }
 0x43a   : > { %v1359_v34 = vcvt.s32.f32 %v1357_v35 }
 0x43b   : > { %v4542_v25 = vcvt.s32.f32 %v1566_v21  ;;  %v1343_v21 = vcvt.s32.f32 %v1341_v36  ;;  %v1375_v36 = vcvt.s32.f32 %v1373_v19 }
 0x43d   : > { %1569 = vmin.xlane.f32.xlu0 %v4542_v25 }
 0x48e   : > { %v4546_v38 = vpop.xlane.xlu1 %1329 }
 0x48f   : > { %vm1331_vm12 = vcmp.eq.f32.partialorder %v4396_v46, %v4546_v38  ;;  %v1389_v46 = vand.u32 65535, %v4428_v14  ;;  %v1421_v14 = vand.u32 65535, %v4448_v7  ;;  %v1439_v7 = vcvt.s32.f32 %v1437_v28 }
 0x490   : > { %v1332_v31 = vsel %vm1331_vm12, %v1327_v54, inf }
 0x491   : > { %1333 = vmin.xlane.f32.xlu1 %v1332_v31  ;;  %v1391_v31 = vcvt.s32.f32 %v1389_v46  ;;  %v1423_v19 = vcvt.s32.f32 %v1421_v14  ;;  %v1453_v46 = vand.u32 65535, %v4468_v55  ;;  %v1485_v55 = vand.u32 65535, %v4488_v18 }
 0x492   : > { %v4552_v37 = vpop.xlane.xlu0 %1345  ;;  %v1517_v18 = vand.u32 65535, %v4508_v60  ;;  %v1549_v60 = vand.u32 65535, %v4528_v22 }
 0x493   : > { %vm1347_vm13 = vcmp.eq.f32.partialorder %v4406_v15, %v4552_v37  ;;  %v1487_v14 = vcvt.s32.f32 %v1485_v55 }
 0x494   : > { %v1348_v9 = vsel %vm1347_vm13, %v1343_v21, inf  ;;  %v1407_v21 = vcvt.s32.f32 %v1405_v6  ;;  %v1471_v6 = vcvt.s32.f32 %v1469_v20  ;;  %v1519_v33 = vcvt.s32.f32 %v1517_v18 }
 0x495   : > { %1349 = vmin.xlane.f32.xlu0 %v1348_v9 }
 0x496   : > { %v4556_v3 = vpop.xlane.xlu1 %1361 }
 0x497   : > { %vm1363_vm14 = vcmp.eq.f32.partialorder %v4416_v29, %v4556_v3 }
 0x498   : > { %v1364_v54 = vsel %vm1363_vm14, %v1359_v34, inf }
 0x499   : > { %1365 = vmin.xlane.f32.xlu1 %v1364_v54 }
 0x49a   : > { %v4562_v11 = vpop.xlane.xlu0 %1377 }
 0x49b   : > { %vm1379_vm15 = vcmp.eq.f32.partialorder %v4426_v23, %v4562_v11 }
 0x49c   : > { %v1380_v15 = vsel %vm1379_vm15, %v1375_v36, inf }
 0x49d   : > { %1381 = vmin.xlane.f32.xlu0 %v1380_v15  ;;  %v1455_v15 = vcvt.s32.f32 %v1453_v46 }
 0x49e   : > { %v4566_v9 = vpop.xlane.xlu1 %1393 }
 0x49f   : > { %vm1395_vm1 = vcmp.eq.f32.partialorder %v4436_v27, %v4566_v9 }
 0x4a0   : > { %v1396_v29 = vsel %vm1395_vm1, %v1391_v31, inf }
 0x4a1   : > { %1397 = vmin.xlane.f32.xlu1 %v1396_v29 }
 0x4a2   : > { %v4572_v35 = vpop.xlane.xlu0 %1409 }
 0x4a3   : > { %vm1411_vm2 = vcmp.eq.f32.partialorder %v4446_v44, %v4572_v35 }
 0x4a4   : > { %v1412_v23 = vsel %vm1411_vm2, %v1407_v21, inf }
 0x4a5   : > { %1413 = vmin.xlane.f32.xlu0 %v1412_v23  ;;  %v1503_v23 = vcvt.s32.f32 %v1501_v10 }
 0x4a6   : > { %v4576_v34 = vpop.xlane.xlu1 %1425 }
 0x4a7   : > { %vm1427_vm3 = vcmp.eq.f32.partialorder %v4456_v24, %v4576_v34 }
 0x4a8   : > { %v1428_v27 = vsel %vm1427_vm3, %v1423_v19, inf  ;;  %v1533_v19 = vand.u32 65535, %v4518_v51  ;;  %v1565_v51 = vand.u32 65535, %v4538_v5 }
 0x4a9   : > { %1429 = vmin.xlane.f32.xlu1 %v1428_v27 }
 0x4aa   : > { %v4581_v54 = vpop.xlane.xlu0 %1441  ;;  %v1567_v20 = vcvt.s32.f32 %v1565_v51 }
 0x4ab   : > { %vm1443_vm4 = vcmp.eq.f32.partialorder %v4466_v17, %v4581_v54 }
 0x4ac   : > { %v1444_v44 = vsel %vm1443_vm4, %v1439_v7, inf  ;;  %v1535_v7 = vcvt.s32.f32 %v1533_v19 }
 0x4ad   : > { %1445 = vmin.xlane.f32.xlu0 %v1444_v44  ;;  %v1551_v44 = vcvt.s32.f32 %v1549_v60 }
 0x4ae   : > { %v4586_v36 = vpop.xlane.xlu1 %1457 }
 0x4af   : > { %vm1459_vm5 = vcmp.eq.f32.partialorder %v4476_v63, %v4586_v36 }
 0x4b0   : > { %v1460_v24 = vsel %vm1459_vm5, %v1455_v15, inf }
 0x4b1   : > { %1461 = vmin.xlane.f32.xlu1 %v1460_v24 }
 0x4b2   : > { %v4591_v31 = vpop.xlane.xlu0 %1473 }
 0x4b3   : > { %vm1475_vm6 = vcmp.eq.f32.partialorder %v4486_v32, %v4591_v31 }
 0x4b4   : > { %v1476_v17 = vsel %vm1475_vm6, %v1471_v6, inf  ;;  %v1352_v6 = vcvt.f32.s32 %v4552_v37 }
 0x4b5   : > { %1477 = vmin.xlane.f32.xlu0 %v1476_v17 }
 0x4b6   : > { %v4596_v29 = vpop.xlane.xlu1 %1489  ;;  %v1353_v10 = vshll.u32 %v1352_v6, 16 }
 0x4b7   : > { %vm1491_vm7 = vcmp.eq.f32.partialorder %v4496_v61, %v4596_v29 }
 0x4b8   : > { %v1492_v63 = vsel %vm1491_vm7, %v1487_v14, inf }
 0x4b9   : > { %1493 = vmin.xlane.f32.xlu1 %v1492_v63 }
 0x4ba   : > { %v4601_v21 = vpop.xlane.xlu0 %1505 }
 0x4bb   : > { %vm1507_vm8 = vcmp.eq.f32.partialorder %v4506_v26, %v4601_v21 }
 0x4bc   : > { %v1508_v32 = vsel %vm1507_vm8, %v1503_v23, inf }
 0x4bd   : > { %1509 = vmin.xlane.f32.xlu0 %v1508_v32  ;;  %v1384_v32 = vcvt.f32.s32 %v4562_v11 }
 0x4be   : > { %v4607_v28 = vpop.xlane.xlu1 %1521 }
 0x4bf   : > { %vm1523_vm9 = vcmp.eq.f32.partialorder %v4516_v49, %v4607_v28 }
 0x4c0   : > { %v1524_v61 = vsel %vm1523_vm9, %v1519_v33, inf }
 0x4c1   : > { %1525 = vmin.xlane.f32.xlu1 %v1524_v61  ;;  %v1400_v61 = vcvt.f32.s32 %v4566_v9 }
 0x4c2   : > { %v4611_v27 = vpop.xlane.xlu0 %1537 }
 0x4c3   : > { %vm1539_vm10 = vcmp.eq.f32.partialorder %v4526_v2, %v4611_v27  ;;  %v1336_v2 = vcvt.f32.s32 %v4546_v38 }
 0x4c4   : > { %v1540_v26 = vsel %vm1539_vm10, %v1535_v7, inf  ;;  %v5697_v7 = vmov 1.0|1.0  }
 0x4c5   : > { %1541 = vmin.xlane.f32.xlu0 %v1540_v26  ;;  %v1337_v5 = vshll.u32 %v1336_v2, 16  ;;  %v1385_v26 = vshll.u32 %v1384_v32, 16 }
 0x4c6   : > { %v4617_v46 = vpop.xlane.xlu1 %1553 }
 0x4c7   : > { %vm1555_vm11 = vcmp.eq.f32.partialorder %v4536_v45, %v4617_v46  ;;  %v1368_v45 = vcvt.f32.s32 %v4556_v3 }
 0x4c8   : > { %v1556_v49 = vsel %vm1555_vm11, %v1551_v44, inf }
 0x4c9   : > { %1557 = vmin.xlane.f32.xlu1 %v1556_v49  ;;  %v1369_v3 = vshll.u32 %v1368_v45, 16  ;;  %v1401_v49 = vshll.u32 %v1400_v61, 16 }
 0x4ca   : > { %v4621_v15 = vpop.xlane.xlu0 %1569 }
 0x4cb   : > { %vm1571_vm12 = vcmp.eq.f32.partialorder %v4542_v25, %v4621_v15 }
 0x4cc   : > { %v1572_v22 = vsel %vm1571_vm12, %v1567_v20, inf }
 0x4cd   : > { %1573 = vmin.xlane.f32.xlu0 %v1572_v22  ;;  %v1416_v22 = vcvt.f32.s32 %v4572_v35 }
 0x51e   : > { %v1334_v24 = vpop.xlane.xlu1 %1333 }
 0x51f   : > { %v1335_v55 = vcvt.f32.s32 %v1334_v24 }
 0x521   : > { %v1338_v17 = vadd.s32 %v1337_v5, %v1335_v55  ;;  %v1432_v5 = vcvt.f32.s32 %v4576_v34  ;;  %v1417_v55 = vshll.u32 %v1416_v22, 16 }
 0x522   : > { %v1350_v14 = vpop.xlane.xlu0 %1349 }
 0x523   : > { %vm1579_vm13 = vcmp.eq.s32.totalorder %v3906_v42, %v1338_v17  ;;  %vm1580_vm14 = vcmp.eq.s32.totalorder %v3909_v43, %v1338_v17  ;;  %v1351_v63 = vcvt.f32.s32 %v1350_v14  ;;  %v1433_v14 = vshll.u32 %v1432_v5, 16 }
 0x524   : > { %v4631_v25 = vsel %vm1579_vm13, -inf, %v4159_v40  ;;  %v4636_v38 = vsel %vm1580_vm14, -inf, %v4162_v39 }
 0x525   : > { %v1354_v37 = vadd.s32 %v1353_v10, %v1351_v63  ;;  %v1797_v23 = vmax.f32 %v4631_v25, %v4636_v38  ;;  %v1448_v63 = vcvt.f32.s32 %v4581_v54 }
 0x526   : > { %v1366_v18 = vpop.xlane.xlu1 %1365 }
 0x527   : > { %vm1581_vm15 = vcmp.eq.s32.totalorder %v3906_v42, %v1354_v37  ;;  %v1367_v19 = vcvt.f32.s32 %v1366_v18  ;;  %1798 = vmax.xlane.f32.xlu1 %v1797_v23  ;;  %vm1582_vm1 = vcmp.eq.s32.totalorder %v3909_v43, %v1354_v37  ;;  %v1449_v32 = vshll.u32 %v1448_v63, 16 }
 0x528   : > { %vm3253_vm2 = vmpackc.low %vm1581_vm15, %vm1579_vm13  ;;  %v4644_v40 = vsel %vm1581_vm15, -inf, %v4173_v48  ;;  %v4647_v39 = vsel %vm1582_vm1, -inf, %v4170_v47 }
 0x529   : > { %v1370_v33 = vadd.s32 %v1369_v3, %v1367_v19  ;;  %vm3251_vm3 = vmpackc.low %vm1582_vm1, %vm1580_vm14  ;;  %v1800_v11 = vmax.f32 %v4644_v40, %v4647_v39  ;;  %v1464_v3 = vcvt.f32.s32 %v4586_v36 }
 0x52a   : > { %3252 = vmatprep.subr.msk.bf16.mxu0 %vm3251_vm3, %v5697_v7  ;;  %v1382_v60 = vpop.xlane.xlu0 %1381 }
 0x52b   : > { %vm1583_vm4 = vcmp.eq.s32.totalorder %v3906_v42, %v1370_v33  ;;  %vm1584_vm5 = vcmp.eq.s32.totalorder %v3909_v43, %v1370_v33  ;;  %3254 = vmatpush1.bf16.xpose.msk.msra.mxu0 %vm3253_vm2, %v5697_v7  ;;  %v1383_v47 = vcvt.f32.s32 %v1382_v60  ;;  %1801 = vmax.xlane.f32.xlu0 %v1800_v11  ;;  %v1465_v11 = vshll.u32 %v1464_v3, 16 }
 0x52c   : > { %v4661_v48 = vsel %vm1583_vm4, -inf, %v4187_v50  ;;  %v4666_v9 = vsel %vm1584_vm5, -inf, %v4190_v57  ;;  %v1480_v60 = vcvt.f32.s32 %v4591_v31 }
 0x52d   : > { %v1386_v51 = vadd.s32 %v1385_v26, %v1383_v47  ;;  %v1803_v44 = vmax.f32 %v4661_v48, %v4666_v9 }
 0x52e   : > { %v1398_v20 = vpop.xlane.xlu1 %1397 }
 0x52f   : > { %vm1585_vm6 = vcmp.eq.s32.totalorder %v3906_v42, %v1386_v51  ;;  %v1399_v2 = vcvt.f32.s32 %v1398_v20  ;;  %1804 = vmax.xlane.f32.xlu1 %v1803_v44  ;;  %vm1586_vm7 = vcmp.eq.s32.totalorder %v3909_v43, %v1386_v51  ;;  %v1496_v51 = vcvt.f32.s32 %v4596_v29 }
 0x530   : > { %vm3257_vm8 = vmpackc.low %vm1585_vm6, %vm1583_vm4  ;;  %v4676_v50 = vsel %vm1585_vm6, -inf, %v4198_v52  ;;  %v4679_v57 = vsel %vm1586_vm7, -inf, %v4201_v53 }
 0x531   : > { %v1402_v24 = vadd.s32 %v1401_v49, %v1399_v2  ;;  %vm3255_vm9 = vmpackc.low %vm1586_vm7, %vm1584_vm5  ;;  %v1806_v35 = vmax.f32 %v4676_v50, %v4679_v57  ;;  %v1481_v49 = vshll.u32 %v1480_v60, 16  ;;  %v1497_v2 = vshll.u32 %v1496_v51, 16  ;;  %v5701_v60 = vld [vmem:[#allocation19_spill] sm:$0xff] }
 0x532   : > { %3256 = vmatprep.subr.msk.bf16.mxu0 %vm3255_vm9, %v5697_v7  ;;  %v1414_v6 = vpop.xlane.xlu0 %1413 }
 0x533   : > { %vm1587_vm10 = vcmp.eq.s32.totalorder %v3906_v42, %v1402_v24  ;;  %vm1588_vm11 = vcmp.eq.s32.totalorder %v3909_v43, %v1402_v24  ;;  %3258 = vmatpush1.bf16.xpose.msk.msra.mxu0 %vm3257_vm8, %v5697_v7  ;;  %v1415_v52 = vcvt.f32.s32 %v1414_v6  ;;  %1807 = vmax.xlane.f32.xlu0 %v1806_v35  ;;  %v1512_v35 = vcvt.f32.s32 %v4601_v21 }
 0x534   : > { %v4693_v53 = vsel %vm1587_vm10, -inf, %v4215_v56  ;;  %v4698_v34 = vsel %vm1588_vm11, -inf, %v4218_v8 }
 0x535   : > { %v1418_v17 = vadd.s32 %v1417_v55, %v1415_v52  ;;  %v1809_v45 = vmax.f32 %v4693_v53, %v4698_v34  ;;  %v1528_v55 = vcvt.f32.s32 %v4607_v28 }
 0x536   : > { %v1430_v10 = vpop.xlane.xlu1 %1429 }
 0x537   : > { %vm1589_vm12 = vcmp.eq.s32.totalorder %v3906_v42, %v1418_v17  ;;  %v1431_v37 = vcvt.f32.s32 %v1430_v10  ;;  %1810 = vmax.xlane.f32.xlu1 %v1809_v45  ;;  %vm1590_vm13 = vcmp.eq.s32.totalorder %v3909_v43, %v1418_v17  ;;  %v1513_v17 = vshll.u32 %v1512_v35, 16  ;;  %v5698_v45 = vld [vmem:[#allocation16_spill] sm:$0xff] }
 0x538   : > { %vm3261_vm14 = vmpackc.low %vm1589_vm12, %vm1587_vm10  ;;  %v4708_v56 = vsel %vm1589_vm12, -inf, %v4226_v58  ;;  %v4711_v8 = vsel %vm1590_vm13, -inf, %v4229_v59  ;;  %v1529_v63 = vshll.u32 %v1528_v55, 16 }
 0x539   : > { %v1434_v23 = vadd.s32 %v1433_v14, %v1431_v37  ;;  %vm3259_vm15 = vmpackc.low %vm1590_vm13, %vm1588_vm11  ;;  %v1812_v54 = vmax.f32 %v4708_v56, %v4711_v8 }
 0x53a   : > { %3260 = vmatprep.subr.msk.bf16.mxu0 %vm3259_vm15, %v5697_v7  ;;  %v1446_v18 = vpop.xlane.xlu0 %1445 }
 0x53b   : > { %vm1591_vm1 = vcmp.eq.s32.totalorder %v3906_v42, %v1434_v23  ;;  %vm1592_vm2 = vcmp.eq.s32.totalorder %v3909_v43, %v1434_v23  ;;  %3262 = vmatpush1.bf16.xpose.msk.msra.mxu0 %vm3261_vm14, %v5697_v7  ;;  %v1447_v58 = vcvt.f32.s32 %v1446_v18  ;;  %1813 = vmax.xlane.f32.xlu0 %v1812_v54  ;;  %v1544_v23 = vcvt.f32.s32 %v4611_v27  ;;  %v5700_v18 = vld [vmem:[#allocation18_spill] sm:$0xff] }
 0x53c   : > { %v4725_v59 = vsel %vm1591_vm1, -inf, %v4243_v62  ;;  %v4730_v36 = vsel %vm1592_vm2, -inf, %v4246_v41 }
 0x53d   : > { %v1450_v19 = vadd.s32 %v1449_v32, %v1447_v58  ;;  %v1815_v33 = vmax.f32 %v4725_v59, %v4730_v36 }
 0x53e   : > { %v1462_v61 = vpop.xlane.xlu1 %1461 }
 0x53f   : > { %vm1593_vm3 = vcmp.eq.s32.totalorder %v3906_v42, %v1450_v19  ;;  %v1463_v26 = vcvt.f32.s32 %v1462_v61  ;;  %1816 = vmax.xlane.f32.xlu1 %v1815_v33  ;;  %vm1594_vm4 = vcmp.eq.s32.totalorder %v3909_v43, %v1450_v19  ;;  %v1560_v19 = vcvt.f32.s32 %v4617_v46 }
 0x540   : > { %vm3265_vm5 = vmpackc.low %vm1593_vm3, %vm1591_vm1  ;;  %v4740_v62 = vsel %vm1593_vm3, -inf, %v4254_v0  ;;  %v4743_v41 = vsel %vm1594_vm4, -inf, %v4257_v1 }
 0x541   : > { %v1466_v47 = vadd.s32 %v1465_v11, %v1463_v26  ;;  %vm3263_vm6 = vmpackc.low %vm1594_vm4, %vm1592_vm2  ;;  %v1818_v31 = vmax.f32 %v4740_v62, %v4743_v41  ;;  %v1545_v11 = vshll.u32 %v1544_v23, 16  ;;  %v5708_v23 = vld [vmem:[#allocation26_spill] sm:$0xff] }
 0x542   : > { %3264 = vmatprep.subr.msk.bf16.mxu0 %vm3263_vm6, %v5697_v7  ;;  %v1478_v44 = vpop.xlane.xlu0 %1477 }
 0x543   : > { %vm1595_vm7 = vcmp.eq.s32.totalorder %v3906_v42, %v1466_v47  ;;  %vm1596_vm8 = vcmp.eq.s32.totalorder %v3909_v43, %v1466_v47  ;;  %3266 = vmatpush1.bf16.xpose.msk.msra.mxu0 %vm3265_vm5, %v5697_v7  ;;  %v1479_v0 = vcvt.f32.s32 %v1478_v44  ;;  %1819 = vmax.xlane.f32.xlu0 %v1818_v31  ;;  %v5702_v47 = vld [vmem:[#allocation20_spill] sm:$0xff]  ;;  %v1561_v44 = vshll.u32 %v1560_v19, 16 }
 0x544   : > { %v4757_v1 = vsel %vm1595_vm7, -inf, %v4271_v4  ;;  %v4762_v29 = vsel %vm1596_vm8, -inf, %v4274_v30  ;;  %v5712_v19 = vld [vmem:[#allocation8_spill] sm:$0xff] }
 0x545   : > { %v1482_v20 = vadd.s32 %v1481_v49, %v1479_v0  ;;  %v1821_v22 = vmax.f32 %v4757_v1, %v4762_v29  ;;  %v1576_v0 = vcvt.f32.s32 %v4621_v15 }
 0x546   : > { %v1494_v24 = vpop.xlane.xlu1 %1493 }
 0x547   : > { %vm1597_vm9 = vcmp.eq.s32.totalorder %v3906_v42, %v1482_v20  ;;  %v1495_v5 = vcvt.f32.s32 %v1494_v24  ;;  %1822 = vmax.xlane.f32.xlu1 %v1821_v22  ;;  %vm1598_vm10 = vcmp.eq.s32.totalorder %v3909_v43, %v1482_v20  ;;  %v5703_v22 = vld [vmem:[#allocation21_spill] sm:$0xff]  ;;  %v5704_v24 = vld [vmem:[#allocation22_spill] sm:$0xff] }
 0x548   : > { %vm3269_vm11 = vmpackc.low %vm1597_vm9, %vm1595_vm7  ;;  %v4772_v4 = vsel %vm1597_vm9, -inf, %v4282_v12  ;;  %v4775_v30 = vsel %vm1598_vm10, -inf, %v4285_v13 }
 0x549   : > { %v1498_v6 = vadd.s32 %v1497_v2, %v1495_v5  ;;  %vm3267_vm12 = vmpackc.low %vm1598_vm10, %vm1596_vm8  ;;  %v1824_v21 = vmax.f32 %v4772_v4, %v4775_v30 }
 0x54a   : > { %3268 = vmatprep.subr.msk.bf16.mxu0 %vm3267_vm12, %v5697_v7  ;;  %v1510_v52 = vpop.xlane.xlu0 %1509 }
 0x54b   : > { %vm1599_vm13 = vcmp.eq.s32.totalorder %v3906_v42, %v1498_v6  ;;  %vm1600_vm14 = vcmp.eq.s32.totalorder %v3909_v43, %v1498_v6  ;;  %3270 = vmatpush1.bf16.xpose.msk.msra.mxu0 %vm3269_vm11, %v5697_v7  ;;  %v1511_v12 = vcvt.f32.s32 %v1510_v52  ;;  %1825 = vmax.xlane.f32.xlu0 %v1824_v21  ;;  %v1577_v21 = vshll.u32 %v1576_v0, 16  ;;  %v5705_v52 = vld [vmem:[#allocation23_spill] sm:$0xff] }
 0x54c   : > { %v4789_v13 = vsel %vm1599_vm13, -inf, %v4299_v16  ;;  %v4794_v28 = vsel %vm1600_vm14, -inf, %v5698_v45  ;;  %v5699_v16 = vld [vmem:[#allocation17_spill] sm:$0xff] }
 0x54d   : > { %v1514_v14 = vadd.s32 %v1513_v17, %v1511_v12  ;;  %v1827_v10 = vmax.f32 %v4789_v13, %v4794_v28  ;;  %v5706_v12 = vld [vmem:[#allocation24_spill] sm:$0xff] }
 0x54e   : > { %v1526_v37 = vpop.xlane.xlu1 %1525 }
 0x54f   : > { %vm1601_vm15 = vcmp.eq.s32.totalorder %v3906_v42, %v1514_v14  ;;  %v1527_v54 = vcvt.f32.s32 %v1526_v37  ;;  %1828 = vmax.xlane.f32.xlu1 %v1827_v10  ;;  %vm1602_vm1 = vcmp.eq.s32.totalorder %v3909_v43, %v1514_v14 }
 0x550   : > { %vm3273_vm2 = vmpackc.low %vm1601_vm15, %vm1599_vm13  ;;  %v4804_v3 = vsel %vm1601_vm15, -inf, %v5699_v16  ;;  %v4807_v32 = vsel %vm1602_vm1, -inf, %v5700_v18  ;;  %v5709_v18 = vld [vmem:[#allocation10_spill] sm:$0xff] }
 0x551   : > { %v1530_v58 = vadd.s32 %v1529_v63, %v1527_v54  ;;  %vm3271_vm3 = vmpackc.low %vm1602_vm1, %vm1600_vm14  ;;  %v1830_v27 = vmax.f32 %v4804_v3, %v4807_v32  ;;  %v5707_v63 = vld [vmem:[#allocation25_spill] sm:$0xff] }
 0x552   : > { %3272 = vmatprep.subr.msk.bf16.mxu0 %vm3271_vm3, %v5697_v7  ;;  %v1542_v33 = vpop.xlane.xlu0 %1541 }
 0x553   : > { %vm1603_vm4 = vcmp.eq.s32.totalorder %v3906_v42, %v1530_v58  ;;  %vm1604_vm5 = vcmp.eq.s32.totalorder %v3909_v43, %v1530_v58  ;;  %3274 = vmatpush1.bf16.xpose.msk.msra.mxu0 %vm3273_vm2, %v5697_v7  ;;  %v1543_v61 = vcvt.f32.s32 %v1542_v33  ;;  %1831 = vmax.xlane.f32.xlu0 %v1830_v27  ;;  %v5710_v58 = vld [vmem:[#allocation7_spill] sm:$0xff]  ;;  %v5713_v33 = vld [vmem:[#allocation12_spill] sm:$0xff] }
 0x554   : > { %v4821_v26 = vsel %vm1603_vm4, -inf, %v5701_v60  ;;  %v4826_v46 = vsel %vm1604_vm5, -inf, %v5702_v47  ;;  %v5711_v27 = vld [vmem:[#allocation11_spill] sm:$0xff]  ;;  %v5716_v60 = vld [vmem:[#allocation14_spill] sm:$0xff] }
 0x555   : > { %v1546_v31 = vadd.s32 %v1545_v11, %v1543_v61  ;;  %v1833_v51 = vmax.f32 %v4821_v26, %v4826_v46  ;;  %v5714_v11 = vld [vmem:[#allocation9_spill] sm:$0xff]  ;;  %v5717_v47 = vld [vmem:[#allocation15_spill] sm:$0xff] }
 0x556   : > { %v1558_v49 = vpop.xlane.xlu1 %1557  ;;  %v5715_v61 = vld [vmem:[#allocation13_spill] sm:$0xff] }
 0x557   : > { %vm1605_vm6 = vcmp.eq.s32.totalorder %v3906_v42, %v1546_v31  ;;  %v1559_v20 = vcvt.f32.s32 %v1558_v49  ;;  %1834 = vmax.xlane.f32.xlu1 %v1833_v51  ;;  %vm1606_vm7 = vcmp.eq.s32.totalorder %v3909_v43, %v1546_v31  ;;  %v5718_v31 = vld [vmem:[#allocation6_spill] sm:$0xff] }
 0x558   : > { %vm3277_vm8 = vmpackc.low %vm1605_vm6, %vm1603_vm4  ;;  %v4836_v2 = vsel %vm1605_vm6, -inf, %v5703_v22  ;;  %v4839_v35 = vsel %vm1606_vm7, -inf, %v5704_v24 }
 0x559   : > { %v1562_v5 = vadd.s32 %v1561_v44, %v1559_v20  ;;  %vm3275_vm9 = vmpackc.low %vm1606_vm7, %vm1604_vm5  ;;  %v1836_v15 = vmax.f32 %v4836_v2, %v4839_v35 }
 0x55a   : > { %3276 = vmatprep.subr.msk.bf16.mxu0 %vm3275_vm9, %v5697_v7  ;;  %v1574_v6 = vpop.xlane.xlu0 %1573 }
 0x55b   : > { %vm1607_vm10 = vcmp.eq.s32.totalorder %v3906_v42, %v1562_v5  ;;  %vm1608_vm11 = vcmp.eq.s32.totalorder %v3909_v43, %v1562_v5  ;;  %3278 = vmatpush1.bf16.xpose.msk.msra.mxu0 %vm3277_vm8, %v5697_v7  ;;  %v1575_v55 = vcvt.f32.s32 %v1574_v6  ;;  %1837 = vmax.xlane.f32.xlu0 %v1836_v15 }
 0x55c   : > { %v4850_v17 = vsel %vm1607_vm10, -inf, %v5705_v52  ;;  %v4853_v45 = vsel %vm1608_vm11, -inf, %v5706_v12 }
 0x55d   : > { %v1578_v14 = vadd.s32 %v1577_v21, %v1575_v55  ;;  %v1839_v10 = vmax.f32 %v4850_v17, %v4853_v45 }
 0x55f   : > { %vm1609_vm12 = vcmp.eq.s32.totalorder %v3906_v42, %v1578_v14  ;;  %1840 = vmax.xlane.f32.xlu1 %v1839_v10  ;;  %vm1610_vm13 = vcmp.eq.s32.totalorder %v3909_v43, %v1578_v14 }
 0x560   : > { %vm3281_vm14 = vmpackc.low %vm1609_vm12, %vm1607_vm10  ;;  %v4860_v37 = vsel %vm1609_vm12, -inf, %v5707_v63  ;;  %v4863_v54 = vsel %vm1610_vm13, -inf, %v5708_v23 }
 0x561   : > { %vm3279_vm15 = vmpackc.low %vm1610_vm13, %vm1608_vm11  ;;  %v1842_v16 = vmax.f32 %v4860_v37, %v4863_v54 }
 0x562   : > { %3280 = vmatprep.subr.msk.bf16.mxu0 %vm3279_vm15, %v5697_v7 }
 0x563   : > { %3282 = vmatpush1.bf16.xpose.msk.msra.mxu0 %vm3281_vm14, %v5697_v7  ;;  %1843 = vmax.xlane.f32.xlu0 %v1842_v16 }
 0x56a   : > { %1740 = vmatmul.mubr.f32.vlgmr.msra.gmra.mrb[32].mxu0 %v5709_v18 }
 0x56b   : > { %1744 = vmatprep.mubr.f32.mxu0 %v5710_v58 }
 0x56e   : > { %1745 = vmatmul.mubr.f32.gmra.mrb[34].mxu0 %v5711_v27 }
 0x56f   : > { %1749 = vmatprep.mubr.f32.mxu0 %v5712_v19 }
 0x572   : > { %1750 = vmatmul.mubr.f32.gmra.mrb[36].mxu0 %v5713_v33 }
 0x573   : > { %1754 = vmatprep.mubr.f32.mxu0 %v5714_v11 }
 0x576   : > { %1755 = vmatmul.mubr.f32.gmra.mrb[38].mxu0 %v5715_v61 }
 0x577   : > { %1759 = vmatprep.mubr.f32.mxu0 %v5716_v60 }
 0x57a   : > { %1760 = vmatmul.mubr.f32.gmra.mrb[40].mxu0 %v5717_v47 }
 0x57b   : > { %2325 = vmatprep.mubr.f32.mxu0 %v5718_v31 }
 0x5b4   : > { %v1799_v51 = vpop.xlane.xlu1 %1798 }
 0x5b5   : > { %vm1845_vm1 = vcmp.eq.f32.partialorder %v4631_v25, %v1799_v51  ;;  %vm1846_vm2 = vcmp.eq.f32.partialorder %v4636_v38, %v1799_v51 }
 0x5b6   : > { %v1877_v44 = vsel %vm1845_vm1, %v3906_v42, 256  ;;  %v1878_v49 = vsel %vm1846_vm2, %v3909_v43, 256 }
 0x5b7   : > { %vm1909_vm3 = vcmp.lt.s32.totalorder %v1877_v44, %v1878_v49 }
 0x5b8   : > { %v4883_v0 = vsel %vm1909_vm3, %v1877_v44, %v1878_v49  ;;  %v1802_v20 = vpop.xlane.xlu0 %1801 }
 0x5b9   : > { %vm1847_vm4 = vcmp.eq.f32.partialorder %v4644_v40, %v1802_v20  ;;  %vm1848_vm5 = vcmp.eq.f32.partialorder %v4647_v39, %v1802_v20  ;;  %v1912_v22 = vshra.s32 %v4883_v0, 16 }
 0x5ba   : > { %v1879_v24 = vsel %vm1847_vm4, %v3906_v42, 256  ;;  %v1880_v25 = vsel %vm1848_vm5, %v3909_v43, 256 }
 0x5bb   : > { %vm1925_vm6 = vcmp.lt.s32.totalorder %v1879_v24, %v1880_v25  ;;  %v4890_v38 = vcvt.s32.f32 %v1912_v22 }
 0x5bc   : > { %v4892_v5 = vsel %vm1925_vm6, %v1879_v24, %v1880_v25  ;;  %v1805_v15 = vpop.xlane.xlu1 %1804 }
 0x5bd   : > { %vm1849_vm7 = vcmp.eq.f32.partialorder %v4661_v48, %v1805_v15  ;;  %vm1850_vm8 = vcmp.eq.f32.partialorder %v4666_v9, %v1805_v15  ;;  %1915 = vmin.xlane.f32.xlu1 %v4890_v38  ;;  %v1928_v40 = vshra.s32 %v4892_v5, 16 }
 0x5be   : > { %v1881_v39 = vsel %vm1849_vm7, %v3906_v42, 256  ;;  %v1882_v6 = vsel %vm1850_vm8, %v3909_v43, 256 }
 0x5bf   : > { %vm1941_vm9 = vcmp.lt.s32.totalorder %v1881_v39, %v1882_v6  ;;  %v4900_v21 = vcvt.s32.f32 %v1928_v40 }
 0x5c0   : > { %v4902_v55 = vsel %vm1941_vm9, %v1881_v39, %v1882_v6  ;;  %v1808_v52 = vpop.xlane.xlu0 %1807 }
 0x5c1   : > { %vm1851_vm10 = vcmp.eq.f32.partialorder %v4676_v50, %v1808_v52  ;;  %vm1852_vm11 = vcmp.eq.f32.partialorder %v4679_v57, %v1808_v52  ;;  %1931 = vmin.xlane.f32.xlu0 %v4900_v21  ;;  %v1944_v48 = vshra.s32 %v4902_v55, 16 }
 0x5c2   : > { %v1883_v9 = vsel %vm1851_vm10, %v3906_v42, 256  ;;  %v1884_v12 = vsel %vm1852_vm11, %v3909_v43, 256 }
 0x5c3   : > { %vm1957_vm12 = vcmp.lt.s32.totalorder %v1883_v9, %v1884_v12  ;;  %v4910_v14 = vcvt.s32.f32 %v1944_v48 }
 0x5c4   : > { %v4912_v10 = vsel %vm1957_vm12, %v1883_v9, %v1884_v12  ;;  %v1811_v63 = vpop.xlane.xlu1 %1810 }
 0x5c5   : > { %vm1853_vm13 = vcmp.eq.f32.partialorder %v4693_v53, %v1811_v63  ;;  %vm1854_vm14 = vcmp.eq.f32.partialorder %v4698_v34, %v1811_v63  ;;  %1947 = vmin.xlane.f32.xlu1 %v4910_v14  ;;  %v1960_v50 = vshra.s32 %v4912_v10, 16 }
 0x5c6   : > { %v1885_v57 = vsel %vm1853_vm13, %v3906_v42, 256  ;;  %v1886_v23 = vsel %vm1854_vm14, %v3909_v43, 256 }
 0x5c7   : > { %vm1973_vm15 = vcmp.lt.s32.totalorder %v1885_v57, %v1886_v23  ;;  %v4920_v16 = vcvt.s32.f32 %v1960_v50 }
 0x5c8   : > { %v4922_v58 = vsel %vm1973_vm15, %v1885_v57, %v1886_v23  ;;  %v1814_v31 = vpop.xlane.xlu0 %1813 }
 0x5c9   : > { %vm1855_vm1 = vcmp.eq.f32.partialorder %v4708_v56, %v1814_v31  ;;  %vm1856_vm2 = vcmp.eq.f32.partialorder %v4711_v8, %v1814_v31  ;;  %1963 = vmin.xlane.f32.xlu0 %v4920_v16  ;;  %v1976_v53 = vshra.s32 %v4922_v58, 16 }
 0x5ca   : > { %v1887_v34 = vsel %vm1855_vm1, %v3906_v42, 256  ;;  %v1888_v51 = vsel %vm1856_vm2, %v3909_v43, 256 }
 0x5cb   : > { %vm1989_vm3 = vcmp.lt.s32.totalorder %v1887_v34, %v1888_v51  ;;  %v4930_v44 = vcvt.s32.f32 %v1976_v53 }
 0x5cc   : > { %v4932_v49 = vsel %vm1989_vm3, %v1887_v34, %v1888_v51  ;;  %v1817_v20 = vpop.xlane.xlu1 %1816 }
 0x5cd   : > { %vm1857_vm4 = vcmp.eq.f32.partialorder %v4725_v59, %v1817_v20  ;;  %vm1858_vm5 = vcmp.eq.f32.partialorder %v4730_v36, %v1817_v20  ;;  %1979 = vmin.xlane.f32.xlu1 %v4930_v44  ;;  %v1992_v56 = vshra.s32 %v4932_v49, 16 }
 0x5ce   : > { %v1889_v8 = vsel %vm1857_vm4, %v3906_v42, 256  ;;  %v1890_v22 = vsel %vm1858_vm5, %v3909_v43, 256 }
 0x5cf   : > { %vm2005_vm6 = vcmp.lt.s32.totalorder %v1889_v8, %v1890_v22  ;;  %v4940_v24 = vcvt.s32.f32 %v1992_v56 }
 0x5d0   : > { %v4942_v25 = vsel %vm2005_vm6, %v1889_v8, %v1890_v22  ;;  %v1820_v15 = vpop.xlane.xlu0 %1819 }
 0x5d1   : > { %vm1859_vm7 = vcmp.eq.f32.partialorder %v4740_v62, %v1820_v15  ;;  %vm1860_vm8 = vcmp.eq.f32.partialorder %v4743_v41, %v1820_v15  ;;  %1995 = vmin.xlane.f32.xlu0 %v4940_v24  ;;  %v2008_v59 = vshra.s32 %v4942_v25, 16 }
 0x5d2   : > { %v1891_v36 = vsel %vm1859_vm7, %v3906_v42, 256  ;;  %v1892_v40 = vsel %vm1860_vm8, %v3909_v43, 256 }
 0x5d3   : > { %vm2021_vm9 = vcmp.lt.s32.totalorder %v1891_v36, %v1892_v40  ;;  %v4950_v39 = vcvt.s32.f32 %v2008_v59 }
 0x5d4   : > { %v4952_v6 = vsel %vm2021_vm9, %v1891_v36, %v1892_v40  ;;  %v1823_v52 = vpop.xlane.xlu1 %1822 }
 0x5d5   : > { %vm1861_vm10 = vcmp.eq.f32.partialorder %v4757_v1, %v1823_v52  ;;  %vm1862_vm11 = vcmp.eq.f32.partialorder %v4762_v29, %v1823_v52  ;;  %2011 = vmin.xlane.f32.xlu1 %v4950_v39  ;;  %v2024_v62 = vshra.s32 %v4952_v6, 16 }
 0x5d6   : > { %v1893_v41 = vsel %vm1861_vm10, %v3906_v42, 256  ;;  %v1894_v48 = vsel %vm1862_vm11, %v3909_v43, 256 }
 0x5d7   : > { %vm2037_vm12 = vcmp.lt.s32.totalorder %v1893_v41, %v1894_v48  ;;  %v4960_v9 = vcvt.s32.f32 %v2024_v62 }
 0x5d8   : > { %v4962_v12 = vsel %vm2037_vm12, %v1893_v41, %v1894_v48  ;;  %v1826_v63 = vpop.xlane.xlu0 %1825 }
 0x5d9   : > { %vm1863_vm13 = vcmp.eq.f32.partialorder %v4772_v4, %v1826_v63  ;;  %vm1864_vm14 = vcmp.eq.f32.partialorder %v4775_v30, %v1826_v63  ;;  %2027 = vmin.xlane.f32.xlu0 %v4960_v9  ;;  %v2040_v1 = vshra.s32 %v4962_v12, 16 }
 0x5da   : > { %v1895_v29 = vsel %vm1863_vm13, %v3906_v42, 256  ;;  %v1896_v50 = vsel %vm1864_vm14, %v3909_v43, 256 }
 0x5db   : > { %vm2053_vm15 = vcmp.lt.s32.totalorder %v1895_v29, %v1896_v50  ;;  %v4970_v57 = vcvt.s32.f32 %v2040_v1 }
 0x5dc   : > { %v4972_v23 = vsel %vm2053_vm15, %v1895_v29, %v1896_v50  ;;  %v1829_v31 = vpop.xlane.xlu1 %1828 }
 0x5dd   : > { %vm1865_vm1 = vcmp.eq.f32.partialorder %v4789_v13, %v1829_v31  ;;  %vm1866_vm2 = vcmp.eq.f32.partialorder %v4794_v28, %v1829_v31  ;;  %2043 = vmin.xlane.f32.xlu1 %v4970_v57  ;;  %v2056_v4 = vshra.s32 %v4972_v23, 16 }
 0x5de   : > { %v1897_v30 = vsel %vm1865_vm1, %v3906_v42, 256  ;;  %v1898_v53 = vsel %vm1866_vm2, %v3909_v43, 256 }
 0x5df   : > { %vm2069_vm3 = vcmp.lt.s32.totalorder %v1897_v30, %v1898_v53  ;;  %v4980_v34 = vcvt.s32.f32 %v2056_v4 }
 0x5e0   : > { %v4982_v51 = vsel %vm2069_vm3, %v1897_v30, %v1898_v53  ;;  %v1832_v20 = vpop.xlane.xlu0 %1831 }
 0x5e1   : > { %vm1867_vm4 = vcmp.eq.f32.partialorder %v4804_v3, %v1832_v20  ;;  %vm1868_vm5 = vcmp.eq.f32.partialorder %v4807_v32, %v1832_v20  ;;  %2059 = vmin.xlane.f32.xlu0 %v4980_v34  ;;  %v2072_v13 = vshra.s32 %v4982_v51, 16 }
 0x5e2   : > { %v1899_v28 = vsel %vm1867_vm4, %v3906_v42, 256  ;;  %v1900_v56 = vsel %vm1868_vm5, %v3909_v43, 256 }
 0x5e3   : > { %vm2085_vm6 = vcmp.lt.s32.totalorder %v1899_v28, %v1900_v56  ;;  %v4990_v8 = vcvt.s32.f32 %v2072_v13 }
 0x5e4   : > { %v4992_v22 = vsel %vm2085_vm6, %v1899_v28, %v1900_v56  ;;  %v1835_v15 = vpop.xlane.xlu1 %1834  ;;  %v1927_v56 = vand.u32 65535, %v4892_v5  ;;  %v1959_v5 = vand.u32 65535, %v4912_v10  ;;  %v1991_v10 = vand.u32 65535, %v4932_v49 }
 0x5e5   : > { %vm1869_vm7 = vcmp.eq.f32.partialorder %v4821_v26, %v1835_v15  ;;  %vm1870_vm8 = vcmp.eq.f32.partialorder %v4826_v46, %v1835_v15  ;;  %2075 = vmin.xlane.f32.xlu1 %v4990_v8  ;;  %v2088_v3 = vshra.s32 %v4992_v22, 16  ;;  %v2023_v49 = vand.u32 65535, %v4952_v6 }
 0x5e6   : > { %v1901_v32 = vsel %vm1869_vm7, %v3906_v42, 256  ;;  %v1902_v59 = vsel %vm1870_vm8, %v3909_v43, 256  ;;  %v2055_v6 = vand.u32 65535, %v4972_v23  ;;  %v2087_v23 = vand.u32 65535, %v4992_v22 }
 0x5e7   : > { %vm2101_vm9 = vcmp.lt.s32.totalorder %v1901_v32, %v1902_v59  ;;  %v5000_v36 = vcvt.s32.f32 %v2088_v3 }
 0x5e8   : > { %v5002_v40 = vsel %vm2101_vm9, %v1901_v32, %v1902_v59  ;;  %v1838_v52 = vpop.xlane.xlu0 %1837  ;;  %v1929_v32 = vcvt.s32.f32 %v1927_v56  ;;  %v1943_v59 = vand.u32 65535, %v4902_v55  ;;  %v1975_v55 = vand.u32 65535, %v4922_v58 }
 0x5e9   : > { %vm1871_vm10 = vcmp.eq.f32.partialorder %v4836_v2, %v1838_v52  ;;  %vm1872_vm11 = vcmp.eq.f32.partialorder %v4839_v35, %v1838_v52  ;;  %2091 = vmin.xlane.f32.xlu0 %v5000_v36  ;;  %v2104_v26 = vshra.s32 %v5002_v40, 16  ;;  %v2007_v58 = vand.u32 65535, %v4942_v25 }
 0x5ea   : > { %v1903_v46 = vsel %vm1871_vm10, %v3906_v42, 256  ;;  %v1904_v62 = vsel %vm1872_vm11, %v3909_v43, 256  ;;  %v2039_v25 = vand.u32 65535, %v4962_v12  ;;  %v2057_v56 = vcvt.s32.f32 %v2055_v6 }
 0x5eb   : > { %vm2117_vm12 = vcmp.lt.s32.totalorder %v1903_v46, %v1904_v62  ;;  %v5010_v41 = vcvt.s32.f32 %v2104_v26  ;;  %v1945_v26 = vcvt.s32.f32 %v1943_v59  ;;  %v2071_v12 = vand.u32 65535, %v4982_v51 }
 0x5ec   : > { %v5012_v48 = vsel %vm2117_vm12, %v1903_v46, %v1904_v62  ;;  %v1841_v63 = vpop.xlane.xlu1 %1840  ;;  %v1961_v62 = vcvt.s32.f32 %v1959_v5  ;;  %v2103_v51 = vand.u32 65535, %v5002_v40 }
 0x5ed   : > { %vm1873_vm13 = vcmp.eq.f32.partialorder %v4850_v17, %v1841_v63  ;;  %vm1874_vm14 = vcmp.eq.f32.partialorder %v4853_v45, %v1841_v63  ;;  %2107 = vmin.xlane.f32.xlu1 %v5010_v41  ;;  %v2120_v2 = vshra.s32 %v5012_v48, 16  ;;  %v2119_v22 = vand.u32 65535, %v5012_v48 }
 0x5ee   : > { %v1905_v35 = vsel %vm1873_vm13, %v3906_v42, 256  ;;  %v1906_v1 = vsel %vm1874_vm14, %v3909_v43, 256  ;;  %v2105_v5 = vcvt.s32.f32 %v2103_v51 }
 0x5ef   : > { %vm2133_vm15 = vcmp.lt.s32.totalorder %v1905_v35, %v1906_v1  ;;  %v5020_v29 = vcvt.s32.f32 %v2120_v2  ;;  %v1977_v2 = vcvt.s32.f32 %v1975_v55 }
 0x5f0   : > { %v5022_v50 = vsel %vm2133_vm15, %v1905_v35, %v1906_v1  ;;  %v1844_v31 = vpop.xlane.xlu0 %1843  ;;  %v1993_v1 = vcvt.s32.f32 %v1991_v10  ;;  %v5128_v10 = vpop.f32.mrb[0].mxu1 }
 0x5f1   : > { %vm1875_vm1 = vcmp.eq.f32.partialorder %v4860_v37, %v1844_v31  ;;  %vm1876_vm2 = vcmp.eq.f32.partialorder %v4863_v54, %v1844_v31  ;;  %2123 = vmin.xlane.f32.xlu0 %v5020_v29  ;;  %v2136_v17 = vshra.s32 %v5022_v50, 16  ;;  %v1911_v54 = vand.u32 65535, %v4883_v0  ;;  %5719 = vst [vmem:[#allocation16_spill] sm:$0xff] %v5128_v10 }
 0x5f2   : > { %v1907_v45 = vsel %vm1875_vm1, %v3906_v42, 256  ;;  %v1908_v4 = vsel %vm1876_vm2, %v3909_v43, 256  ;;  %v2135_v40 = vand.u32 65535, %v5022_v50 }
 0x5f3   : > { %vm2149_vm3 = vcmp.lt.s32.totalorder %v1907_v45, %v1908_v4  ;;  %v5030_v30 = vcvt.s32.f32 %v2136_v17  ;;  %v1913_v28 = vcvt.s32.f32 %v1911_v54  ;;  %v2009_v17 = vcvt.s32.f32 %v2007_v58  ;;  %v1157_v58 = vpop.f32.mrb[1].mxu1 }
 0x5f4   : > { %v5032_v53 = vsel %vm2149_vm3, %v1907_v45, %v1908_v4  ;;  %v2025_v4 = vcvt.s32.f32 %v2023_v49  ;;  %v2041_v54 = vcvt.s32.f32 %v2039_v25  ;;  %v2137_v48 = vcvt.s32.f32 %v2135_v40 }
 0x5f5   : > { %2139 = vmin.xlane.f32.xlu1 %v5030_v30  ;;  %v2152_v20 = vshra.s32 %v5032_v53, 16 }
 0x5f7   : > { %v5036_v37 = vcvt.s32.f32 %v2152_v20 }
 0x5f9   : > { %2155 = vmin.xlane.f32.xlu0 %v5036_v37 }
 0x64a   : > { %v5040_v13 = vpop.xlane.xlu1 %1915 }
 0x64b   : > { %vm1917_vm4 = vcmp.eq.f32.partialorder %v4890_v38, %v5040_v13 }
 0x64c   : > { %v1918_v15 = vsel %vm1917_vm4, %v1913_v28, inf }
 0x64d   : > { %1919 = vmin.xlane.f32.xlu1 %v1918_v15 }
 0x64e   : > { %v5045_v3 = vpop.xlane.xlu0 %1931 }
 0x64f   : > { %vm1933_vm5 = vcmp.eq.f32.partialorder %v4900_v21, %v5045_v3 }
 0x650   : > { %v1934_v52 = vsel %vm1933_vm5, %v1929_v32, inf  ;;  %v2073_v32 = vcvt.s32.f32 %v2071_v12 }
 0x651   : > { %1935 = vmin.xlane.f32.xlu0 %v1934_v52  ;;  %v2089_v52 = vcvt.s32.f32 %v2087_v23 }
 0x652   : > { %v5050_v0 = vpop.xlane.xlu1 %1947 }
 0x653   : > { %vm1949_vm6 = vcmp.eq.f32.partialorder %v4910_v14, %v5050_v0 }
 0x654   : > { %v1950_v38 = vsel %vm1949_vm6, %v1945_v26, inf }
 0x655   : > { %1951 = vmin.xlane.f32.xlu1 %v1950_v38 }
 0x656   : > { %v5055_v46 = vpop.xlane.xlu0 %1963 }
 0x657   : > { %vm1965_vm7 = vcmp.eq.f32.partialorder %v4920_v16, %v5055_v46 }
 0x658   : > { %v1966_v21 = vsel %vm1965_vm7, %v1961_v62, inf  ;;  %v2121_v62 = vcvt.s32.f32 %v2119_v22 }
 0x659   : > { %1967 = vmin.xlane.f32.xlu0 %v1966_v21 }
 0x65a   : > { %v5060_v63 = vpop.xlane.xlu1 %1979 }
 0x65b   : > { %vm1981_vm8 = vcmp.eq.f32.partialorder %v4930_v44, %v5060_v63 }
 0x65c   : > { %v1982_v14 = vsel %vm1981_vm8, %v1977_v2, inf }
 0x65d   : > { %1983 = vmin.xlane.f32.xlu1 %v1982_v14  ;;  %v5130_v14 = vpop.f32.mrb[32].mxu0 }
 0x65e   : > { %v5065_v35 = vpop.xlane.xlu0 %1995  ;;  %5720 = vst [vmem:[#allocation17_spill] sm:$0xff] %v5130_v14  ;;  %v1743_v49 = vpop.f32.mrb[33].mxu0 }
 0x65f   : > { %vm1997_vm9 = vcmp.eq.f32.partialorder %v4940_v24, %v5065_v35 }
 0x660   : > { %v1998_v16 = vsel %vm1997_vm9, %v1993_v1, inf  ;;  %v2361_v1 = vrot.slane %v5128_v10, 4 }
 0x661   : > { %1999 = vmin.xlane.f32.xlu0 %v1998_v16 }
 0x662   : > { %v5070_v31 = vpop.xlane.xlu1 %2011 }
 0x663   : > { %vm2013_vm10 = vcmp.eq.f32.partialorder %v4950_v39, %v5070_v31 }
 0x664   : > { %v2014_v44 = vsel %vm2013_vm10, %v2009_v17, inf  ;;  %v2454_v17 = vrot.slane %v5130_v14, 4 }
 0x665   : > { %2015 = vmin.xlane.f32.xlu1 %v2014_v44 }
 0x666   : > { %v5075_v45 = vpop.xlane.xlu0 %2027 }
 0x667   : > { %vm2029_vm11 = vcmp.eq.f32.partialorder %v4960_v9, %v5075_v45 }
 0x668   : > { %v2030_v24 = vsel %vm2029_vm11, %v2025_v4, inf  ;;  %v5140_v4 = vpop.f32.mrb[2].mxu1 }
 0x669   : > { %2031 = vmin.xlane.f32.xlu0 %v2030_v24  ;;  %5721 = vst [vmem:[#allocation18_spill] sm:$0xff] %v5140_v4  ;;  %v2382_v6 = vrot.slane %v5140_v4, 4 }
 0x66a   : > { %v5080_v20 = vpop.xlane.xlu1 %2043 }
 0x66b   : > { %vm2045_vm12 = vcmp.eq.f32.partialorder %v4970_v57, %v5080_v20 }
 0x66c   : > { %v2046_v39 = vsel %vm2045_vm12, %v2041_v54, inf }
 0x66d   : > { %2047 = vmin.xlane.f32.xlu1 %v2046_v39  ;;  %v1162_v39 = vpop.f32.mrb[3].mxu1 }
 0x66e   : > { %v5085_v28 = vpop.xlane.xlu0 %2059 }
 0x66f   : > { %vm2061_vm13 = vcmp.eq.f32.partialorder %v4980_v34, %v5085_v28 }
 0x670   : > { %v2062_v9 = vsel %vm2061_vm13, %v2057_v56, inf }
 0x671   : > { %2063 = vmin.xlane.f32.xlu0 %v2062_v9  ;;  %v5149_v9 = vpop.f32.mrb[4].mxu1 }
 0x672   : > { %v5090_v15 = vpop.xlane.xlu1 %2075  ;;  %5723 = vst [vmem:[#allocation20_spill] sm:$0xff] %v5149_v9 }
 0x673   : > { %vm2077_vm14 = vcmp.eq.f32.partialorder %v4990_v8, %v5090_v15 }
 0x674   : > { %v2078_v57 = vsel %vm2077_vm14, %v2073_v32, inf }
 0x675   : > { %2079 = vmin.xlane.f32.xlu1 %v2078_v57 }
 0x676   : > { %v5095_v59 = vpop.xlane.xlu0 %2091 }
 0x677   : > { %vm2093_vm15 = vcmp.eq.f32.partialorder %v5000_v36, %v5095_v59 }
 0x678   : > { %v2094_v34 = vsel %vm2093_vm15, %v2089_v52, inf }
 0x679   : > { %2095 = vmin.xlane.f32.xlu0 %v2094_v34 }
 0x67a   : > { %v5100_v26 = vpop.xlane.xlu1 %2107 }
 0x67b   : > { %vm2109_vm1 = vcmp.eq.f32.partialorder %v5010_v41, %v5100_v26  ;;  %v2151_v41 = vand.u32 65535, %v5032_v53  ;;  %v1922_v53 = vcvt.f32.s32 %v5040_v13  ;;  %v5142_v13 = vpop.f32.mrb[34].mxu0 }
 0x67c   : > { %v2110_v8 = vsel %vm2109_vm1, %v2105_v5, inf  ;;  %5722 = vst [vmem:[#allocation19_spill] sm:$0xff] %v5142_v13  ;;  %v1748_v56 = vpop.f32.mrb[35].mxu0 }
 0x67d   : > { %2111 = vmin.xlane.f32.xlu1 %v2110_v8  ;;  %v2153_v50 = vcvt.s32.f32 %v2151_v41  ;;  %v5138_v44 = vshll.u32 %v1922_v53, 16  ;;  %v5161_v52 = vpop.f32.mrb[36].mxu0  ;;  %v1167_v8 = vpop.f32.mrb[5].mxu1  ;;  %v2403_v41 = vrot.slane %v5149_v9, 4 }
 0x67e   : > { %v5105_v38 = vpop.xlane.xlu0 %2123  ;;  %5724 = vst [vmem:[#allocation21_spill] sm:$0xff] %v5161_v52 }
 0x67f   : > { %vm2125_vm2 = vcmp.eq.f32.partialorder %v5020_v29, %v5105_v38 }
 0x680   : > { %v2126_v36 = vsel %vm2125_vm2, %v2121_v62, inf  ;;  %v1753_v62 = vpop.f32.mrb[37].mxu0 }
 0x681   : > { %2127 = vmin.xlane.f32.xlu0 %v2126_v36 }
 0x682   : > { %v5110_v55 = vpop.xlane.xlu1 %2139 }
 0x683   : > { %vm2141_vm3 = vcmp.eq.f32.partialorder %v5030_v30, %v5110_v55  ;;  %v5125_v30 = vld [vmem:[%s287_s25] sm:$0xf] }
 0x684   : > { %v2142_v21 = vsel %vm2141_vm3, %v2137_v48, inf  ;;  %v2444_v16 = vmul.f32 %v5130_v14, %v5125_v30  ;;  %v2363_v24 = vmul.f32 %v2361_v1, %v5125_v30  ;;  %v2372_v54 = vmul.f32 %v5140_v4, %v5125_v30 }
 0x685   : > { %2143 = vmin.xlane.f32.xlu1 %v2142_v21  ;;  %v5155_v23 = vmul.f32 %v2454_v17, %v5125_v30  ;;  %v5159_v57 = vmul.f32 %v5142_v13, %v5125_v30  ;;  %v2384_v5 = vmul.f32 %v2382_v6, %v5125_v30  ;;  %v2393_v22 = vmul.f32 %v5149_v9, %v5125_v30  ;;  %v5169_v21 = vpop.f32.mrb[6].mxu1 }
 0x686   : > { %v5115_v2 = vpop.xlane.xlu0 %2155  ;;  %v5152_v32 = vsel %vm317_vm0, %v2444_v16, 0.0  ;;  %v2364_v51 = vsel %vm317_vm0, %v2363_v24, 0.0  ;;  %v2373_v34 = vsel %vm317_vm0, %v2372_v54, 0.0  ;;  %5725 = vst [vmem:[#allocation22_spill] sm:$0xff] %v5169_v21  ;;  %v2424_v1 = vrot.slane %v5169_v21, 4  ;;  %v1172_v58 = vpop.f32.mrb[7].mxu1 }
 0x687   : > { %vm2157_vm4 = vcmp.eq.f32.partialorder %v5036_v37, %v5115_v2  ;;  %v2351_v37 = vmul.f32 %v5128_v10, %v5125_v30  ;;  %v2365_v36 = vrot.slane %v2364_v51, 4  ;;  %v2374_v48 = vrot.slane %v2373_v34, 4  ;;  %v5178_v54 = vpop.f32.mrb[8].mxu1 }
 0x688   : > { %v2158_v29 = vsel %vm2157_vm4, %v2153_v50, inf  ;;  %v5171_v50 = vpop.f32.mrb[38].mxu0  ;;  %v2394_v53 = vsel %vm317_vm0, %v2393_v22, 0.0  ;;  %v2405_v56 = vmul.f32 %v2403_v41, %v5125_v30  ;;  %v1177_v22 = vpop.f32.mrb[9].mxu1 }
 0x689   : > { %2159 = vmin.xlane.f32.xlu0 %v2158_v29  ;;  %v2352_v25 = vsel %vm317_vm0, %v2351_v37, 0.0  ;;  %5726 = vst [vmem:[#allocation23_spill] sm:$0xff] %v5171_v50  ;;  %v2385_v29 = vsel %vm317_vm0, %v2384_v5, 0.0  ;;  %v2414_v37 = vmul.f32 %v5169_v21, %v5125_v30  ;;  %v1758_v16 = vpop.f32.mrb[39].mxu0  ;;  %v2366_v49 = vadd.f32 %v2365_v36, %v2364_v51 }
 0x68a   : > { %v2353_v12 = vrot.slane %v2352_v25, 4  ;;  %v2386_v24 = vrot.slane %v2385_v29, 4  ;;  %v5180_v6 = vpop.f32.mrb[40].mxu0  ;;  %v2395_v39 = vrot.slane %v2394_v53, 4  ;;  %v2426_v5 = vmul.f32 %v2424_v1, %v5125_v30 }
 0x68b   : > { %5727 = vst [vmem:[#allocation24_spill] sm:$0xff] %v5180_v6  ;;  %v1763_v8 = vpop.f32.mrb[41].mxu0  ;;  %v2367_v58 = vrot.slane %v2366_v49, 2 }
 0x68c   : > { %v2354_v40 = vadd.f32 %v2353_v12, %v2352_v25  ;;  %v2375_v25 = vadd.f32 %v2374_v48, %v2373_v34  ;;  %v2415_v12 = vsel %vm317_vm0, %v2414_v37, 0.0  ;;  %v2387_v14 = vadd.f32 %v2386_v24, %v2385_v29 }
 0x68d   : > { %v2396_v51 = vadd.f32 %v2395_v39, %v2394_v53  ;;  %v2406_v34 = vsel %vm317_vm0, %v2405_v56, 0.0  ;;  %v2416_v36 = vrot.slane %v2415_v12, 4  ;;  %v2427_v48 = vsel %vm317_vm0, %v2426_v5, 0.0 }
 0x68e   : > { %v2355_v17 = vrot.slane %v2354_v40, 2  ;;  %v2376_v16 = vrot.slane %v2375_v25, 2  ;;  %v2368_v9 = vadd.f32 %v2367_v58, %v2366_v49  ;;  %v2388_v41 = vrot.slane %v2387_v14, 2 }
 0x68f   : > { %v2397_v10 = vrot.slane %v2396_v51, 2  ;;  %v2407_v37 = vrot.slane %v2406_v34, 4  ;;  %v2417_v47 = vadd.f32 %v2416_v36, %v2415_v12  ;;  %v2428_v1 = vrot.slane %v2427_v48, 4 }
 0x690   : > { %v2356_v62 = vadd.f32 %v2355_v17, %v2354_v40  ;;  %v2377_v4 = vadd.f32 %v2376_v16, %v2375_v25  ;;  %v2369_v8 = vrot.slane %v2368_v9, 1  ;;  %v2389_v17 = vadd.f32 %v2388_v41, %v2387_v14 }
 0x691   : > { %v2398_v60 = vadd.f32 %v2397_v10, %v2396_v51  ;;  %v2408_v29 = vadd.f32 %v2407_v37, %v2406_v34  ;;  %v2418_v53 = vrot.slane %v2417_v47, 2  ;;  %v2429_v24 = vadd.f32 %v2428_v1, %v2427_v48 }
 0x692   : > { %v2357_v21 = vrot.slane %v2356_v62, 1  ;;  %v2378_v40 = vrot.slane %v2377_v4, 1  ;;  %v2370_v56 = vadd.f32 %v2369_v8, %v2368_v9  ;;  %v2390_v61 = vrot.slane %v2389_v17, 1 }
 0x693   : > { %v2399_v49 = vrot.slane %v2398_v60, 1  ;;  %v2409_v25 = vrot.slane %v2408_v29, 2  ;;  %v2419_v58 = vadd.f32 %v2418_v53, %v2417_v47  ;;  %v2430_v16 = vrot.slane %v2429_v24, 2 }
 0x694   : > { %v2358_v22 = vadd.f32 %v2357_v21, %v2356_v62  ;;  %v2379_v5 = vadd.f32 %v2378_v40, %v2377_v4  ;;  %v5189_v11 = vmul.f32 0.5, %v2370_v56  ;;  %v2391_v21 = vadd.f32 %v2390_v61, %v2389_v17 }
 0x695   : > { %v2435_v10 = vmul.f32 %v5178_v54, %v5125_v30  ;;  %v2400_v14 = vadd.f32 %v2399_v49, %v2398_v60  ;;  %v2410_v62 = vadd.f32 %v2409_v25, %v2408_v29  ;;  %v2420_v51 = vrot.slane %v2419_v58, 1 }
 0x696   : > { %v5187_v39 = vmul.f32 0.5, %v2358_v22  ;;  %v5191_v12 = vmul.f32 0.5, %v2379_v5  ;;  %v2431_v34 = vadd.f32 %v2430_v16, %v2429_v24  ;;  %v5197_v9 = vmul.f32 0.5, %v2391_v21 }
 0x697   : > { %v2436_v47 = vsel %vm317_vm0, %v2435_v10, 0.0  ;;  %v2446_v36 = vrot.slane %v5152_v32, 4  ;;  %v5201_v48 = vmul.f32 0.5, %v2400_v14  ;;  %v2411_v41 = vrot.slane %v2410_v62, 1 }
 0x698   : > { %v2630_v4 = vmax.f32 %v5187_v39, %v5189_v11  ;;  %v2421_v61 = vadd.f32 %v2420_v51, %v2419_v58  ;;  %v2432_v37 = vrot.slane %v2431_v34, 1  ;;  %v2437_v60 = vrot.slane %v2436_v47, 4 }
 0x699   : > { %v2447_v22 = vadd.f32 %v2446_v36, %v5152_v32  ;;  %v2457_v8 = vsel %vm317_vm0, %v5155_v23, 0.0  ;;  %v2412_v40 = vadd.f32 %v2411_v41, %v2410_v62  ;;  %v2466_v49 = vsel %vm317_vm0, %v5159_v57, 0.0 }
 0x69a   : > { %v2631_v1 = vmax.f32 %v2630_v4, %v5191_v12  ;;  %v5207_v17 = vmul.f32 0.5, %v2421_v61  ;;  %v2433_v29 = vadd.f32 %v2432_v37, %v2431_v34  ;;  %v2458_v53 = vrot.slane %v2457_v8, 4 }
 0x69b   : > { %v2438_v56 = vadd.f32 %v2437_v60, %v2436_v47  ;;  %v2448_v5 = vrot.slane %v2447_v22, 2  ;;  %v5212_v25 = vmul.f32 0.5, %v2412_v40  ;;  %v2467_v16 = vrot.slane %v2466_v49, 4 }
 0x69c   : > { %v2632_v24 = vmax.f32 %v2631_v1, %v5197_v9  ;;  %v5214_v58 = vmul.f32 0.5, %v2433_v29  ;;  %v2459_v32 = vadd.f32 %v2458_v53, %v2457_v8  ;;  %v2475_v14 = vrot.slane %v5142_v13, 4 }
 0x69d   : > { %v2439_v21 = vrot.slane %v2438_v56, 2  ;;  %v2449_v10 = vadd.f32 %v2448_v5, %v2447_v22  ;;  %v2468_v51 = vadd.f32 %v2467_v16, %v2466_v49  ;;  %v2486_v34 = vmul.f32 %v5161_v52, %v5125_v30 }
 0x69e   : > { %v2633_v23 = vmax.f32 %v2632_v24, %v5201_v48  ;;  %v2460_v62 = vrot.slane %v2459_v32, 2  ;;  %v2496_v4 = vrot.slane %v5161_v52, 4  ;;  %v2477_v41 = vmul.f32 %v2475_v14, %v5125_v30 }
 0x69f   : > { %v2440_v57 = vadd.f32 %v2439_v21, %v2438_v56  ;;  %v2450_v36 = vrot.slane %v2449_v10, 1  ;;  %v2469_v37 = vrot.slane %v2468_v51, 2  ;;  %v2487_v1 = vsel %vm317_vm0, %v2486_v34, 0.0 }
 0x6a0   : > { %v2634_v47 = vmax.f32 %v2633_v23, %v5212_v25  ;;  %v2461_v61 = vadd.f32 %v2460_v62, %v2459_v32  ;;  %v2498_v60 = vmul.f32 %v2496_v4, %v5125_v30  ;;  %v2478_v29 = vsel %vm317_vm0, %v2477_v41, 0.0 }
 0x6a1   : > { %v2441_v22 = vrot.slane %v2440_v57, 1  ;;  %v2451_v40 = vadd.f32 %v2450_v36, %v2449_v10  ;;  %v2470_v24 = vadd.f32 %v2469_v37, %v2468_v51  ;;  %v2479_v56 = vrot.slane %v2478_v29, 4 }
 0x6a2   : > { %v2635_v8 = vmax.f32 %v2634_v47, %v5207_v17  ;;  %v2462_v53 = vrot.slane %v2461_v61, 1  ;;  %v2488_v5 = vrot.slane %v2487_v1, 4  ;;  %v2499_v32 = vsel %vm317_vm0, %v2498_v60, 0.0 }
 0x6a3   : > { %v2442_v49 = vadd.f32 %v2441_v22, %v2440_v57  ;;  %v5228_v23 = vmul.f32 0.5, %v2451_v40  ;;  %v2471_v14 = vrot.slane %v2470_v24, 1  ;;  %v2480_v62 = vadd.f32 %v2479_v56, %v2478_v29 }
 0x6a4   : > { %v2636_v16 = vmax.f32 %v2635_v8, %v5214_v58  ;;  %v2463_v21 = vadd.f32 %v2462_v53, %v2461_v61  ;;  %v2489_v34 = vadd.f32 %v2488_v5, %v2487_v1  ;;  %v2500_v10 = vrot.slane %v2499_v32, 4 }
 0x6a5   : > { %v5231_v4 = vmul.f32 0.5, %v2442_v49  ;;  %v2507_v47 = vmul.f32 %v5171_v50, %v5125_v30  ;;  %v2517_v51 = vrot.slane %v5171_v50, 4  ;;  %v2472_v57 = vadd.f32 %v2471_v14, %v2470_v24 }
 0x6a6   : > { %v5236_v36 = vmul.f32 0.5, %v2463_v21  ;;  %v2481_v41 = vrot.slane %v2480_v62, 2  ;;  %v2490_v37 = vrot.slane %v2489_v34, 2  ;;  %v2501_v60 = vadd.f32 %v2500_v10, %v2499_v32 }
 0x6a7   : > { %v2637_v22 = vmax.f32 %v2636_v16, %v5231_v4  ;;  %v2508_v61 = vsel %vm317_vm0, %v2507_v47, 0.0  ;;  %v2519_v1 = vmul.f32 %v2517_v51, %v5125_v30  ;;  %v5241_v8 = vmul.f32 0.5, %v2472_v57 }
 0x6a8   : > { %v2482_v40 = vadd.f32 %v2481_v41, %v2480_v62  ;;  %v2491_v29 = vadd.f32 %v2490_v37, %v2489_v34  ;;  %v2509_v53 = vrot.slane %v2508_v61, 4  ;;  %v2502_v5 = vrot.slane %v2501_v60, 2 }
 0x6a9   : > { %v2638_v56 = vmax.f32 %v2637_v22, %v5228_v23  ;;  %v2520_v49 = vsel %vm317_vm0, %v2519_v1, 0.0  ;;  %v2528_v24 = vmul.f32 %v5180_v6, %v5125_v30  ;;  %v1938_v10 = vcvt.f32.s32 %v5045_v3 }
 0x6aa   : > { %v2483_v21 = vrot.slane %v2482_v40, 1  ;;  %v2492_v16 = vrot.slane %v2491_v29, 1  ;;  %v2510_v32 = vadd.f32 %v2509_v53, %v2508_v61  ;;  %v2521_v14 = vrot.slane %v2520_v49, 4 }
 0x6ab   : > { %v2639_v51 = vmax.f32 %v2638_v56, %v5236_v36  ;;  %v2503_v62 = vadd.f32 %v2502_v5, %v2501_v60  ;;  %v2529_v34 = vsel %vm317_vm0, %v2528_v24, 0.0 }
 0x6ac   : > { %v2484_v41 = vadd.f32 %v2483_v21, %v2482_v40  ;;  %v2493_v37 = vadd.f32 %v2492_v16, %v2491_v29  ;;  %v2511_v22 = vrot.slane %v2510_v32, 2  ;;  %v2522_v6 = vadd.f32 %v2521_v14, %v2520_v49 }
 0x6ad   : > { %v2640_v1 = vmax.f32 %v2639_v51, %v5241_v8  ;;  %v2504_v50 = vrot.slane %v2503_v62, 1  ;;  %v2530_v52 = vrot.slane %v2529_v34, 4  ;;  %v1954_v51 = vcvt.f32.s32 %v5050_v0 }
 0x6ae   : > { %v5251_v13 = vmul.f32 0.5, %v2484_v41  ;;  %v5253_v61 = vmul.f32 0.5, %v2493_v37  ;;  %v2512_v3 = vadd.f32 %v2511_v22, %v2510_v32  ;;  %v2523_v5 = vrot.slane %v2522_v6, 2 }
 0x6af   : > { %v2505_v60 = vadd.f32 %v2504_v50, %v2503_v62  ;;  %v2531_v24 = vadd.f32 %v2530_v52, %v2529_v34  ;;  %v1970_v41 = vcvt.f32.s32 %v5055_v46  ;;  %v1955_v22 = vshll.u32 %v1954_v51, 16 }
 0x6b0   : > { %v2641_v29 = vmax.f32 %v2640_v1, %v5251_v13  ;;  %v2513_v16 = vrot.slane %v2512_v3, 1  ;;  %v2524_v49 = vadd.f32 %v2523_v5, %v2522_v6 }
 0x6b1   : > { %v5257_v21 = vmul.f32 0.5, %v2505_v60  ;;  %v2532_v14 = vrot.slane %v2531_v24, 2  ;;  %v1971_v5 = vshll.u32 %v1970_v41, 16 }
 0x6b2   : > { %v2514_v52 = vadd.f32 %v2513_v16, %v2512_v3 }
 0x6b3   : > { %v2533_v62 = vadd.f32 %v2532_v14, %v2531_v24 }
 0x6b4   : > { %v5271_v46 = vmul.f32 0.5, %v2514_v52  ;;  %v2018_v52 = vcvt.f32.s32 %v5070_v31 }
 0x6b5   : > { %v2534_v37 = vrot.slane %v2533_v62, 1 }
 0x6b6   : > { %v2019_v0 = vshll.u32 %v2018_v52, 16 }
 0x6da   : > { %v1920_v47 = vpop.xlane.xlu1 %1919 }
 0x6db   : > { %v1921_v57 = vcvt.f32.s32 %v1920_v47  ;;  %v1939_v47 = vshll.u32 %v1938_v10, 16  ;;  %v2525_v10 = vrot.slane %v2524_v49, 1 }
 0x6dd   : > { %v1924_v53 = vadd.s32 %v5138_v44, %v1921_v57  ;;  %v2642_v44 = vmax.f32 %v2641_v29, %v5253_v61  ;;  %v2526_v57 = vadd.f32 %v2525_v10, %v2524_v49  ;;  %v1986_v29 = vcvt.f32.s32 %v5060_v63 }
 0x6de   : > { %v1936_v56 = vpop.xlane.xlu0 %1935  ;;  %v2002_v49 = vcvt.f32.s32 %v5065_v35 }
 0x6df   : > { %v1937_v40 = vcvt.f32.s32 %v1936_v56  ;;  %vm2165_vm5 = vcmp.eq.s32.totalorder %v3906_v42, %v1924_v53  ;;  %v2643_v6 = vmax.f32 %v2642_v44, %v5257_v21  ;;  %vm2166_vm9 = vcmp.eq.s32.totalorder %v3909_v43, %v1924_v53 }
 0x6e0   : > { %v5275_v3 = vmul.f32 0.5, %v2526_v57  ;;  %v2535_v56 = vadd.f32 %v2534_v37, %v2533_v62  ;;  %v2003_v35 = vshll.u32 %v2002_v49, 16  ;;  %v2034_v62 = vcvt.f32.s32 %v5075_v45 }
 0x6e1   : > { %v1940_v32 = vadd.s32 %v1939_v47, %v1937_v40  ;;  %v2644_v60 = vmax.f32 %v2643_v6, %v5271_v46 }
 0x6e2   : > { %v1952_v50 = vpop.xlane.xlu1 %1951  ;;  %v5284_v47 = vmul.f32 0.5, %v2535_v56  ;;  %v2035_v57 = vshll.u32 %v2034_v62, 16  ;;  %v2066_v56 = vcvt.f32.s32 %v5085_v28 }
 0x6e3   : > { %vm2167_vm6 = vcmp.eq.s32.totalorder %v3906_v42, %v1940_v32  ;;  %v1953_v34 = vcvt.f32.s32 %v1952_v50  ;;  %vm2168_vm7 = vcmp.eq.s32.totalorder %v3909_v43, %v1940_v32  ;;  %v5287_v40 = vmax.f32 %v2644_v60, %v5275_v3 }
 0x6e4   : > { %vm5266_vm8 = vmpackc.low %vm2167_vm6, %vm2165_vm5  ;;  %v1987_v32 = vshll.u32 %v1986_v29, 16 }
 0x6e5   : > { %vm3283_vm10 = vmpackc.low %vm2168_vm7, %vm2166_vm9  ;;  %v1956_v24 = vadd.s32 %v1955_v22, %v1953_v34  ;;  %v2646_v51 = vmax.f32 %v5287_v40, %v5284_v47  ;;  %v2050_v22 = vcvt.f32.s32 %v5080_v20 }
 0x6e6   : > { %3284 = vmatprep.subr.msk.bf16.mxu0 %vm3283_vm10, %v5697_v7  ;;  %3315 = vmatprep.subr.msk.bf16.mxu1 %vm3283_vm10, %v5697_v7  ;;  %v1968_v1 = vpop.xlane.xlu0 %1967 }
 0x6e7   : > { %3286 = vmatpush1.bf16.xpose.msk.msra.mxu0 %vm5266_vm8, %v5697_v7  ;;  %3323 = vmatpush1.bf16.xpose.msk.msra.mxu1 %vm5266_vm8, %v5697_v7  ;;  %v1969_v53 = vcvt.f32.s32 %v1968_v1  ;;  %vm2169_vm11 = vcmp.eq.s32.totalorder %v3906_v42, %v1956_v24  ;;  %vm2170_vm15 = vcmp.eq.s32.totalorder %v3909_v43, %v1956_v24  ;;  %v2051_v24 = vshll.u32 %v2050_v22, 16 }
 0x6e9   : > { %v1972_v16 = vadd.s32 %v1971_v5, %v1969_v53  ;;  %v2067_v53 = vshll.u32 %v2066_v56, 16 }
 0x6ea   : > { %v1984_v14 = vpop.xlane.xlu1 %1983 }
 0x6eb   : > { %vm2171_vm12 = vcmp.eq.s32.totalorder %v3906_v42, %v1972_v16  ;;  %v1985_v41 = vcvt.f32.s32 %v1984_v14  ;;  %vm2172_vm13 = vcmp.eq.s32.totalorder %v3909_v43, %v1972_v16  ;;  %v2082_v16 = vcvt.f32.s32 %v5090_v15 }
 0x6ec   : > { %vm3289_vm14 = vmpackc.low %vm2171_vm12, %vm2169_vm11  ;;  %v2098_v14 = vcvt.f32.s32 %v5095_v59 }
 0x6ed   : > { %vm3287_vm1 = vmpackc.low %vm2172_vm13, %vm2170_vm15  ;;  %v1988_v44 = vadd.s32 %v1987_v32, %v1985_v41 }
 0x6ee   : > { %3288 = vmatprep.subr.msk.bf16.mxu0 %vm3287_vm1, %v5697_v7  ;;  %3316 = vmatprep.subr.msk.bf16.mxu1 %vm3287_vm1, %v5697_v7  ;;  %v2000_v63 = vpop.xlane.xlu0 %1999 }
 0x6ef   : > { %3290 = vmatpush1.bf16.xpose.msk.msra.mxu0 %vm3289_vm14, %v5697_v7  ;;  %3324 = vmatpush1.bf16.xpose.msk.msra.mxu1 %vm3289_vm14, %v5697_v7  ;;  %v2001_v50 = vcvt.f32.s32 %v2000_v63  ;;  %vm2173_vm2 = vcmp.eq.s32.totalorder %v3906_v42, %v1988_v44  ;;  %vm2174_vm6 = vcmp.eq.s32.totalorder %v3909_v43, %v1988_v44  ;;  %v2083_v63 = vshll.u32 %v2082_v16, 16 }
 0x6f1   : > { %v2004_v10 = vadd.s32 %v2003_v35, %v2001_v50  ;;  %v2099_v35 = vshll.u32 %v2098_v14, 16  ;;  %v2114_v50 = vcvt.f32.s32 %v5100_v26 }
 0x6f2   : > { %v2016_v34 = vpop.xlane.xlu1 %2015 }
 0x6f3   : > { %vm2175_vm3 = vcmp.eq.s32.totalorder %v3906_v42, %v2004_v10  ;;  %v2017_v6 = vcvt.f32.s32 %v2016_v34  ;;  %vm2176_vm4 = vcmp.eq.s32.totalorder %v3909_v43, %v2004_v10  ;;  %v2130_v10 = vcvt.f32.s32 %v5105_v38 }
 0x6f4   : > { %vm3293_vm5 = vmpackc.low %vm2175_vm3, %vm2173_vm2 }
 0x6f5   : > { %vm3291_vm7 = vmpackc.low %vm2176_vm4, %vm2174_vm6  ;;  %v2020_v45 = vadd.s32 %v2019_v0, %v2017_v6  ;;  %v2115_v6 = vshll.u32 %v2114_v50, 16  ;;  %v2131_v0 = vshll.u32 %v2130_v10, 16 }
 0x6f6   : > { %3292 = vmatprep.subr.msk.bf16.mxu0 %vm3291_vm7, %v5697_v7  ;;  %3317 = vmatprep.subr.msk.bf16.mxu1 %vm3291_vm7, %v5697_v7  ;;  %v2032_v31 = vpop.xlane.xlu0 %2031 }
 0x6f7   : > { %3294 = vmatpush1.bf16.xpose.msk.msra.mxu0 %vm3293_vm5, %v5697_v7  ;;  %3325 = vmatpush1.bf16.xpose.msk.msra.mxu1 %vm3293_vm5, %v5697_v7  ;;  %v2033_v37 = vcvt.f32.s32 %v2032_v31  ;;  %vm2177_vm8 = vcmp.eq.s32.totalorder %v3906_v42, %v2020_v45  ;;  %vm2178_vm12 = vcmp.eq.s32.totalorder %v3909_v43, %v2020_v45 }
 0x6f9   : > { %v2036_v1 = vadd.s32 %v2035_v57, %v2033_v37  ;;  %v2146_v57 = vcvt.f32.s32 %v5110_v55  ;;  %v2162_v37 = vcvt.f32.s32 %v5115_v2 }
 0x6fa   : > { %v2048_v60 = vpop.xlane.xlu1 %2047 }
 0x6fb   : > { %vm2179_vm9 = vcmp.eq.s32.totalorder %v3906_v42, %v2036_v1  ;;  %v2049_v5 = vcvt.f32.s32 %v2048_v60  ;;  %vm2180_vm10 = vcmp.eq.s32.totalorder %v3909_v43, %v2036_v1  ;;  %v2147_v56 = vshll.u32 %v2146_v57, 16 }
 0x6fc   : > { %vm3297_vm11 = vmpackc.low %vm2179_vm9, %vm2177_vm8  ;;  %v2163_v60 = vshll.u32 %v2162_v37, 16 }
 0x6fd   : > { %vm3295_vm13 = vmpackc.low %vm2180_vm10, %vm2178_vm12  ;;  %v2052_v28 = vadd.s32 %v2051_v24, %v2049_v5 }
 0x6fe   : > { %3296 = vmatprep.subr.msk.bf16.mxu0 %vm3295_vm13, %v5697_v7  ;;  %3318 = vmatprep.subr.msk.bf16.mxu1 %vm3295_vm13, %v5697_v7  ;;  %v2064_v20 = vpop.xlane.xlu0 %2063 }
 0x6ff   : > { %3298 = vmatpush1.bf16.xpose.msk.msra.mxu0 %vm3297_vm11, %v5697_v7  ;;  %3326 = vmatpush1.bf16.xpose.msk.msra.mxu1 %vm3297_vm11, %v5697_v7  ;;  %v2065_v29 = vcvt.f32.s32 %v2064_v20  ;;  %vm2181_vm14 = vcmp.eq.s32.totalorder %v3906_v42, %v2052_v28  ;;  %vm2182_vm3 = vcmp.eq.s32.totalorder %v3909_v43, %v2052_v28  ;;  %v5732_v20 = vld [vmem:[#allocation14_spill] sm:$0xff] }
 0x701   : > { %v2068_v49 = vadd.s32 %v2067_v53, %v2065_v29  ;;  %v5733_v53 = vld [vmem:[#allocation15_spill] sm:$0xff] }
 0x702   : > { %v2080_v41 = vpop.xlane.xlu1 %2079 }
 0x703   : > { %vm2183_vm15 = vcmp.eq.s32.totalorder %v3906_v42, %v2068_v49  ;;  %v2081_v32 = vcvt.f32.s32 %v2080_v41  ;;  %vm2184_vm1 = vcmp.eq.s32.totalorder %v3909_v43, %v2068_v49 }
 0x704   : > { %vm3301_vm2 = vmpackc.low %vm2183_vm15, %vm2181_vm14 }
 0x705   : > { %vm3299_vm4 = vmpackc.low %vm2184_vm1, %vm2182_vm3  ;;  %v2084_v59 = vadd.s32 %v2083_v63, %v2081_v32 }
 0x706   : > { %3300 = vmatprep.subr.msk.bf16.mxu0 %vm3299_vm4, %v5697_v7  ;;  %3319 = vmatprep.subr.msk.bf16.mxu1 %vm3299_vm4, %v5697_v7  ;;  %v2096_v15 = vpop.xlane.xlu0 %2095 }
 0x707   : > { %3302 = vmatpush1.bf16.xpose.msk.msra.mxu0 %vm3301_vm2, %v5697_v7  ;;  %3327 = vmatpush1.bf16.xpose.msk.msra.mxu1 %vm3301_vm2, %v5697_v7  ;;  %v2097_v44 = vcvt.f32.s32 %v2096_v15  ;;  %vm2185_vm5 = vcmp.eq.s32.totalorder %v3906_v42, %v2084_v59  ;;  %vm2186_vm9 = vcmp.eq.s32.totalorder %v3909_v43, %v2084_v59 }
 0x709   : > { %v2100_v52 = vadd.s32 %v2099_v35, %v2097_v44 }
 0x70a   : > { %v2112_v62 = vpop.xlane.xlu1 %2111 }
 0x70b   : > { %vm2187_vm6 = vcmp.eq.s32.totalorder %v3906_v42, %v2100_v52  ;;  %v2113_v34 = vcvt.f32.s32 %v2112_v62  ;;  %vm2188_vm7 = vcmp.eq.s32.totalorder %v3909_v43, %v2100_v52 }
 0x70c   : > { %vm3305_vm8 = vmpackc.low %vm2187_vm6, %vm2185_vm5 }
 0x70d   : > { %vm3303_vm10 = vmpackc.low %vm2188_vm7, %vm2186_vm9  ;;  %v2116_v38 = vadd.s32 %v2115_v6, %v2113_v34 }
 0x70e   : > { %3304 = vmatprep.subr.msk.bf16.mxu0 %vm3303_vm10, %v5697_v7  ;;  %3320 = vmatprep.subr.msk.bf16.mxu1 %vm3303_vm10, %v5697_v7  ;;  %v2128_v26 = vpop.xlane.xlu0 %2127 }
 0x70f   : > { %3306 = vmatpush1.bf16.xpose.msk.msra.mxu0 %vm3305_vm8, %v5697_v7  ;;  %3328 = vmatpush1.bf16.xpose.msk.msra.mxu1 %vm3305_vm8, %v5697_v7  ;;  %v2129_v31 = vcvt.f32.s32 %v2128_v26  ;;  %vm2189_vm11 = vcmp.eq.s32.totalorder %v3906_v42, %v2116_v38  ;;  %vm2190_vm15 = vcmp.eq.s32.totalorder %v3909_v43, %v2116_v38 }
 0x711   : > { %v2132_v45 = vadd.s32 %v2131_v0, %v2129_v31 }
 0x712   : > { %v2144_v22 = vpop.xlane.xlu1 %2143 }
 0x713   : > { %vm2191_vm12 = vcmp.eq.s32.totalorder %v3906_v42, %v2132_v45  ;;  %v2145_v1 = vcvt.f32.s32 %v2144_v22  ;;  %vm2192_vm13 = vcmp.eq.s32.totalorder %v3909_v43, %v2132_v45 }
 0x714   : > { %vm3309_vm14 = vmpackc.low %vm2191_vm12, %vm2189_vm11 }
 0x715   : > { %vm3307_vm1 = vmpackc.low %vm2192_vm13, %vm2190_vm15  ;;  %v2148_v2 = vadd.s32 %v2147_v56, %v2145_v1 }
 0x716   : > { %3308 = vmatprep.subr.msk.bf16.mxu0 %vm3307_vm1, %v5697_v7  ;;  %3321 = vmatprep.subr.msk.bf16.mxu1 %vm3307_vm1, %v5697_v7  ;;  %v2160_v55 = vpop.xlane.xlu0 %2159 }
 0x717   : > { %3310 = vmatpush1.bf16.xpose.msk.msra.mxu0 %vm3309_vm14, %v5697_v7  ;;  %3329 = vmatpush1.bf16.xpose.msk.msra.mxu1 %vm3309_vm14, %v5697_v7  ;;  %v2161_v5 = vcvt.f32.s32 %v2160_v55  ;;  %vm2193_vm2 = vcmp.eq.s32.totalorder %v3906_v42, %v2148_v2  ;;  %vm2194_vm5 = vcmp.eq.s32.totalorder %v3909_v43, %v2148_v2 }
 0x719   : > { %v2164_v24 = vadd.s32 %v2163_v60, %v2161_v5 }
 0x71b   : > { %vm2195_vm3 = vcmp.eq.s32.totalorder %v3906_v42, %v2164_v24  ;;  %vm2196_vm4 = vcmp.eq.s32.totalorder %v3909_v43, %v2164_v24  ;;  %v5730_v42 = vld [vmem:[#allocation9_spill] sm:$0xff] }
 0x71c   : > { %vm3313_vm6 = vmpackc.low %vm2195_vm3, %vm2193_vm2  ;;  %v5731_v43 = vld [vmem:[#allocation13_spill] sm:$0xff] }
 0x71d   : > { %vm3311_vm7 = vmpackc.low %vm2196_vm4, %vm2194_vm5 }
 0x71e   : > { %3312 = vmatprep.subr.msk.bf16.mxu0 %vm3311_vm7, %v5697_v7  ;;  %3322 = vmatprep.subr.msk.bf16.mxu1 %vm3311_vm7, %v5697_v7 }
 0x71f   : > { %3314 = vmatpush1.bf16.xpose.msk.msra.mxu0 %vm3313_vm6, %v5697_v7  ;;  %3330 = vmatpush1.bf16.xpose.msk.msra.mxu1 %vm3313_vm6, %v5697_v7 }
 0x726   : > { %2326 = vmatmul.mubr.f32.vlgmr.msra.gmra.mrb[42].mxu0 %v5709_v18  ;;  %2331 = vmatmul.mubr.f32.vlgmr.msra.gmra.mrb[10].mxu1 %v5711_v27 }
 0x727   : > { %2335 = vmatprep.mubr.f32.mxu1 %v5712_v19 }
 0x72a   : > { %2336 = vmatmul.mubr.f32.gmra.mrb[12].mxu1 %v5713_v33 }
 0x72b   : > { %2340 = vmatprep.mubr.f32.mxu1 %v5730_v42 }
 0x72e   : > { %2341 = vmatmul.mubr.f32.gmra.mrb[14].mxu1 %v5731_v43 }
 0x72f   : > { %2345 = vmatprep.mubr.f32.mxu1 %v5732_v20 }
 0x732   : > { %2346 = vmatmul.mubr.f32.gmra.mrb[16].mxu1 %v5733_v53 }
 0x7f9   : > { %v5367_v28 = vpop.f32.mrb[42].mxu0  ;;  %v5369_v29 = vpop.f32.mrb[10].mxu1 }
 0x7fa   : > { %v2537_v7 = vmul.f32 %v5367_v28, %v5125_v30  ;;  %v2547_v18 = vrot.slane %v5367_v28, 4  ;;  %v2558_v27 = vmul.f32 %v5369_v29, %v5125_v30  ;;  %v2568_v19 = vrot.slane %v5369_v29, 4  ;;  %v2329_v33 = vpop.f32.mrb[43].mxu0  ;;  %v2334_v16 = vpop.f32.mrb[11].mxu1 }
 0x7fc   : > { %v2538_v49 = vsel %vm317_vm0, %v2537_v7, 0.0  ;;  %v2549_v14 = vmul.f32 %v2547_v18, %v5125_v30  ;;  %v2559_v41 = vsel %vm317_vm0, %v2558_v27, 0.0  ;;  %v2570_v32 = vmul.f32 %v2568_v19, %v5125_v30 }
 0x7fd   : > { %v2539_v63 = vrot.slane %v2538_v49, 4  ;;  %v2560_v15 = vrot.slane %v2559_v41, 4  ;;  %v5381_v35 = vpop.f32.mrb[12].mxu1 }
 0x7fe   : > { %v2550_v59 = vsel %vm317_vm0, %v2549_v14, 0.0  ;;  %v2571_v44 = vsel %vm317_vm0, %v2570_v32, 0.0  ;;  %v2579_v50 = vmul.f32 %v5381_v35, %v5125_v30  ;;  %v2589_v52 = vrot.slane %v5381_v35, 4  ;;  %v2339_v10 = vpop.f32.mrb[13].mxu1 }
 0x7ff   : > { %v2540_v62 = vadd.f32 %v2539_v63, %v2538_v49  ;;  %v2551_v34 = vrot.slane %v2550_v59, 4  ;;  %v2561_v6 = vadd.f32 %v2560_v15, %v2559_v41  ;;  %v2572_v26 = vrot.slane %v2571_v44, 4 }
 0x800   : > { %v2580_v0 = vsel %vm317_vm0, %v2579_v50, 0.0  ;;  %v2591_v38 = vmul.f32 %v2589_v52, %v5125_v30 }
 0x801   : > { %v2541_v31 = vrot.slane %v2540_v62, 2  ;;  %v2552_v57 = vadd.f32 %v2551_v34, %v2550_v59  ;;  %v2562_v45 = vrot.slane %v2561_v6, 2  ;;  %v2573_v37 = vadd.f32 %v2572_v26, %v2571_v44  ;;  %v5390_v22 = vpop.f32.mrb[14].mxu1 }
 0x802   : > { %v2581_v1 = vrot.slane %v2580_v0, 4  ;;  %v2592_v56 = vsel %vm317_vm0, %v2591_v38, 0.0  ;;  %v2600_v55 = vmul.f32 %v5390_v22, %v5125_v30  ;;  %v2610_v60 = vrot.slane %v5390_v22, 4  ;;  %v2344_v2 = vpop.f32.mrb[15].mxu1 }
 0x803   : > { %v2542_v5 = vadd.f32 %v2541_v31, %v2540_v62  ;;  %v2553_v24 = vrot.slane %v2552_v57, 2  ;;  %v2563_v42 = vadd.f32 %v2562_v45, %v2561_v6  ;;  %v2574_v43 = vrot.slane %v2573_v37, 2 }
 0x804   : > { %v2582_v20 = vadd.f32 %v2581_v1, %v2580_v0  ;;  %v2593_v53 = vrot.slane %v2592_v56, 4  ;;  %v2601_v7 = vsel %vm317_vm0, %v2600_v55, 0.0  ;;  %v2612_v18 = vmul.f32 %v2610_v60, %v5125_v30 }
 0x805   : > { %v2543_v27 = vrot.slane %v2542_v5, 1  ;;  %v2554_v19 = vadd.f32 %v2553_v24, %v2552_v57  ;;  %v2564_v33 = vrot.slane %v2563_v42, 1  ;;  %v2575_v16 = vadd.f32 %v2574_v43, %v2573_v37  ;;  %v5398_v49 = vpop.f32.mrb[16].mxu1 }
 0x806   : > { %v2583_v14 = vrot.slane %v2582_v20, 2  ;;  %v2594_v41 = vadd.f32 %v2593_v53, %v2592_v56  ;;  %v2602_v32 = vrot.slane %v2601_v7, 4  ;;  %v2613_v63 = vsel %vm317_vm0, %v2612_v18, 0.0  ;;  %v2349_v15 = vpop.f32.mrb[17].mxu1 }
 0x807   : > { %v2544_v59 = vadd.f32 %v2543_v27, %v2542_v5  ;;  %v2555_v44 = vrot.slane %v2554_v19, 1  ;;  %v2576_v50 = vrot.slane %v2575_v16, 1  ;;  %v2614_v34 = vrot.slane %v2613_v63, 4 }
 0x808   : > { %v2584_v52 = vadd.f32 %v2583_v14, %v2582_v20  ;;  %v2595_v10 = vrot.slane %v2594_v41, 2  ;;  %v2603_v62 = vadd.f32 %v2602_v32, %v2601_v7  ;;  %v2565_v0 = vadd.f32 %v2564_v33, %v2563_v42 }
 0x809   : > { %v5401_v6 = vmul.f32 0.5, %v2544_v59  ;;  %v2556_v26 = vadd.f32 %v2555_v44, %v2554_v19  ;;  %v2615_v45 = vadd.f32 %v2614_v34, %v2613_v63  ;;  %v2577_v56 = vadd.f32 %v2576_v50, %v2575_v16 }
 0x80a   : > { %v2585_v38 = vrot.slane %v2584_v52, 1  ;;  %v2596_v31 = vadd.f32 %v2595_v10, %v2594_v41  ;;  %v2604_v57 = vrot.slane %v2603_v62, 2  ;;  %v2621_v55 = vmul.f32 %v5398_v49, %v5125_v30 }
 0x80b   : > { %v5403_v37 = vmul.f32 0.5, %v2556_v26  ;;  %v2647_v1 = vmax.f32 %v2646_v51, %v5401_v6  ;;  %v2616_v5 = vrot.slane %v2615_v45, 2  ;;  %v5411_v24 = vmul.f32 0.5, %v2565_v0 }
 0x80c   : > { %v2597_v60 = vrot.slane %v2596_v31, 1  ;;  %v2605_v2 = vadd.f32 %v2604_v57, %v2603_v62  ;;  %v2586_v43 = vadd.f32 %v2585_v38, %v2584_v52  ;;  %v2622_v20 = vsel %vm317_vm0, %v2621_v55, 0.0 }
 0x80d   : > { %v2648_v42 = vmax.f32 %v2647_v1, %v5403_v37  ;;  %v2617_v7 = vadd.f32 %v2616_v5, %v2615_v45  ;;  %v5415_v18 = vmul.f32 0.5, %v2577_v56  ;;  %v2623_v27 = vrot.slane %v2622_v20, 4 }
 0x80e   : > { %v2606_v53 = vrot.slane %v2605_v2, 1  ;;  %v2598_v51 = vadd.f32 %v2597_v60, %v2596_v31  ;;  %v5418_v30 = vmul.f32 0.5, %v2586_v43 }
 0x80f   : > { %v2649_v40 = vmax.f32 %v2648_v42, %v5411_v24  ;;  %v2618_v19 = vrot.slane %v2617_v7, 1  ;;  %v2624_v14 = vadd.f32 %v2623_v27, %v2622_v20 }
 0x810   : > { %v2607_v16 = vadd.f32 %v2606_v53, %v2605_v2  ;;  %v5421_v41 = vmul.f32 0.5, %v2598_v51 }
 0x811   : > { %v2650_v33 = vmax.f32 %v2649_v40, %v5415_v18  ;;  %v2619_v63 = vadd.f32 %v2618_v19, %v2617_v7  ;;  %v2625_v15 = vrot.slane %v2624_v14, 2 }
 0x812   : > { %v5424_v59 = vmul.f32 0.5, %v2607_v16 }
 0x813   : > { %v2651_v32 = vmax.f32 %v2650_v33, %v5418_v30  ;;  %v2626_v50 = vadd.f32 %v2625_v15, %v2624_v14  ;;  %v5427_v52 = vmul.f32 0.5, %v2619_v63  ;;  %v5734_v15 = vld [vmem:[#allocation16_spill] sm:$0xff] }
 0x815   : > { %v2652_v44 = vmax.f32 %v2651_v32, %v5421_v41  ;;  %v2627_v62 = vrot.slane %v2626_v50, 1 }
 0x817   : > { %v2653_v10 = vmax.f32 %v2652_v44, %v5424_v59  ;;  %v2628_v26 = vadd.f32 %v2627_v62, %v2626_v50 }
 0x819   : > { %v2654_v34 = vmax.f32 %v2653_v10, %v5427_v52  ;;  %v5431_v0 = vmul.f32 0.5, %v2628_v26 }
 0x81b   : > { %v5434_v38 = vmax.f32 %v2654_v34, %v5431_v0  ;;  %v5735_v34 = vld [vmem:[#allocation18_spill] sm:$0xff] }
 0x81d   : > { %v2656_v31 = vsub.f32 %v5187_v39, %v5434_v38  ;;  %v2659_v57 = vsub.f32 %v5189_v11, %v5434_v38  ;;  %v2662_v45 = vsub.f32 %v5191_v12, %v5434_v38  ;;  %v2665_v1 = vsub.f32 %v5197_v9, %v5434_v38 }
 0x81e   : > { %v2668_v56 = vsub.f32 %v5201_v48, %v5434_v38  ;;  %v2671_v55 = vsub.f32 %v5212_v25, %v5434_v38  ;;  %v2674_v60 = vsub.f32 %v5207_v17, %v5434_v38  ;;  %v2677_v39 = vsub.f32 %v5214_v58, %v5434_v38 }
 0x81f   : > { %v2657_v2 = vmul.f32 1.442695, %v2656_v31  ;;  %v2660_v11 = vmul.f32 1.442695, %v2659_v57  ;;  %v2663_v5 = vmul.f32 1.442695, %v2662_v45  ;;  %v2680_v12 = vsub.f32 %v5231_v4, %v5434_v38 }
 0x820   : > { %v2666_v42 = vmul.f32 1.442695, %v2665_v1  ;;  %v2683_v9 = vsub.f32 %v5228_v23, %v5434_v38  ;;  %v2669_v48 = vmul.f32 1.442695, %v2668_v56  ;;  %v2672_v43 = vmul.f32 1.442695, %v2671_v55 }
 0x821   : > { %3414 = vpow2.f32 %v2657_v2  ;;  %v2675_v25 = vmul.f32 1.442695, %v2674_v60  ;;  %v2686_v17 = vsub.f32 %v5236_v36, %v5434_v38  ;;  %v2689_v58 = vsub.f32 %v5241_v8, %v5434_v38  ;;  %v5736_v56 = vld [vmem:[#allocation20_spill] sm:$0xff] }
 0x822   : > { %3416 = vpow2.f32 %v2660_v11  ;;  %v2692_v20 = vsub.f32 %v5251_v13, %v5434_v38  ;;  %v2695_v4 = vsub.f32 %v5253_v61, %v5434_v38  ;;  %v2698_v23 = vsub.f32 %v5257_v21, %v5434_v38 }
 0x823   : > { %3418 = vpow2.f32 %v2663_v5  ;;  %v2678_v53 = vmul.f32 1.442695, %v2677_v39  ;;  %v2701_v7 = vsub.f32 %v5271_v46, %v5434_v38  ;;  %v2681_v36 = vmul.f32 1.442695, %v2680_v12 }
 0x824   : > { %3420 = vpow2.f32 %v2666_v42  ;;  %v2684_v40 = vmul.f32 1.442695, %v2683_v9  ;;  %v2687_v8 = vmul.f32 1.442695, %v2686_v17  ;;  %v2704_v51 = vsub.f32 %v5275_v3, %v5434_v38  ;;  %v5737_v9 = vld [vmem:[#allocation22_spill] sm:$0xff] }
 0x825   : > { %3422 = vpow2.f32 %v2669_v48  ;;  %v2707_v13 = vsub.f32 %v5284_v47, %v5434_v38  ;;  %v2710_v61 = vsub.f32 %v5401_v6, %v5434_v38  ;;  %v2713_v21 = vsub.f32 %v5403_v37, %v5434_v38 }
 0x826   : > { %3424 = vpow2.f32 %v2672_v43  ;;  %v2716_v46 = vsub.f32 %v5411_v24, %v5434_v38  ;;  %v2690_v27 = vmul.f32 1.442695, %v2689_v58  ;;  %v2719_v19 = vsub.f32 %v5415_v18, %v5434_v38 }
 0x827   : > { %3426 = vpow2.f32 %v2675_v25  ;;  %v2693_v3 = vmul.f32 1.442695, %v2692_v20  ;;  %v2696_v33 = vmul.f32 1.442695, %v2695_v4  ;;  %v2699_v47 = vmul.f32 1.442695, %v2698_v23 }
 0x828   : > { %3428 = vpow2.f32 %v2678_v53  ;;  %v2722_v16 = vsub.f32 %v5418_v30, %v5434_v38  ;;  %v2725_v6 = vsub.f32 %v5421_v41, %v5434_v38  ;;  %v2728_v24 = vsub.f32 %v5424_v59, %v5434_v38 }
 0x829   : > { %3430 = vpow2.f32 %v2681_v36  ;;  %v2731_v14 = vsub.f32 %v5427_v52, %v5434_v38  ;;  %v2734_v18 = vsub.f32 %v5431_v0, %v5434_v38  ;;  %v2702_v63 = vmul.f32 1.442695, %v2701_v7 }
 0x82a   : > { %3432 = vpow2.f32 %v2684_v40  ;;  %v2705_v50 = vmul.f32 1.442695, %v2704_v51  ;;  %v2708_v41 = vmul.f32 1.442695, %v2707_v13  ;;  %v2711_v10 = vmul.f32 1.442695, %v2710_v61 }
 0x82b   : > { %v3415_v37 = vpop.eup %3414  ;;  %3434 = vpow2.f32 %v2687_v8  ;;  %v2714_v0 = vmul.f32 1.442695, %v2713_v21  ;;  %v2717_v38 = vmul.f32 1.442695, %v2716_v46  ;;  %v2720_v2 = vmul.f32 1.442695, %v2719_v19 }
 0x82c   : > { %v3417_v32 = vpop.eup %3416  ;;  %3436 = vpow2.f32 %v2690_v27  ;;  %v2768_v44 = vmul.f32 %v3415_v37, %v5734_v15  ;;  %v2723_v11 = vmul.f32 1.442695, %v2722_v16  ;;  %v2726_v17 = vmul.f32 1.442695, %v2725_v6  ;;  %v5738_v51 = vld [vmem:[#allocation17_spill] sm:$0xff] }
 0x82d   : > { %v3419_v30 = vpop.eup %3418  ;;  %3438 = vpow2.f32 %v2693_v3  ;;  %v2770_v59 = vmul.f32 %v3417_v32, %v5734_v15  ;;  %v2738_v52 = vadd.f32 %v3417_v32, %v3415_v37  ;;  %v2729_v40 = vmul.f32 1.442695, %v2728_v24 }
 0x82e   : > { %v3421_v62 = vpop.eup %3420  ;;  %3440 = vpow2.f32 %v2696_v33  ;;  %v2775_v26 = vmul.f32 %v3419_v30, %v5735_v34  ;;  %v2732_v8 = vmul.f32 1.442695, %v2731_v14  ;;  %v2735_v3 = vmul.f32 1.442695, %v2734_v18  ;;  %v5739_v33 = vld [vmem:[#allocation19_spill] sm:$0xff]  ;;  %v5740_v14 = vld [vmem:[#allocation21_spill] sm:$0xff] }
 0x82f   : > { %v3423_v31 = vpop.eup %3422  ;;  %3442 = vpow2.f32 %v2699_v47  ;;  %v2777_v57 = vmul.f32 %v3421_v62, %v5735_v34  ;;  %v2772_v1 = vrot.slane %v2770_v59, 4  ;;  %v2739_v60 = vadd.f32 %v3419_v30, %v2738_v52  ;;  %v5741_v18 = vld [vmem:[#allocation23_spill] sm:$0xff] }
 0x830   : > { %v3425_v45 = vpop.eup %3424  ;;  %3444 = vpow2.f32 %v2702_v63  ;;  %v2782_v55 = vmul.f32 %v3423_v31, %v5736_v56 }
 0x831   : > { %v3427_v39 = vpop.eup %3426  ;;  %3446 = vpow2.f32 %v2705_v50  ;;  %v2784_v5 = vmul.f32 %v3425_v45, %v5736_v56  ;;  %v2774_v42 = vadd.f32 %v2772_v1, %v2768_v44  ;;  %v2740_v43 = vadd.f32 %v3421_v62, %v2739_v60 }
 0x832   : > { %v3429_v12 = vpop.eup %3428  ;;  %3448 = vpow2.f32 %v2708_v41  ;;  %v2789_v48 = vmul.f32 %v3427_v39, %v5737_v9  ;;  %v2779_v58 = vrot.slane %v2777_v57, 4 }
 0x833   : > { %v3431_v25 = vpop.eup %3430  ;;  %3450 = vpow2.f32 %v2711_v10  ;;  %v2791_v20 = vmul.f32 %v3429_v12, %v5737_v9  ;;  %v2776_v23 = vadd.f32 %v2775_v26, %v2774_v42  ;;  %v2741_v7 = vadd.f32 %v3423_v31, %v2740_v43  ;;  %v5742_v31 = vld [vmem:[#allocation24_spill] sm:$0xff] }
 0x834   : > { %v3433_v4 = vpop.eup %3432  ;;  %3452 = vpow2.f32 %v2714_v0  ;;  %v2796_v53 = vmul.f32 %v3431_v25, %v5178_v54  ;;  %v2786_v6 = vrot.slane %v2784_v5, 4 }
 0x835   : > { %v3435_v36 = vpop.eup %3434  ;;  %3454 = vpow2.f32 %v2717_v38  ;;  %v2798_v13 = vmul.f32 %v3433_v4, %v5738_v51  ;;  %v2781_v21 = vadd.f32 %v2779_v58, %v2776_v23  ;;  %v2742_v27 = vadd.f32 %v3425_v45, %v2741_v7 }
 0x836   : > { %v3437_v61 = vpop.eup %3436  ;;  %3456 = vpow2.f32 %v2720_v2  ;;  %v2800_v46 = vmul.f32 %v3435_v36, %v5738_v51  ;;  %v2793_v34 = vrot.slane %v2791_v20, 4 }
 0x837   : > { %v3439_v19 = vpop.eup %3438  ;;  %3458 = vpow2.f32 %v2723_v11  ;;  %v2805_v47 = vmul.f32 %v3437_v61, %v5739_v33  ;;  %v2783_v54 = vadd.f32 %v2782_v55, %v2781_v21  ;;  %v2743_v63 = vadd.f32 %v3427_v39, %v2742_v27 }
 0x838   : > { %v3441_v16 = vpop.eup %3440  ;;  %3460 = vpow2.f32 %v2726_v17  ;;  %v2807_v37 = vmul.f32 %v3439_v19, %v5739_v33  ;;  %v2802_v43 = vrot.slane %v2800_v46, 4 }
 0x839   : > { %v3443_v24 = vpop.eup %3442  ;;  %3462 = vpow2.f32 %v2729_v40  ;;  %v2812_v32 = vmul.f32 %v3441_v16, %v5740_v14  ;;  %v2788_v44 = vadd.f32 %v2786_v6, %v2783_v54  ;;  %v2744_v10 = vadd.f32 %v3429_v12, %v2743_v63 }
 0x83a   : > { %v3445_v15 = vpop.eup %3444  ;;  %3464 = vpow2.f32 %v2732_v8  ;;  %v2814_v30 = vmul.f32 %v3443_v24, %v5740_v14 }
 0x83b   : > { %v3447_v50 = vpop.eup %3446  ;;  %3466 = vpow2.f32 %v2735_v3  ;;  %v2819_v41 = vmul.f32 %v3445_v15, %v5741_v18  ;;  %v2790_v59 = vadd.f32 %v2789_v48, %v2788_v44  ;;  %v2745_v38 = vadd.f32 %v3431_v25, %v2744_v10 }
 0x83c   : > { %v3449_v62 = vpop.eup %3448  ;;  %v2821_v26 = vmul.f32 %v3447_v50, %v5741_v18  ;;  %v2816_v27 = vrot.slane %v2814_v30, 4 }
 0x83d   : > { %v3451_v52 = vpop.eup %3450  ;;  %v2826_v0 = vmul.f32 %v3449_v62, %v5742_v31  ;;  %v2795_v45 = vadd.f32 %v2793_v34, %v2790_v59  ;;  %v2746_v60 = vadd.f32 %v3433_v4, %v2745_v38 }
 0x83e   : > { %v3453_v57 = vpop.eup %3452  ;;  %v2828_v1 = vmul.f32 %v3451_v52, %v5367_v28  ;;  %v2823_v54 = vrot.slane %v2821_v26, 4 }
 0x83f   : > { %v3455_v56 = vpop.eup %3454  ;;  %v2830_v55 = vmul.f32 %v3453_v57, %v5367_v28  ;;  %v2797_v2 = vadd.f32 %v2796_v53, %v2795_v45  ;;  %v2747_v42 = vadd.f32 %v3435_v36, %v2746_v60 }
 0x840   : > { %v3457_v39 = vpop.eup %3456  ;;  %v2835_v11 = vmul.f32 %v3455_v56, %v5369_v29 }
 0x841   : > { %v3459_v5 = vpop.eup %3458  ;;  %v2837_v12 = vmul.f32 %v3457_v39, %v5369_v29  ;;  %v2799_v48 = vadd.f32 %v2798_v13, %v2797_v2  ;;  %v2748_v20 = vadd.f32 %v3437_v61, %v2747_v42  ;;  %v2809_v29 = vrot.slane %v2807_v37, 4 }
 0x842   : > { %v3461_v9 = vpop.eup %3460  ;;  %v2842_v25 = vmul.f32 %v3459_v5, %v5381_v35 }
 0x843   : > { %v3463_v17 = vpop.eup %3462  ;;  %v2844_v58 = vmul.f32 %v3461_v9, %v5381_v35  ;;  %v2804_v28 = vadd.f32 %v2802_v43, %v2799_v48  ;;  %v2749_v40 = vadd.f32 %v3439_v19, %v2748_v20 }
 0x844   : > { %v3465_v23 = vpop.eup %3464  ;;  %v2849_v4 = vmul.f32 %v3463_v17, %v5390_v22 }
 0x845   : > { %v3467_v53 = vpop.eup %3466  ;;  %v2851_v7 = vmul.f32 %v3465_v23, %v5390_v22  ;;  %v2806_v8 = vadd.f32 %v2805_v47, %v2804_v28  ;;  %v2750_v51 = vadd.f32 %v3441_v16, %v2749_v40  ;;  %v2832_v47 = vrot.slane %v2830_v55, 4 }
 0x846   : > { %v2856_v36 = vmul.f32 %v3467_v53, %v5398_v49 }
 0x847   : > { %v2811_v13 = vadd.f32 %v2809_v29, %v2806_v8  ;;  %v2751_v21 = vadd.f32 %v3443_v24, %v2750_v51  ;;  %v2839_v24 = vrot.slane %v2837_v12, 4  ;;  %v2853_v26 = vrot.slane %v2851_v7, 4 }
 0x849   : > { %v2813_v46 = vadd.f32 %v2812_v32, %v2811_v13  ;;  %v2752_v3 = vadd.f32 %v3445_v15, %v2751_v21 }
 0x84b   : > { %v2818_v35 = vadd.f32 %v2816_v27, %v2813_v46  ;;  %v2753_v61 = vadd.f32 %v3447_v50, %v2752_v3 }
 0x84d   : > { %v2820_v33 = vadd.f32 %v2819_v41, %v2818_v35  ;;  %v2754_v6 = vadd.f32 %v3449_v62, %v2753_v61  ;;  %v2846_v41 = vrot.slane %v2844_v58, 4 }
 0x84f   : > { %v2825_v14 = vadd.f32 %v2823_v54, %v2820_v33  ;;  %v2755_v63 = vadd.f32 %v3451_v52, %v2754_v6 }
 0x851   : > { %v2827_v44 = vadd.f32 %v2826_v0, %v2825_v14  ;;  %v2756_v22 = vadd.f32 %v3453_v57, %v2755_v63 }
 0x853   : > { %v2829_v19 = vadd.f32 %v2828_v1, %v2827_v44  ;;  %v2757_v37 = vadd.f32 %v3455_v56, %v2756_v22 }
 0x855   : > { %v2834_v18 = vadd.f32 %v2832_v47, %v2829_v19  ;;  %v2758_v49 = vadd.f32 %v3457_v39, %v2757_v37 }
 0x857   : > { %v2836_v16 = vadd.f32 %v2835_v11, %v2834_v18  ;;  %v2759_v32 = vadd.f32 %v3459_v5, %v2758_v49 }
 0x859   : > { %v2841_v15 = vadd.f32 %v2839_v24, %v2836_v16  ;;  %v2760_v30 = vadd.f32 %v3461_v9, %v2759_v32 }
 0x85b   : > { %v2843_v50 = vadd.f32 %v2842_v25, %v2841_v15  ;;  %v2761_v10 = vadd.f32 %v3463_v17, %v2760_v30 }
 0x85d   : > { %v2848_v62 = vadd.f32 %v2846_v41, %v2843_v50  ;;  %v2762_v59 = vadd.f32 %v3465_v23, %v2761_v10 }
 0x85f   : > { %v2850_v34 = vadd.f32 %v2849_v4, %v2848_v62  ;;  %v2763_v52 = vadd.f32 %v3467_v53, %v2762_v59 }
 0x861   : > { %v2855_v31 = vadd.f32 %v2853_v26, %v2850_v34  ;;  %3468 = vrcp.f32 %v2763_v52 }
 0x863   : > { %v2857_v0 = vadd.f32 %v2856_v36, %v2855_v31 }
 0x86b   : > { %v3469_v38 = vpop.eup %3468 }
 0x86c   : > { %v2765_v57 = vmul.f32 %v3469_v38, %v2763_v52 }
 0x86e   : > { %v2766_v45 = vsub.f32 2.0, %v2765_v57 }
 0x870   : > { %v2767_v1 = vmul.f32 %v3469_v38, %v2766_v45 }
 0x872   : > { %v2858_v56 = vmul.f32 %v2857_v0, %v2767_v1 }
 0x874   : > { %2859 = vst [vmem:[%s274_s6] sm:$0xf] %v2858_v56 }
 0x875   : > { %3483 = shalt.err (!%p3480_p11)
}
 0x876   : > { %s3484_s24 = scalar_lea.hbm %s5523_s10, 64  ;;  %s3488_s29 = scalar_lea.hbm %s5580_s3, 256 }
 0x877   : > { %p3485_p12 = scmp.ne.s32.totalorder %s5523_s10, %s3484_s24  ;;  %p3489_p1 = scmp.lt.u32.totalorder %s5523_s10, %s5580_s3 }
 0x878   : > { %p3490_p2 = scmp.lt.u32.totalorder %s3488_s29, %s3484_s24  ;;  %p3492_p4 = scmp.lt.u32.totalorder %s3484_s24, %s5523_s10 }
 0x879   : > { %p3486_p13 = pnand %p3485_p12, %p3649_p8 }
 0x87a   : > { %p3491_p3 = por %p3490_p2, %p3489_p1 }
 0x87b   : > { %p3487_p0 = pneg %p3486_p13 }
 0x87c   : > { %p3493_p5 = por %p3492_p4, %p3491_p3 }
 0x87e   : > { %p3494_p6 = pnand %p3493_p5, %p3487_p0 }
 0x880   : > { %3497 = shalt.err (!%p3494_p6)
}
 0x881   : > { %3335 = dma.vmem_to_hbm [thread:$0]  (%p3649_p8), %s5525_s7, 64, %s5523_s10, %s2861_s16  }
 0x882 PF: > { %p3341_p7 = scmp.ge.s32.totalorder %s3564_s19, 2  ;;  %s2888_s6 = sand.u32 1, %s3536_s12  }
 0x883   : > { %s2889_s8 = scalar_lea.sflag [#allocation4], %s2888_s6 }
 0x884   : > { %p3338_p10 = pnand %p3341_p7, %p3653_p9 }
 0x886   : > { %3531 = dma.done.wait (!%p3338_p10), %s2889_s8, 64  }
 0x887   : > { %3533 = vsyncadd (!%p3338_p10), %s2889_s8, 4294967232  ;;  %s16_s19 = sadd.s32 1, %s3564_s19   ;;  %s5743_s12 = smov %s3540_s13 }
 0x888   : > { %p13_p11 = scmp.ge.s32.totalorder %s16_s19, 6   ;;  %s5744_s13 = smov %s3544_s14 }
 0x889   : > { %s5745_s14 = smov %s3661_s4  ;;  %s5746_s15 = smov %s3556_s17 }
 0x88a   : > { %s5747_s16 = smov %s3560_s18  ;;  %s5748_s17 = smov %s5751_s22 }
 0x88b   : > { %s5749_s18 = smov %s5755_s23  ;;  %15 = sbr.rel (!%p13_p11) target bundleno = 5 (0x5), region = 116 }
 0x892   :  { %2894 = vsyncpa [#allocation4], 1 }
 0x893   :  { %2896 = vsyncpa [#allocation4 + $0x1], 1 }

</bundles_post_ra>
